<compile_context>
chip_gen: v7x
topology: tpu7x:2x2x1
jax: 0.10.0
libtpu: 0.0.40
codegen_flags: <defaults>
</compile_context>

<pallas_src>
import functools

import jax
import jax.numpy as jnp
from jax.experimental import pallas as pl
from jax.experimental.pallas import tpu as pltpu

FEAT_DIM = 256
NORM_DIM = 768
FLATTEN_SHAPE = 3072  # C*D*H*W = 3*4*16*16
HEAD_PAD = 128        # lane-dense padded width for the two classifier heads
N_ACTION = 8
N_OFFENCE = 4
LN_EPS = 1e-5

# Row indices inside the stacked (13, 256) "vecs" parameter slab.
ROW_DB_B, ROW_DB_G, ROW_DB_BE = 0, 1, 2
ROW_IN_G, ROW_IN_BE, ROW_IN_B1, ROW_IN_B2 = 3, 4, 5, 6
ROW_FA_G, ROW_FA_BE, ROW_FA_B1 = 7, 8, 9
ROW_FO_G, ROW_FO_BE, ROW_FO_B1 = 10, 11, 12
N_VEC_ROWS = 13

# Column offsets inside the stacked (256, 1024) "mats" parameter slab.
MAT_IN_W1, MAT_IN_W2, MAT_FA_W1, MAT_FO_W1 = 0, 1, 2, 3


# ----------------------------------------------------------------------------
# In-kernel helpers
# ----------------------------------------------------------------------------
def _layernorm(x, gamma, beta, eps=LN_EPS):
    mu = jnp.mean(x, axis=-1, keepdims=True)
    xc = x - mu
    var = jnp.mean(xc * xc, axis=-1, keepdims=True)
    inv = jax.lax.rsqrt(var + eps)
    return xc * inv * gamma + beta


# ----------------------------------------------------------------------------
# Fused kernel: backbone (tiled over K) + full post-backbone epilogue
# ----------------------------------------------------------------------------
def fused_kernel(B, V,
                 x_ref, bkw_ref, bkb_ref, dbw_ref,
                 vec_ref, mat_ref, hw2_ref, hb2_ref,
                 aux_ref, heads_ref,
                 acc_ref, pool_ref):
    k = pl.program_id(0)

    # ---- backbone stand-in: accumulate (B*V, 3072) @ (3072, 768) over K ----
    @pl.when(k == 0)
    def _():
        # initialize the accumulator with the broadcast bias (saves the
        # epilogue add and the zero fill)
        acc_ref[...] = jnp.broadcast_to(bkb_ref[...], acc_ref.shape)

    acc_ref[...] += jnp.dot(x_ref[...], bkw_ref[...],
                            preferred_element_type=jnp.float32)

    # ---- epilogue: everything downstream, only on the last K step ----------
    @pl.when(k == pl.num_programs(0) - 1)
    def _():
        feats = acc_ref[...]                                         # (B*V, 768) f32

        def vec(row):                                                # (1, 256)
            return vec_ref[row:row + 1, :]

        def mat(i):                                                  # (256, 256)
            return mat_ref[:, i * FEAT_DIM:(i + 1) * FEAT_DIM]

        # drop_block: Linear(768->256) + LayerNorm(256)   (Dropout = identity)
        h = jnp.dot(feats, dbw_ref[...],
                    preferred_element_type=jnp.float32) + vec(ROW_DB_B)
        h = _layernorm(h, vec(ROW_DB_G), vec(ROW_DB_BE))             # (B*V, 256)
        aux_ref[...] = h.astype(aux_ref.dtype)

        # aggregation (agr_type='max'): max over the view axis -> (B, 256)
        for b in range(B):
            blk = aux_ref[b * V:(b + 1) * V, :]                      # (V, 256)
            pool_ref[b:b + 1, :] = jnp.max(blk, axis=0, keepdims=True)
        pooled = pool_ref[...]                                       # (B, 256)

        # inter: LayerNorm -> Linear -> Linear
        p = _layernorm(pooled, vec(ROW_IN_G), vec(ROW_IN_BE))
        p = jnp.dot(p, mat(MAT_IN_W1),
                    preferred_element_type=jnp.float32) + vec(ROW_IN_B1)
        p = jnp.dot(p, mat(MAT_IN_W2),
                    preferred_element_type=jnp.float32) + vec(ROW_IN_B2)

        # fc_action / fc_offence heads (separate LN + Linear1, fused output
        # projection into one lane-dense padded (B, 128) slab)
        ha = _layernorm(p, vec(ROW_FA_G), vec(ROW_FA_BE))
        ha = jnp.dot(ha, mat(MAT_FA_W1),
                     preferred_element_type=jnp.float32) + vec(ROW_FA_B1)
        ho = _layernorm(p, vec(ROW_FO_G), vec(ROW_FO_BE))
        ho = jnp.dot(ho, mat(MAT_FO_W1),
                     preferred_element_type=jnp.float32) + vec(ROW_FO_B1)

        out = (jnp.dot(ha, hw2_ref[:FEAT_DIM, :],
                       preferred_element_type=jnp.float32)
               + jnp.dot(ho, hw2_ref[FEAT_DIM:, :],
                         preferred_element_type=jnp.float32)
               + hb2_ref[...])
        heads_ref[...] = out.astype(heads_ref.dtype)


# ----------------------------------------------------------------------------
# Parameter initialization (shapes as in VideoMAENetwork.__init__)
# ----------------------------------------------------------------------------
def init_params(key):
    ks = jax.random.split(key, 16)

    def normal(k, shape, std):
        return (std * jax.random.normal(k, shape)).astype(jnp.float32)

    def kaiming(k, fan_in, fan_out):
        # nn.init.kaiming_normal_ (fan_in, leaky_relu a=0): std = sqrt(2/fan_in)
        std = (2.0 / fan_in) ** 0.5
        return normal(k, (fan_in, fan_out), std)

    p = {}
    # backbone stand-in: Linear(3072 -> 768); streamed in bf16 (HBM-bound)
    p["bk_w"] = normal(ks[0], (FLATTEN_SHAPE, NORM_DIM),
                       (1.0 / FLATTEN_SHAPE) ** 0.5).astype(jnp.bfloat16)
    p["bk_b"] = jnp.zeros((1, NORM_DIM), jnp.float32)
    # drop_block: Linear(768 -> 256) + LayerNorm(256)
    p["db_w"] = normal(ks[1], (NORM_DIM, FEAT_DIM), (1.0 / NORM_DIM) ** 0.5)
    p["db_b"] = jnp.zeros((1, FEAT_DIM), jnp.float32)
    p["db_g"] = jnp.ones((1, FEAT_DIM), jnp.float32)
    p["db_be"] = jnp.zeros((1, FEAT_DIM), jnp.float32)
    # inter: LayerNorm(256), Linear(256,256), Linear(256,256)
    p["in_g"] = jnp.ones((1, FEAT_DIM), jnp.float32)
    p["in_be"] = jnp.zeros((1, FEAT_DIM), jnp.float32)
    p["in_w1"] = normal(ks[2], (FEAT_DIM, FEAT_DIM), (1.0 / FEAT_DIM) ** 0.5)
    p["in_b1"] = jnp.zeros((1, FEAT_DIM), jnp.float32)
    p["in_w2"] = normal(ks[3], (FEAT_DIM, FEAT_DIM), (1.0 / FEAT_DIM) ** 0.5)
    p["in_b2"] = jnp.zeros((1, FEAT_DIM), jnp.float32)
    # fc_action: LayerNorm(256), Linear(256,256), Linear(256,8) -- kaiming, zero bias
    p["fa_g"] = jnp.ones((1, FEAT_DIM), jnp.float32)
    p["fa_be"] = jnp.zeros((1, FEAT_DIM), jnp.float32)
    p["fa_w1"] = kaiming(ks[4], FEAT_DIM, FEAT_DIM)
    p["fa_b1"] = jnp.zeros((1, FEAT_DIM), jnp.float32)
    p["fa_w2"] = kaiming(ks[5], FEAT_DIM, N_ACTION)
    p["fa_b2"] = jnp.zeros((1, N_ACTION), jnp.float32)
    # fc_offence: LayerNorm(256), Linear(256,256), Linear(256,4) -- kaiming, zero bias
    p["fo_g"] = jnp.ones((1, FEAT_DIM), jnp.float32)
    p["fo_be"] = jnp.zeros((1, FEAT_DIM), jnp.float32)
    p["fo_w1"] = kaiming(ks[6], FEAT_DIM, FEAT_DIM)
    p["fo_b1"] = jnp.zeros((1, FEAT_DIM), jnp.float32)
    p["fo_w2"] = kaiming(ks[7], FEAT_DIM, N_OFFENCE)
    p["fo_b2"] = jnp.zeros((1, N_OFFENCE), jnp.float32)
    return p


# ----------------------------------------------------------------------------
# Full forward: one pallas_call for the whole network
# ----------------------------------------------------------------------------
@jax.jit
def video_mae_forward(mvimages, params):
    B, V, C, D, H, W = mvimages.shape
    BV = B * V
    K = C * D * H * W
    tk = 1024
    assert K % tk == 0, "reduction dim must be a multiple of the K tile"

    # batch_tensor(dim=1, squeeze=True) + flatten; bf16 activations so the
    # backbone matmul sees homogeneous bf16 MXU operands (f32 accumulation).
    x = mvimages.reshape(BV, K).astype(jnp.bfloat16)

    # ---- consolidated constant slabs (few large DMAs instead of many tiny) --
    # (13, 256): all LayerNorm gammas/betas + Linear biases of the epilogue
    vecs = jnp.concatenate([
        params["db_b"], params["db_g"], params["db_be"],
        params["in_g"], params["in_be"], params["in_b1"], params["in_b2"],
        params["fa_g"], params["fa_be"], params["fa_b1"],
        params["fo_g"], params["fo_be"], params["fo_b1"],
    ], axis=0)
    # (256, 1024): the four square (256,256) weights, lane-concatenated
    mats = jnp.concatenate([params["in_w1"], params["in_w2"],
                            params["fa_w1"], params["fo_w1"]], axis=1)
    # (512, 128): lane-dense padded head projections
    #   rows [0,256)  -> fc_action  Linear(256,8)  in cols [0,8)
    #   rows [256,512)-> fc_offence Linear(256,4)  in cols [8,12)
    hw2 = jnp.zeros((2 * FEAT_DIM, HEAD_PAD), jnp.float32)
    hw2 = hw2.at[:FEAT_DIM, :N_ACTION].set(params["fa_w2"])
    hw2 = hw2.at[FEAT_DIM:, N_ACTION:N_ACTION + N_OFFENCE].set(params["fo_w2"])
    hb2 = jnp.zeros((1, HEAD_PAD), jnp.float32)
    hb2 = hb2.at[:, :N_ACTION].set(params["fa_b2"])
    hb2 = hb2.at[:, N_ACTION:N_ACTION + N_OFFENCE].set(params["fo_b2"])

    kernel = functools.partial(fused_kernel, B, V)

    aux_flat, heads = pl.pallas_call(
        kernel,
        out_shape=(jax.ShapeDtypeStruct((BV, FEAT_DIM), jnp.float32),
                   jax.ShapeDtypeStruct((B, HEAD_PAD), jnp.float32)),
        grid_spec=pltpu.PrefetchScalarGridSpec(
            num_scalar_prefetch=0,
            grid=(K // tk,),
            in_specs=[
                pl.BlockSpec((BV, tk), lambda k: (0, k)),                 # x, streamed over K
                pl.BlockSpec((tk, NORM_DIM), lambda k: (k, 0)),           # bk_w, streamed over K
                pl.BlockSpec((1, NORM_DIM), lambda k: (0, 0)),            # bk_b
                pl.BlockSpec((NORM_DIM, FEAT_DIM), lambda k: (0, 0)),     # db_w
                pl.BlockSpec((N_VEC_ROWS, FEAT_DIM), lambda k: (0, 0)),   # vecs
                pl.BlockSpec((FEAT_DIM, 4 * FEAT_DIM), lambda k: (0, 0)),  # mats
                pl.BlockSpec((2 * FEAT_DIM, HEAD_PAD), lambda k: (0, 0)),  # hw2
                pl.BlockSpec((1, HEAD_PAD), lambda k: (0, 0)),            # hb2
            ],
            out_specs=[
                pl.BlockSpec((BV, FEAT_DIM), lambda k: (0, 0)),           # aux
                pl.BlockSpec((B, HEAD_PAD), lambda k: (0, 0)),            # padded heads
            ],
            scratch_shapes=[
                pltpu.VMEM((BV, NORM_DIM), jnp.float32),   # backbone accumulator
                pltpu.VMEM((B, FEAT_DIM), jnp.float32),    # view-max pool buffer
            ],
        ),
        compiler_params=pltpu.CompilerParams(
            dimension_semantics=("arbitrary",),
            vmem_limit_bytes=32 * 1024 * 1024,
        ),
    )(x, params["bk_w"], params["bk_b"], params["db_w"], vecs, mats, hw2, hb2)

    # unbatch_tensor + identity lifting_net
    aux = aux_flat.reshape(B, V, FEAT_DIM)
    pred_action = heads[:, :N_ACTION]
    pred_offence_severity = heads[:, N_ACTION:N_ACTION + N_OFFENCE]
    return pred_offence_severity, pred_action, aux


# ----------------------------------------------------------------------------
if __name__ == "__main__":
    key = jax.random.PRNGKey(0)
    k_in, k_par = jax.random.split(key)

    # (B, V, C, D, H, W) with C*D*H*W == flatten_shape == 3072
    B, V, C, D, H, W = 2, 2, 3, 4, 16, 16
    mvimages = jax.random.normal(k_in, (B, V, C, D, H, W), dtype=jnp.float32)

    params = init_params(k_par)

    off, act, aux = video_mae_forward(mvimages, params)
    jax.block_until_ready((off, act, aux))

    assert off.shape == (B, 4)
    assert act.shape == (B, 8)
    assert aux.shape == (B, V, FEAT_DIM)
    assert jnp.all(jnp.isfinite(off))
    assert jnp.all(jnp.isfinite(act))
    assert jnp.all(jnp.isfinite(aux))

    print("KERNEL_OK")
</pallas_src>

<mosaic_0001>
module attributes {stable_mosaic.version = 11 : i64} {
  func.func @fused_kernel(%arg0: i32, %arg1: memref<4x1024xbf16, #tpu.memory_space<vmem>>, %arg2: memref<1024x768xbf16, #tpu.memory_space<vmem>>, %arg3: memref<1x768xf32, #tpu.memory_space<vmem>>, %arg4: memref<768x256xf32, #tpu.memory_space<vmem>>, %arg5: memref<13x256xf32, #tpu.memory_space<vmem>>, %arg6: memref<256x1024xf32, #tpu.memory_space<vmem>>, %arg7: memref<512x128xf32, #tpu.memory_space<vmem>>, %arg8: memref<1x128xf32, #tpu.memory_space<vmem>>, %arg9: memref<4x256xf32, #tpu.memory_space<vmem>>, %arg10: memref<2x128xf32, #tpu.memory_space<vmem>>, %arg11: memref<4x768xf32, #tpu.memory_space<vmem>>, %arg12: memref<2x256xf32, #tpu.memory_space<vmem>>) attributes {dimension_semantics = [#tpu.dimension_semantics<arbitrary>], iteration_bounds = array<i64: 3>, scalar_prefetch = 0 : i64, scratch_operands = 2 : i64, tpu.core_type = #tpu.core_type<tc>, window_params = [{transform_indices = @transform_0, window_bounds = array<i64: 4, 1024>}, {transform_indices = @transform_1, window_bounds = array<i64: 1024, 768>}, {pipeline_mode = #tpu.pipeline_mode<synchronous>, transform_indices = @transform_2, window_bounds = array<i64: 1, 768>}, {pipeline_mode = #tpu.pipeline_mode<synchronous>, transform_indices = @transform_3, window_bounds = array<i64: 768, 256>}, {pipeline_mode = #tpu.pipeline_mode<synchronous>, transform_indices = @transform_4, window_bounds = array<i64: 13, 256>}, {pipeline_mode = #tpu.pipeline_mode<synchronous>, transform_indices = @transform_5, window_bounds = array<i64: 256, 1024>}, {pipeline_mode = #tpu.pipeline_mode<synchronous>, transform_indices = @transform_6, window_bounds = array<i64: 512, 128>}, {pipeline_mode = #tpu.pipeline_mode<synchronous>, transform_indices = @transform_7, window_bounds = array<i64: 1, 128>}, {pipeline_mode = #tpu.pipeline_mode<synchronous>, transform_indices = @transform_8, window_bounds = array<i64: 4, 256>}, {pipeline_mode = #tpu.pipeline_mode<synchronous>, transform_indices = @transform_9, window_bounds = array<i64: 2, 128>}]} {
    %c0_i32 = arith.constant 0 : i32
    %0 = arith.cmpi eq, %arg0, %c0_i32 : i32
    %1 = arith.extui %0 : i1 to i32
    %c0_i32_0 = arith.constant 0 : i32
    %2 = arith.cmpi ne, %1, %c0_i32_0 : i32
    scf.if %2 {
      %c0_9 = arith.constant 0 : index
      %c0_10 = arith.constant 0 : index
      %12 = vector.load %arg3[%c0_9, %c0_10] : memref<1x768xf32, #tpu.memory_space<vmem>>, vector<1x768xf32>
      %13 = vector.shape_cast %12 : vector<1x768xf32> to vector<1x768xf32>
      %14 = vector.broadcast %13 : vector<1x768xf32> to vector<4x768xf32>
      %c0_11 = arith.constant 0 : index
      %c0_12 = arith.constant 0 : index
      %15 = vector.load %arg11[%c0_11, %c0_12] : memref<4x768xf32, #tpu.memory_space<vmem>>, vector<4x768xf32>
      tpu.vector_store %arg11[%c0_11, %c0_12], %14 {strides = array<i32>} : memref<4x768xf32, #tpu.memory_space<vmem>>, vector<4x768xf32>,
    } else {
    }
    %c0 = arith.constant 0 : index
    %c0_1 = arith.constant 0 : index
    %3 = vector.load %arg11[%c0, %c0_1] : memref<4x768xf32, #tpu.memory_space<vmem>>, vector<4x768xf32>
    %c0_2 = arith.constant 0 : index
    %c0_3 = arith.constant 0 : index
    %4 = vector.load %arg1[%c0_2, %c0_3] : memref<4x1024xbf16, #tpu.memory_space<vmem>>, vector<4x1024xbf16>
    %c0_4 = arith.constant 0 : index
    %c0_5 = arith.constant 0 : index
    %5 = vector.load %arg2[%c0_4, %c0_5] : memref<1024x768xbf16, #tpu.memory_space<vmem>>, vector<1024x768xbf16>
    %cst = arith.constant dense<0.000000e+00> : vector<4x768xf32>
    %6 = tpu.matmul %4, %5, %cst {dimension_numbers = #tpu.dot_dimension_numbers<[1], [0], [0], [1], [0, 0, 1, 1], [], []>} : vector<4x1024xbf16>, vector<1024x768xbf16>, vector<4x768xf32> -> vector<4x768xf32>
    %7 = arith.addf %3, %6 : vector<4x768xf32>
    %c0_6 = arith.constant 0 : index
    %c0_7 = arith.constant 0 : index
    %8 = vector.load %arg11[%c0_6, %c0_7] : memref<4x768xf32, #tpu.memory_space<vmem>>, vector<4x768xf32>
    tpu.vector_store %arg11[%c0_6, %c0_7], %7 {strides = array<i32>} : memref<4x768xf32, #tpu.memory_space<vmem>>, vector<4x768xf32>,
    %c2_i32 = arith.constant 2 : i32
    %9 = arith.cmpi eq, %arg0, %c2_i32 : i32
    %10 = arith.extui %9 : i1 to i32
    %c0_i32_8 = arith.constant 0 : i32
    %11 = arith.cmpi ne, %10, %c0_i32_8 : i32
    scf.if %11 {
      %c0_9 = arith.constant 0 : index
      %c0_10 = arith.constant 0 : index
      %12 = vector.load %arg11[%c0_9, %c0_10] : memref<4x768xf32, #tpu.memory_space<vmem>>, vector<4x768xf32>
      %c0_11 = arith.constant 0 : index
      %c0_12 = arith.constant 0 : index
      %13 = vector.load %arg4[%c0_11, %c0_12] : memref<768x256xf32, #tpu.memory_space<vmem>>, vector<768x256xf32>
      %cst_13 = arith.constant dense<0.000000e+00> : vector<4x256xf32>
      %14 = tpu.matmul %12, %13, %cst_13 {dimension_numbers = #tpu.dot_dimension_numbers<[1], [0], [0], [1], [0, 0, 1, 1], [], []>} : vector<4x768xf32>, vector<768x256xf32>, vector<4x256xf32> -> vector<4x256xf32>
      %c0_14 = arith.constant 0 : index
      %c0_15 = arith.constant 0 : index
      %15 = vector.load %arg5[%c0_14, %c0_15] : memref<13x256xf32, #tpu.memory_space<vmem>>, vector<1x256xf32>
      %16 = vector.broadcast %15 : vector<1x256xf32> to vector<4x256xf32>
      %17 = arith.addf %14, %16 : vector<4x256xf32>
      %c1 = arith.constant 1 : index
      %c0_16 = arith.constant 0 : index
      %18 = vector.load %arg5[%c1, %c0_16] : memref<13x256xf32, #tpu.memory_space<vmem>>, vector<1x256xf32>
      %c2 = arith.constant 2 : index
      %c0_17 = arith.constant 0 : index
      %19 = vector.load %arg5[%c2, %c0_17] : memref<13x256xf32, #tpu.memory_space<vmem>>, vector<1x256xf32>
      %cst_18 = arith.constant dense<0.000000e+00> : vector<4xf32>
      %20 = vector.multi_reduction <add>, %17, %cst_18 [1] : vector<4x256xf32> to vector<4xf32>
      %21 = vector.shape_cast %20 : vector<4xf32> to vector<4x1xf32>
      %cst_19 = arith.constant 2.560000e+02 : f32
      %22 = vector.broadcast %cst_19 : f32 to vector<4x1xf32>
      %23 = arith.divf %21, %22 : vector<4x1xf32>
      %24 = vector.broadcast %23 : vector<4x1xf32> to vector<4x256xf32>
      %25 = arith.subf %17, %24 : vector<4x256xf32>
      %26 = arith.mulf %25, %25 : vector<4x256xf32>
      %cst_20 = arith.constant dense<0.000000e+00> : vector<4xf32>
      %27 = vector.multi_reduction <add>, %26, %cst_20 [1] : vector<4x256xf32> to vector<4xf32>
      %28 = vector.shape_cast %27 : vector<4xf32> to vector<4x1xf32>
      %cst_21 = arith.constant 2.560000e+02 : f32
      %29 = vector.broadcast %cst_21 : f32 to vector<4x1xf32>
      %30 = arith.divf %28, %29 : vector<4x1xf32>
      %cst_22 = arith.constant 9.99999974E-6 : f32
      %31 = vector.broadcast %cst_22 : f32 to vector<4x1xf32>
      %32 = arith.addf %30, %31 : vector<4x1xf32>
      %33 = math.rsqrt %32 : vector<4x1xf32>
      %34 = vector.broadcast %33 : vector<4x1xf32> to vector<4x256xf32>
      %35 = arith.mulf %25, %34 : vector<4x256xf32>
      %36 = vector.broadcast %18 : vector<1x256xf32> to vector<4x256xf32>
      %37 = arith.mulf %35, %36 : vector<4x256xf32>
      %38 = vector.broadcast %19 : vector<1x256xf32> to vector<4x256xf32>
      %39 = arith.addf %37, %38 : vector<4x256xf32>
      %c0_23 = arith.constant 0 : index
      %c0_24 = arith.constant 0 : index
      %40 = vector.load %arg9[%c0_23, %c0_24] : memref<4x256xf32, #tpu.memory_space<vmem>>, vector<4x256xf32>
      tpu.vector_store %arg9[%c0_23, %c0_24], %39 {strides = array<i32>} : memref<4x256xf32, #tpu.memory_space<vmem>>, vector<4x256xf32>,
      %c0_25 = arith.constant 0 : index
      %c0_26 = arith.constant 0 : index
      %41 = vector.load %arg9[%c0_25, %c0_26] : memref<4x256xf32, #tpu.memory_space<vmem>>, vector<2x256xf32>
      %cst_27 = arith.constant dense<0xFF800000> : vector<256xf32>
      %42 = vector.multi_reduction <maximumf>, %41, %cst_27 [0] : vector<2x256xf32> to vector<256xf32>
      %43 = vector.shape_cast %42 : vector<256xf32> to vector<1x256xf32>
      %c0_28 = arith.constant 0 : index
      %c0_29 = arith.constant 0 : index
      %44 = vector.load %arg12[%c0_28, %c0_29] : memref<2x256xf32, #tpu.memory_space<vmem>>, vector<1x256xf32>
      tpu.vector_store %arg12[%c0_28, %c0_29], %43 {strides = array<i32>} : memref<2x256xf32, #tpu.memory_space<vmem>>, vector<1x256xf32>,
      %c2_30 = arith.constant 2 : index
      %c0_31 = arith.constant 0 : index
      %45 = vector.load %arg9[%c2_30, %c0_31] : memref<4x256xf32, #tpu.memory_space<vmem>>, vector<2x256xf32>
      %cst_32 = arith.constant dense<0xFF800000> : vector<256xf32>
      %46 = vector.multi_reduction <maximumf>, %45, %cst_32 [0] : vector<2x256xf32> to vector<256xf32>
      %47 = vector.shape_cast %46 : vector<256xf32> to vector<1x256xf32>
      %c1_33 = arith.constant 1 : index
      %c0_34 = arith.constant 0 : index
      %48 = vector.load %arg12[%c1_33, %c0_34] : memref<2x256xf32, #tpu.memory_space<vmem>>, vector<1x256xf32>
      tpu.vector_store %arg12[%c1_33, %c0_34], %47 {strides = array<i32>} : memref<2x256xf32, #tpu.memory_space<vmem>>, vector<1x256xf32>,
      %c0_35 = arith.constant 0 : index
      %c0_36 = arith.constant 0 : index
      %49 = vector.load %arg12[%c0_35, %c0_36] : memref<2x256xf32, #tpu.memory_space<vmem>>, vector<2x256xf32>
      %c3 = arith.constant 3 : index
      %c0_37 = arith.constant 0 : index
      %50 = vector.load %arg5[%c3, %c0_37] : memref<13x256xf32, #tpu.memory_space<vmem>>, vector<1x256xf32>
      %c4 = arith.constant 4 : index
      %c0_38 = arith.constant 0 : index
      %51 = vector.load %arg5[%c4, %c0_38] : memref<13x256xf32, #tpu.memory_space<vmem>>, vector<1x256xf32>
      %cst_39 = arith.constant dense<0.000000e+00> : vector<2xf32>
      %52 = vector.multi_reduction <add>, %49, %cst_39 [1] : vector<2x256xf32> to vector<2xf32>
      %53 = vector.shape_cast %52 : vector<2xf32> to vector<2x1xf32>
      %cst_40 = arith.constant 2.560000e+02 : f32
      %54 = vector.broadcast %cst_40 : f32 to vector<2x1xf32>
      %55 = arith.divf %53, %54 : vector<2x1xf32>
      %56 = vector.broadcast %55 : vector<2x1xf32> to vector<2x256xf32>
      %57 = arith.subf %49, %56 : vector<2x256xf32>
      %58 = arith.mulf %57, %57 : vector<2x256xf32>
      %cst_41 = arith.constant dense<0.000000e+00> : vector<2xf32>
      %59 = vector.multi_reduction <add>, %58, %cst_41 [1] : vector<2x256xf32> to vector<2xf32>
      %60 = vector.shape_cast %59 : vector<2xf32> to vector<2x1xf32>
      %cst_42 = arith.constant 2.560000e+02 : f32
      %61 = vector.broadcast %cst_42 : f32 to vector<2x1xf32>
      %62 = arith.divf %60, %61 : vector<2x1xf32>
      %cst_43 = arith.constant 9.99999974E-6 : f32
      %63 = vector.broadcast %cst_43 : f32 to vector<2x1xf32>
      %64 = arith.addf %62, %63 : vector<2x1xf32>
      %65 = math.rsqrt %64 : vector<2x1xf32>
      %66 = vector.broadcast %65 : vector<2x1xf32> to vector<2x256xf32>
      %67 = arith.mulf %57, %66 : vector<2x256xf32>
      %68 = vector.broadcast %50 : vector<1x256xf32> to vector<2x256xf32>
      %69 = arith.mulf %67, %68 : vector<2x256xf32>
      %70 = vector.broadcast %51 : vector<1x256xf32> to vector<2x256xf32>
      %71 = arith.addf %69, %70 : vector<2x256xf32>
      %c0_44 = arith.constant 0 : index
      %c0_45 = arith.constant 0 : index
      %72 = vector.load %arg6[%c0_44, %c0_45] : memref<256x1024xf32, #tpu.memory_space<vmem>>, vector<256x256xf32>
      %cst_46 = arith.constant dense<0.000000e+00> : vector<2x256xf32>
      %73 = tpu.matmul %71, %72, %cst_46 {dimension_numbers = #tpu.dot_dimension_numbers<[1], [0], [0], [1], [0, 0, 1, 1], [], []>} : vector<2x256xf32>, vector<256x256xf32>, vector<2x256xf32> -> vector<2x256xf32>
      %c5 = arith.constant 5 : index
      %c0_47 = arith.constant 0 : index
      %74 = vector.load %arg5[%c5, %c0_47] : memref<13x256xf32, #tpu.memory_space<vmem>>, vector<1x256xf32>
      %75 = vector.broadcast %74 : vector<1x256xf32> to vector<2x256xf32>
      %76 = arith.addf %73, %75 : vector<2x256xf32>
      %c0_48 = arith.constant 0 : index
      %c256 = arith.constant 256 : index
      %77 = vector.load %arg6[%c0_48, %c256] : memref<256x1024xf32, #tpu.memory_space<vmem>>, vector<256x256xf32>
      %cst_49 = arith.constant dense<0.000000e+00> : vector<2x256xf32>
      %78 = tpu.matmul %76, %77, %cst_49 {dimension_numbers = #tpu.dot_dimension_numbers<[1], [0], [0], [1], [0, 0, 1, 1], [], []>} : vector<2x256xf32>, vector<256x256xf32>, vector<2x256xf32> -> vector<2x256xf32>
      %c6 = arith.constant 6 : index
      %c0_50 = arith.constant 0 : index
      %79 = vector.load %arg5[%c6, %c0_50] : memref<13x256xf32, #tpu.memory_space<vmem>>, vector<1x256xf32>
      %80 = vector.broadcast %79 : vector<1x256xf32> to vector<2x256xf32>
      %81 = arith.addf %78, %80 : vector<2x256xf32>
      %c7 = arith.constant 7 : index
      %c0_51 = arith.constant 0 : index
      %82 = vector.load %arg5[%c7, %c0_51] : memref<13x256xf32, #tpu.memory_space<vmem>>, vector<1x256xf32>
      %c8 = arith.constant 8 : index
      %c0_52 = arith.constant 0 : index
      %83 = vector.load %arg5[%c8, %c0_52] : memref<13x256xf32, #tpu.memory_space<vmem>>, vector<1x256xf32>
      %cst_53 = arith.constant dense<0.000000e+00> : vector<2xf32>
      %84 = vector.multi_reduction <add>, %81, %cst_53 [1] : vector<2x256xf32> to vector<2xf32>
      %85 = vector.shape_cast %84 : vector<2xf32> to vector<2x1xf32>
      %cst_54 = arith.constant 2.560000e+02 : f32
      %86 = vector.broadcast %cst_54 : f32 to vector<2x1xf32>
      %87 = arith.divf %85, %86 : vector<2x1xf32>
      %88 = vector.broadcast %87 : vector<2x1xf32> to vector<2x256xf32>
      %89 = arith.subf %81, %88 : vector<2x256xf32>
      %90 = arith.mulf %89, %89 : vector<2x256xf32>
      %cst_55 = arith.constant dense<0.000000e+00> : vector<2xf32>
      %91 = vector.multi_reduction <add>, %90, %cst_55 [1] : vector<2x256xf32> to vector<2xf32>
      %92 = vector.shape_cast %91 : vector<2xf32> to vector<2x1xf32>
      %cst_56 = arith.constant 2.560000e+02 : f32
      %93 = vector.broadcast %cst_56 : f32 to vector<2x1xf32>
      %94 = arith.divf %92, %93 : vector<2x1xf32>
      %cst_57 = arith.constant 9.99999974E-6 : f32
      %95 = vector.broadcast %cst_57 : f32 to vector<2x1xf32>
      %96 = arith.addf %94, %95 : vector<2x1xf32>
      %97 = math.rsqrt %96 : vector<2x1xf32>
      %98 = vector.broadcast %97 : vector<2x1xf32> to vector<2x256xf32>
      %99 = arith.mulf %89, %98 : vector<2x256xf32>
      %100 = vector.broadcast %82 : vector<1x256xf32> to vector<2x256xf32>
      %101 = arith.mulf %99, %100 : vector<2x256xf32>
      %102 = vector.broadcast %83 : vector<1x256xf32> to vector<2x256xf32>
      %103 = arith.addf %101, %102 : vector<2x256xf32>
      %c0_58 = arith.constant 0 : index
      %c512 = arith.constant 512 : index
      %104 = vector.load %arg6[%c0_58, %c512] : memref<256x1024xf32, #tpu.memory_space<vmem>>, vector<256x256xf32>
      %cst_59 = arith.constant dense<0.000000e+00> : vector<2x256xf32>
      %105 = tpu.matmul %103, %104, %cst_59 {dimension_numbers = #tpu.dot_dimension_numbers<[1], [0], [0], [1], [0, 0, 1, 1], [], []>} : vector<2x256xf32>, vector<256x256xf32>, vector<2x256xf32> -> vector<2x256xf32>
      %c9 = arith.constant 9 : index
      %c0_60 = arith.constant 0 : index
      %106 = vector.load %arg5[%c9, %c0_60] : memref<13x256xf32, #tpu.memory_space<vmem>>, vector<1x256xf32>
      %107 = vector.broadcast %106 : vector<1x256xf32> to vector<2x256xf32>
      %108 = arith.addf %105, %107 : vector<2x256xf32>
      %c10 = arith.constant 10 : index
      %c0_61 = arith.constant 0 : index
      %109 = vector.load %arg5[%c10, %c0_61] : memref<13x256xf32, #tpu.memory_space<vmem>>, vector<1x256xf32>
      %c11 = arith.constant 11 : index
      %c0_62 = arith.constant 0 : index
      %110 = vector.load %arg5[%c11, %c0_62] : memref<13x256xf32, #tpu.memory_space<vmem>>, vector<1x256xf32>
      %cst_63 = arith.constant dense<0.000000e+00> : vector<2xf32>
      %111 = vector.multi_reduction <add>, %81, %cst_63 [1] : vector<2x256xf32> to vector<2xf32>
      %112 = vector.shape_cast %111 : vector<2xf32> to vector<2x1xf32>
      %cst_64 = arith.constant 2.560000e+02 : f32
      %113 = vector.broadcast %cst_64 : f32 to vector<2x1xf32>
      %114 = arith.divf %112, %113 : vector<2x1xf32>
      %115 = vector.broadcast %114 : vector<2x1xf32> to vector<2x256xf32>
      %116 = arith.subf %81, %115 : vector<2x256xf32>
      %117 = arith.mulf %116, %116 : vector<2x256xf32>
      %cst_65 = arith.constant dense<0.000000e+00> : vector<2xf32>
      %118 = vector.multi_reduction <add>, %117, %cst_65 [1] : vector<2x256xf32> to vector<2xf32>
      %119 = vector.shape_cast %118 : vector<2xf32> to vector<2x1xf32>
      %cst_66 = arith.constant 2.560000e+02 : f32
      %120 = vector.broadcast %cst_66 : f32 to vector<2x1xf32>
      %121 = arith.divf %119, %120 : vector<2x1xf32>
      %cst_67 = arith.constant 9.99999974E-6 : f32
      %122 = vector.broadcast %cst_67 : f32 to vector<2x1xf32>
      %123 = arith.addf %121, %122 : vector<2x1xf32>
      %124 = math.rsqrt %123 : vector<2x1xf32>
      %125 = vector.broadcast %124 : vector<2x1xf32> to vector<2x256xf32>
      %126 = arith.mulf %116, %125 : vector<2x256xf32>
      %127 = vector.broadcast %109 : vector<1x256xf32> to vector<2x256xf32>
      %128 = arith.mulf %126, %127 : vector<2x256xf32>
      %129 = vector.broadcast %110 : vector<1x256xf32> to vector<2x256xf32>
      %130 = arith.addf %128, %129 : vector<2x256xf32>
      %c0_68 = arith.constant 0 : index
      %c768 = arith.constant 768 : index
      %131 = vector.load %arg6[%c0_68, %c768] : memref<256x1024xf32, #tpu.memory_space<vmem>>, vector<256x256xf32>
      %cst_69 = arith.constant dense<0.000000e+00> : vector<2x256xf32>
      %132 = tpu.matmul %130, %131, %cst_69 {dimension_numbers = #tpu.dot_dimension_numbers<[1], [0], [0], [1], [0, 0, 1, 1], [], []>} : vector<2x256xf32>, vector<256x256xf32>, vector<2x256xf32> -> vector<2x256xf32>
      %c12 = arith.constant 12 : index
      %c0_70 = arith.constant 0 : index
      %133 = vector.load %arg5[%c12, %c0_70] : memref<13x256xf32, #tpu.memory_space<vmem>>, vector<1x256xf32>
      %134 = vector.broadcast %133 : vector<1x256xf32> to vector<2x256xf32>
      %135 = arith.addf %132, %134 : vector<2x256xf32>
      %c0_71 = arith.constant 0 : index
      %c0_72 = arith.constant 0 : index
      %136 = vector.load %arg7[%c0_71, %c0_72] : memref<512x128xf32, #tpu.memory_space<vmem>>, vector<256x128xf32>
      %cst_73 = arith.constant dense<0.000000e+00> : vector<2x128xf32>
      %137 = tpu.matmul %108, %136, %cst_73 {dimension_numbers = #tpu.dot_dimension_numbers<[1], [0], [0], [1], [0, 0, 1, 1], [], []>} : vector<2x256xf32>, vector<256x128xf32>, vector<2x128xf32> -> vector<2x128xf32>
      %c256_74 = arith.constant 256 : index
      %c0_75 = arith.constant 0 : index
      %138 = vector.load %arg7[%c256_74, %c0_75] : memref<512x128xf32, #tpu.memory_space<vmem>>, vector<256x128xf32>
      %cst_76 = arith.constant dense<0.000000e+00> : vector<2x128xf32>
      %139 = tpu.matmul %135, %138, %cst_76 {dimension_numbers = #tpu.dot_dimension_numbers<[1], [0], [0], [1], [0, 0, 1, 1], [], []>} : vector<2x256xf32>, vector<256x128xf32>, vector<2x128xf32> -> vector<2x128xf32>
      %140 = arith.addf %137, %139 : vector<2x128xf32>
      %c0_77 = arith.constant 0 : index
      %c0_78 = arith.constant 0 : index
      %141 = vector.load %arg8[%c0_77, %c0_78] : memref<1x128xf32, #tpu.memory_space<vmem>>, vector<1x128xf32>
      %142 = vector.broadcast %141 : vector<1x128xf32> to vector<2x128xf32>
      %143 = arith.addf %140, %142 : vector<2x128xf32>
      %c0_79 = arith.constant 0 : index
      %c0_80 = arith.constant 0 : index
      %144 = vector.load %arg10[%c0_79, %c0_80] : memref<2x128xf32, #tpu.memory_space<vmem>>, vector<2x128xf32>
      tpu.vector_store %arg10[%c0_79, %c0_80], %143 {strides = array<i32>} : memref<2x128xf32, #tpu.memory_space<vmem>>, vector<2x128xf32>,
    } else {
    }
    return
  }
  func.func @transform_0(%arg0: i32) -> (i32, i32) {
    %c0_i32 = arith.constant 0 : i32
    %c0_i32_0 = arith.constant 0 : i32
    return %c0_i32, %arg0 : i32, i32
  }
  func.func @transform_1(%arg0: i32) -> (i32, i32) {
    %c0_i32 = arith.constant 0 : i32
    %c0_i32_0 = arith.constant 0 : i32
    return %arg0, %c0_i32 : i32, i32
  }
  func.func @transform_2(%arg0: i32) -> (i32, i32) {
    %c0_i32 = arith.constant 0 : i32
    %c0_i32_0 = arith.constant 0 : i32
    %c0_i32_1 = arith.constant 0 : i32
    return %c0_i32, %c0_i32_0 : i32, i32
  }
  func.func @transform_3(%arg0: i32) -> (i32, i32) {
    %c0_i32 = arith.constant 0 : i32
    %c0_i32_0 = arith.constant 0 : i32
    %c0_i32_1 = arith.constant 0 : i32
    return %c0_i32, %c0_i32_0 : i32, i32
  }
  func.func @transform_4(%arg0: i32) -> (i32, i32) {
    %c0_i32 = arith.constant 0 : i32
    %c0_i32_0 = arith.constant 0 : i32
    %c0_i32_1 = arith.constant 0 : i32
    return %c0_i32, %c0_i32_0 : i32, i32
  }
  func.func @transform_5(%arg0: i32) -> (i32, i32) {
    %c0_i32 = arith.constant 0 : i32
    %c0_i32_0 = arith.constant 0 : i32
    %c0_i32_1 = arith.constant 0 : i32
    return %c0_i32, %c0_i32_0 : i32, i32
  }
  func.func @transform_6(%arg0: i32) -> (i32, i32) {
    %c0_i32 = arith.constant 0 : i32
    %c0_i32_0 = arith.constant 0 : i32
    %c0_i32_1 = arith.constant 0 : i32
    return %c0_i32, %c0_i32_0 : i32, i32
  }
  func.func @transform_7(%arg0: i32) -> (i32, i32) {
    %c0_i32 = arith.constant 0 : i32
    %c0_i32_0 = arith.constant 0 : i32
    %c0_i32_1 = arith.constant 0 : i32
    return %c0_i32, %c0_i32_0 : i32, i32
  }
  func.func @transform_8(%arg0: i32) -> (i32, i32) {
    %c0_i32 = arith.constant 0 : i32
    %c0_i32_0 = arith.constant 0 : i32
    %c0_i32_1 = arith.constant 0 : i32
    return %c0_i32, %c0_i32_0 : i32, i32
  }
  func.func @transform_9(%arg0: i32) -> (i32, i32) {
    %c0_i32 = arith.constant 0 : i32
    %c0_i32_0 = arith.constant 0 : i32
    %c0_i32_1 = arith.constant 0 : i32
    return %c0_i32, %c0_i32_0 : i32, i32
  }
}

</mosaic_0001>

<bundles_post_ra>
// kernel: video_mae_forward.1
= control target key start
LH: loop header
LB: loop body
LE: loop exit
PB: predicated region body
PF: predicated region fallthrough
CT: control target
= control target key end

     0   :  { %s8562_s0 = inlined_call_operand.vmem [shape: bf16[4,3072], index: 0, kind: input, shape index: {}]   ;;  %s8563_s1 = inlined_call_operand.hbm [shape: bf16[3072,768], index: 1, kind: input, shape index: {}]   ;;  %s8564_s2 = inlined_call_operand.hbm [shape: f32[1,768], index: 2, kind: input, shape index: {}]   ;;  %s8565_s3 = inlined_call_operand.hbm [shape: f32[768,256], index: 3, kind: input, shape index: {}]   ;;  %s8566_s4 = inlined_call_operand.vmem [shape: f32[13,256], index: 4, kind: input, shape index: {}]   ;;  %s8567_s5 = inlined_call_operand.vmem [shape: f32[256,1024], index: 5, kind: input, shape index: {}]   ;;  %s8568_s6 = inlined_call_operand.vmem [shape: f32[512,128], index: 6, kind: input, shape index: {}]   ;;  %s8569_s7 = inlined_call_operand.vmem [shape: f32[1,128], index: 7, kind: input, shape index: {}]   ;;  %s8570_s8 = inlined_call_operand.vmem [shape: f32[4,256], index: 8, kind: output, shape index: {0}]   ;;  %s8571_s9 = inlined_call_operand.vmem [shape: f32[2,128], index: 9, kind: output, shape index: {1}]  }
   0x1   :  { %8576 = sst [smem:[#allocation12_spill]] %s8564_s2 }
   0x2   :  { %15 = vsyncpa [#allocation5], 0 }
   0x3   :  { %17 = vsyncpa [#allocation5 + $0x1], 0 }
   0x4   :  { %18 = vsyncpa [#allocation7], 0  ;;  %s6813_s30 = smov 0   ;;  %s6815_s10 = smov 0  }
   0x5   :  { %s6817_s11 = smov 0   ;;  %s6819_s12 = smov 0  }
   0x6 LB: > { %s6832_s13 = sadd.s32 4294967295, %s6751_s12   ;;  %s6835_s14 = sadd.s32 1, %s6751_s12   ;;  %s6751_s12 = sphi %s6819_s12, %s8594_s12   ;;  %s6747_s11 = sphi %s6817_s11, %s8593_s11   ;;  %s6743_s10 = sphi %s6815_s10, %s8592_s10   ;;  %s6739_s30 = sphi %s6813_s30, %s8591_s30  }
   0x7   : > { %s54_s15 = ssub.s32 %s6751_s12, %s6835_s14  ;;  %s57_s16 = sadd.s32 1, %s6747_s11 }
   0x8   : > { %p55_p0 = scmp.eq.s32.totalorder %s54_s15, 0  ;;  %p64_p1 = scmp.ne.s32.totalorder %s6747_s11, %s6743_s10 }
   0x9   : > { %p65_p2 = scmp.eq.s32.totalorder %s6751_s12, 0  ;;  %p70_p3 = scmp.ne.s32.totalorder %s6743_s10, %s6739_s30 }
   0xa   : > { %s6845_s17 = scalar_select %p55_p0, %s6747_s11, %s57_s16  }
   0xb   : > { %p6847_p4 = por %p65_p2, %p64_p1  ;;  %p8572_p5 = scmp.eq.s32.totalorder %s6832_s13, 0 }
   0xc   : > { %8577 = sst [smem:[#allocation11_spill]] %s6845_s17  ;;  %p4933_p6 = scmp.ge.s32.totalorder %s6751_s12, 1 }
   0xd   : > { %p249_p7 = scmp.lt.s32.totalorder %s6751_s12, 4  ;;  %p6856_p8 = por %p8572_p5, %p70_p3 }
   0xe   : > { %s6753_s21 = smov [#allocation6]   ;;  %p5994_p12 = scmp.lt.s32.totalorder %s6751_s12, 3 }
   0xf   : > { %s8579_s19 = scalar_select %p6856_p8, 1, 0 }
  0x10   : > { %p6861_p10 = pnand %p4933_p6, %p249_p7  ;;  %s262_s22 = sshll.u32 %s6753_s21, 4  ;;  %s263_s22 = int_to_ptr.vmem [resolvable:$true] %s262_s22 }
  0x11   : > { %s6754_s24 = smov [#allocation8]   ;;  %p6876_p0 = pnand %p5994_p12, %p6847_p4 }
  0x12   : > { %s8580_s20 = scalar_select %p6861_p10, 1, 0 }
  0x13   : > { %p5981_p11 = pneg %p6861_p10  ;;  %s272_s25 = sshll.u32 %s6754_s24, 4  ;;  %s6880_s25 = int_to_ptr.vmem [resolvable:$true] %s272_s25 }
  0x14   : > { %s8582_s26 = scalar_select %p6876_p0, 1, 0 }
  0x15   : > { %p6870_p13 = pnand %p5981_p11, %p8572_p5  ;;  %s8583_s2 = sld [smem:[#allocation12_spill]] }
  0x17   : > { %p6629_p2 = pneg %p6870_p13 }
  0x1b   : > { %s6627_s29 = scalar_lea.hbm %s8583_s2, 96 }
  0x1c   : > { %p6628_p1 = scmp.ne.s32.totalorder %s8583_s2, %s6627_s29  ;;  %p6634_p4 = scmp.lt.u32.totalorder %s6627_s29, %s8583_s2 }
  0x1e   : > { %p6630_p3 = pnand %p6629_p2, %p6628_p1 }
  0x20   : > { %p6631_p6 = pneg %p6630_p3 }
  0x22   : > { %p6636_p7 = pnand %p6634_p4, %p6631_p6 }
  0x24   : > { %6639 = shalt.err (!%p6636_p7)
}
  0x25   : > { %s6640_s21 = scalar_lea.vmem %s263_s22, 96  ;;  %p6648_p5 = scmp.lt.s32.totalorder %s263_s22, %s263_s22 }
  0x26   : > { %p6641_p11 = scmp.ne.s32.totalorder %s263_s22, %s6640_s21  ;;  %p6649_p8 = scmp.lt.s32.totalorder %s6640_s21, %s6640_s21 }
  0x28   : > { %p6643_p12 = pnand %p6641_p11, %p6629_p2  ;;  %p6650_p10 = por %p6649_p8, %p6648_p5 }
  0x2a   : > { %p6644_p9 = pneg %p6643_p12 }
  0x2c   : > { %p6651_p0 = pnand %p6650_p10, %p6644_p9 }
  0x2e   : > { %6654 = shalt.err (!%p6651_p0)
}
  0x2f   : > { %5984 = dma.hbm_to_vmem [thread:$0]  (!%p6870_p13), %s8583_s2, 96, %s263_s22, [#allocation7]  }
  0x30   : > { %s6655_s30 = scalar_lea.hbm %s8565_s3, 24576 }
  0x31   : > { %p6656_p1 = scmp.ne.s32.totalorder %s8565_s3, %s6655_s30  ;;  %p6662_p9 = scmp.lt.u32.totalorder %s6655_s30, %s8565_s3 }
  0x33   : > { %p6658_p5 = pnand %p6656_p1, %p6629_p2 }
  0x35   : > { %p6659_p8 = pneg %p6658_p5 }
  0x37   : > { %p6664_p10 = pnand %p6662_p9, %p6659_p8 }
  0x39   : > { %6667 = shalt.err (!%p6664_p10)
}
  0x3a   : > { %s6668_s22 = scalar_lea.vmem %s6880_s25, 24576  ;;  %p6676_p4 = scmp.lt.s32.totalorder %s6880_s25, %s6880_s25 }
  0x3b   : > { %p6669_p0 = scmp.ne.s32.totalorder %s6880_s25, %s6668_s22  ;;  %p6677_p7 = scmp.lt.s32.totalorder %s6668_s22, %s6668_s22 }
  0x3d   : > { %p6671_p3 = pnand %p6669_p0, %p6629_p2  ;;  %p6678_p11 = por %p6677_p7, %p6676_p4 }
  0x3f   : > { %p6672_p6 = pneg %p6671_p3 }
  0x41   : > { %p6679_p12 = pnand %p6678_p11, %p6672_p6 }
  0x43   : > { %6682 = shalt.err (!%p6679_p12)
}
  0x44   : > { %s6755_s24 = smov 256   ;;  %s6756_s27 = smov 16  }
  0x45   : > { %5987 = dma.hbm_to_vmem [thread:$0]  (!%p6870_p13), %s8565_s3, 24576, %s6880_s25, [#allocation7], %s6755_s24, %s6755_s24, %s6756_s27  }
  0x46   : > { %s307_s30 = sand.u32 1, %s6747_s11   ;;  %s5969_s15 = smul.u32 49152, %s6751_s12 }
  0x47   : > { %s5968_s16 = smul.u32 3072, %s307_s30  ;;  %s6938_s23 = scalar_lea.sflag [#allocation5], %s307_s30 }
  0x48   : > { %s6934_s22 = scalar_lea.hbm %s8563_s1, %s5969_s15  ;;  %p8584_p2 = scmp.ne.s32.totalorder %s8582_s26, 0 }
  0x49   : > { %s311_s2 = scalar_lea.vmem [#allocation4], %s5968_s16  ;;  %s6683_s28 = scalar_lea.hbm %s6934_s22, 49152 }
  0x4a   : > { %s319_s17 = sshll.u32 %s311_s2, 4  ;;  %p6684_p13 = scmp.ne.s32.totalorder %s6934_s22, %s6683_s28  ;;  %s6936_s17 = int_to_ptr.vmem [resolvable:$true] %s319_s17 }
  0x4b   : > { %p6685_p1 = pneg %p8584_p2  ;;  %s6688_s24 = scalar_lea.hbm %s8563_s1, 147456 }
  0x4c   : > { %p6689_p9 = scmp.lt.u32.totalorder %s6934_s22, %s8563_s1  ;;  %p6690_p10 = scmp.lt.u32.totalorder %s6688_s24, %s6683_s28 }
  0x4d   : > { %p6686_p5 = pnand %p6685_p1, %p6684_p13  ;;  %p6692_p3 = scmp.lt.u32.totalorder %s6683_s28, %s6934_s22 }
  0x4e   : > { %p6691_p0 = por %p6690_p10, %p6689_p9 }
  0x4f   : > { %p6687_p8 = pneg %p6686_p5 }
  0x50   : > { %p6693_p6 = por %p6692_p3, %p6691_p0 }
  0x52   : > { %p6694_p4 = pnand %p6693_p6, %p6687_p8 }
  0x54   : > { %6697 = shalt.err (!%p6694_p4)
}
  0x55   : > { %s6698_s2 = scalar_lea.vmem %s6936_s17, 49152  ;;  %s6757_s30 = smov [#allocation4]  }
  0x56   : > { %p6699_p7 = scmp.ne.s32.totalorder %s6936_s17, %s6698_s2  ;;  %s6703_s15 = sshll.u32 %s6757_s30, 4  ;;  %s6704_s15 = int_to_ptr.vmem [resolvable:$false] %s6703_s15 }
  0x57   : > { %s6705_s16 = scalar_lea.vmem %s6704_s15, 98304  ;;  %p6706_p13 = scmp.lt.s32.totalorder %s6936_s17, %s6704_s15 }
  0x58   : > { %p6701_p11 = pnand %p6699_p7, %p6685_p1  ;;  %p6707_p5 = scmp.lt.s32.totalorder %s6705_s16, %s6698_s2 }
  0x5a   : > { %p6702_p12 = pneg %p6701_p11  ;;  %p6708_p9 = por %p6707_p5, %p6706_p13 }
  0x5c   : > { %p6709_p10 = pnand %p6708_p9, %p6702_p12 }
  0x5e   : > { %6712 = shalt.err (!%p6709_p10)
}
  0x5f   : > { %s6758_s18 = smov 384   ;;  %s6759_s21 = smov 24  }
  0x60   : > { %5991 = dma.hbm_to_vmem [thread:$0]  (!%p8584_p2), %s6934_s22, 49152, %s6936_s17, %s6938_s23, %s6758_s18, %s6758_s18, %s6759_s21  }
  0x61   : > { %p8585_p1 = scmp.ne.s32.totalorder %s8580_s20, 0 }
  0x62   : > { %s333_s28 = sand.u32 (!%p8585_p1), 1, %s6743_s10   ;;  %p8586_p8 = scmp.ne.s32.totalorder (!%p8585_p1), %s8579_s19, 0 }
  0x63   : > { %331 = sbr.rel (%p8585_p1) target bundleno = 3011 (0xbc3), region = 52  ;;  %s334_s25 = scalar_lea.sflag (!%p8585_p1), [#allocation5], %s333_s28 }
  0x64   : > { %s5970_s12 = smul.u32 (!%p8585_p1), 3072, %s333_s28 }
  0x66   : > { %s6969_s24 = scalar_lea.vmem (!%p8585_p1), [#allocation4], %s5970_s12 }
  0x6a   : > { %6730 = dma.done.wait (%p8586_p8), %s334_s25, 49152  }
  0x6b   : > { %6732 = vsyncadd (%p8586_p8), %s334_s25, 4294918144  ;;  %p8587_p0 = scmp.eq.s32.totalorder %s6832_s13, 0 }
  0x6d   : > { %6734 = dma.done.wait (%p8587_p0), [#allocation7], 24672   ;;  %p8588_p2 = pmov %p8587_p0 }
  0x6e   : > { %s4943_s17 = sshll.u32 %s6832_s13, 3  ;;  %p8589_p6 = scmp.ne.s32.totalorder %s6832_s13, 0 }
  0x6f   : > { %6736 = vsyncadd (%p8588_p2), [#allocation7], 4294942624  ;;  %p381_p3 = scmp.lt.s32.totalorder %s4943_s17, 23  ;;  %v393_v0 = vlaneseq (!%p8589_p6)  ;;  %v391_v2 = vld [vmem:[#allocation6] sm:$0x3f] (!%p8589_p6) }
  0x70   : > { %390 = sbr.rel (%p8589_p6) target bundleno = 123 (0x7b), region = 68 }
  0x71   : > { %s8596_s17 = smov (!%p381_p3, %s4943_s17), 23  ;;  %v394_v1 = vshrl.u32 (!%p8589_p6), %v393_v0, 7 }
  0x72   : > { %s4944_s20 = sshll.u32 %s8596_s17, 1 }
  0x73   : > { %s6983_s23 = scalar_lea.vmem %s8562_s0, %s4944_s20  ;;  %v395_v3 = vsub.s32 (!%p8589_p6), 0, %v394_v1  ;;  %v399_v4 = vsub.s32 (!%p8589_p6), 1, %v394_v1  ;;  %v403_v5 = vsub.s32 (!%p8589_p6), 2, %v394_v1  ;;  %v407_v6 = vsub.s32 (!%p8589_p6), 3, %v394_v1 }
  0x74   : > { %v411_v7 = vsub.s32 (!%p8589_p6), 4, %v394_v1  ;;  %v415_v8 = vsub.s32 (!%p8589_p6), 5, %v394_v1 }
  0x75   : > { %v396_v9 = vrot.slane (!%p8589_p6), %v391_v2, %v395_v3  ;;  %v400_v10 = vrot.slane (!%p8589_p6), %v391_v2, %v399_v4  ;;  %v404_v11 = vrot.slane (!%p8589_p6), %v391_v2, %v403_v5  ;;  %v408_v12 = vrot.slane (!%p8589_p6), %v391_v2, %v407_v6 }
  0x76   : > { %v412_v13 = vrot.slane (!%p8589_p6), %v391_v2, %v411_v7  ;;  %v416_v14 = vrot.slane (!%p8589_p6), %v391_v2, %v415_v8 }
  0x77   : > { %v417_v15 = vcombine.low %v396_v9, %v400_v10  ;;  %v418_v16 = vcombine.low %v404_v11, %v408_v12 }
  0x78   : > { %v419_v17 = vcombine.low %v412_v13, %v416_v14 }
  0x79   : > { %423 = vst [vmem:[#allocation2] sm:$0xff] %v417_v15  ;;  %424 = vst [vmem:[#allocation2 + $0x8] sm:$0xff] %v418_v16 }
  0x7a   : > { %425 = vst [vmem:[#allocation2 + $0x10] sm:$0xff] %v419_v17 }
  0x7b PF: > { %v6038_v18 = vld [vmem:[%s6969_s24 + $0x4] ss:$24 sps:$4 sm:$0xff]   ;;  %v6042_v20 = vld [vmem:[%s6969_s24] ss:$24 sps:$4 sm:$0xff]   ;;  %v6044_v22 = vld [vmem:[%s6969_s24 + $0x34] ss:$24 sps:$4 sm:$0xff]   ;;  %v821_v56 = vlaneseq }
  0x7c   : > { %v6040_v19 = vld [vmem:[%s6969_s24 + $0x604] ss:$24 sps:$4 sm:$0xff]   ;;  %2779 = vmatprep.subr.bf16.mxu1 %v6038_v18  ;;  %v6043_v21 = vld [vmem:[%s6969_s24 + $0x600] ss:$24 sps:$4 sm:$0xff]   ;;  %v6046_v23 = vld [vmem:[%s6969_s24 + $0x634] ss:$24 sps:$4 sm:$0xff]  }
  0x7d   : > { %2861 = vmatprep.subr.bf16.mxu0 %v6040_v19  ;;  %2780 = vmatpush1.bf16.msra.mxu1 %v6042_v20  ;;  %v6048_v24 = vld [vmem:[%s6969_s24 + $0x30] ss:$24 sps:$4 sm:$0xff]   ;;  %v6050_v26 = vld [vmem:[%s6969_s24 + $0x64] ss:$24 sps:$4 sm:$0xff]   ;;  %v6054_v28 = vld [vmem:[%s6969_s24 + $0x60] ss:$24 sps:$4 sm:$0xff]  }
  0x7e   : > { %2862 = vmatpush1.bf16.msra.mxu0 %v6043_v21  ;;  %2781 = vmatprep.subr.bf16.mxu1 %v6044_v22  ;;  %v6049_v25 = vld [vmem:[%s6969_s24 + $0x630] ss:$24 sps:$4 sm:$0xff]   ;;  %v6052_v27 = vld [vmem:[%s6969_s24 + $0x664] ss:$24 sps:$4 sm:$0xff]   ;;  %v6055_v29 = vld [vmem:[%s6969_s24 + $0x660] ss:$24 sps:$4 sm:$0xff]  }
  0x7f   : > { %2863 = vmatprep.subr.bf16.mxu0 %v6046_v23  ;;  %v6056_v30 = vld [vmem:[%s6969_s24 + $0x94] ss:$24 sps:$4 sm:$0xff]   ;;  %v6060_v32 = vld [vmem:[%s6969_s24 + $0x90] ss:$24 sps:$4 sm:$0xff]   ;;  %v6062_v34 = vld [vmem:[%s6969_s24 + $0xc4] ss:$24 sps:$4 sm:$0xff]  }
  0x80   : > { %v6058_v31 = vld [vmem:[%s6969_s24 + $0x694] ss:$24 sps:$4 sm:$0xff]   ;;  %v6061_v33 = vld [vmem:[%s6969_s24 + $0x690] ss:$24 sps:$4 sm:$0xff]   ;;  %v6064_v35 = vld [vmem:[%s6969_s24 + $0x6c4] ss:$24 sps:$4 sm:$0xff]  }
  0x81   : > { %2782 = vmatpush1.bf16.msra.mxu1 %v6048_v24  ;;  %v6066_v36 = vld [vmem:[%s6969_s24 + $0xc0] ss:$24 sps:$4 sm:$0xff]   ;;  %v6068_v38 = vld [vmem:[%s6969_s24 + $0xf4] ss:$24 sps:$4 sm:$0xff]   ;;  %v6072_v40 = vld [vmem:[%s6969_s24 + $0xf0] ss:$24 sps:$4 sm:$0xff]  }
  0x82   : > { %2864 = vmatpush1.bf16.msra.mxu0 %v6049_v25  ;;  %2783 = vmatprep.subr.bf16.mxu1 %v6050_v26  ;;  %v6067_v37 = vld [vmem:[%s6969_s24 + $0x6c0] ss:$24 sps:$4 sm:$0xff]   ;;  %v6070_v39 = vld [vmem:[%s6969_s24 + $0x6f4] ss:$24 sps:$4 sm:$0xff]   ;;  %v6073_v41 = vld [vmem:[%s6969_s24 + $0x6f0] ss:$24 sps:$4 sm:$0xff]  }
  0x83   : > { %2865 = vmatprep.subr.bf16.mxu0 %v6052_v27  ;;  %v6074_v42 = vld [vmem:[%s6969_s24 + $0x124] ss:$24 sps:$4 sm:$0xff]   ;;  %v6078_v44 = vld [vmem:[%s6969_s24 + $0x120] ss:$24 sps:$4 sm:$0xff]   ;;  %v6080_v46 = vld [vmem:[%s6969_s24 + $0x154] ss:$24 sps:$4 sm:$0xff]  }
  0x84   : > { %v6076_v43 = vld [vmem:[%s6969_s24 + $0x724] ss:$24 sps:$4 sm:$0xff]   ;;  %v6079_v45 = vld [vmem:[%s6969_s24 + $0x720] ss:$24 sps:$4 sm:$0xff]   ;;  %v6082_v47 = vld [vmem:[%s6969_s24 + $0x754] ss:$24 sps:$4 sm:$0xff]  }
  0x85   : > { %2784 = vmatpush1.bf16.msra.mxu1 %v6054_v28  ;;  %v6084_v48 = vld [vmem:[%s6969_s24 + $0x150] ss:$24 sps:$4 sm:$0xff]   ;;  %v6086_v50 = vld [vmem:[%s6969_s24 + $0x184] ss:$24 sps:$4 sm:$0xff]   ;;  %v6090_v52 = vld [vmem:[%s6969_s24 + $0x180] ss:$24 sps:$4 sm:$0xff]  }
  0x86   : > { %2866 = vmatpush1.bf16.msra.mxu0 %v6055_v29  ;;  %2785 = vmatprep.subr.bf16.mxu1 %v6056_v30  ;;  %v6085_v49 = vld [vmem:[%s6969_s24 + $0x750] ss:$24 sps:$4 sm:$0xff]   ;;  %v6088_v51 = vld [vmem:[%s6969_s24 + $0x784] ss:$24 sps:$4 sm:$0xff]   ;;  %v6091_v53 = vld [vmem:[%s6969_s24 + $0x780] ss:$24 sps:$4 sm:$0xff]  }
  0x87   : > { %2867 = vmatprep.subr.bf16.mxu0 %v6058_v31  ;;  %v6760_v54 = vmov 1983009808   ;;  %v6092_v57 = vld [vmem:[%s6969_s24 + $0x1b4] ss:$24 sps:$4 sm:$0xff]   ;;  %v6096_v59 = vld [vmem:[%s6969_s24 + $0x1b0] ss:$24 sps:$4 sm:$0xff]  }
  0x88   : > { %v819_v55 = vunpack.c.l.s4 %v6760_v54  ;;  %v6094_v58 = vld [vmem:[%s6969_s24 + $0x7b4] ss:$24 sps:$4 sm:$0xff]   ;;  %v7027_v61 = vshrl.u32 %v821_v56, 7  ;;  %v6097_v62 = vld [vmem:[%s6969_s24 + $0x7b0] ss:$24 sps:$4 sm:$0xff]   ;;  %p5330_p4 = scmp.ne.s32.totalorder %s6832_s13, 2 }
  0x89   : > { %2786 = vmatpush1.bf16.msra.mxu1 %v6060_v32  ;;  %v6098_v63 = vld [vmem:[%s6969_s24 + $0x1e4] ss:$24 sps:$4 sm:$0xff]   ;;  %v6102_v1 = vld [vmem:[%s6969_s24 + $0x1e0] ss:$24 sps:$4 sm:$0xff]   ;;  %v6104_v4 = vld [vmem:[%s6969_s24 + $0x214] ss:$24 sps:$4 sm:$0xff]  }
  0x8a   : > { %2868 = vmatpush1.bf16.msra.mxu0 %v6061_v33  ;;  %2787 = vmatprep.subr.bf16.mxu1 %v6062_v34  ;;  %v820_v60 = vunpack.c.0.s8 %v819_v55  ;;  %v6100_v0 = vld [vmem:[%s6969_s24 + $0x7e4] ss:$24 sps:$4 sm:$0xff]   ;;  %v6103_v2 = vld [vmem:[%s6969_s24 + $0x7e0] ss:$24 sps:$4 sm:$0xff]   ;;  %v6106_v5 = vld [vmem:[%s6969_s24 + $0x814] ss:$24 sps:$4 sm:$0xff]  }
  0x8b   : > { %2869 = vmatprep.subr.bf16.mxu0 %v6064_v35  ;;  %v429_v6 = vld [vmem:[%s6983_s23] sm:$0xff]  ;;  %v430_v10 = vld [vmem:[%s6983_s23 + $0x8] sm:$0xff]  ;;  %v6114_v16 = vld [vmem:[%s6969_s24 + $0x240] ss:$24 sps:$4 sm:$0xff]   ;;  %vm3726_vm0 = vcmask (!%p5330_p4), 1043456   ;;  %vm3783_vm1 = vcmask (!%p5330_p4), 1041408  }
  0x8c   : > { %v7035_v3 = vsub.s32 %v820_v60, %v7027_v61  ;;  %v6108_v7 = vld [vmem:[%s6969_s24 + $0x210] ss:$24 sps:$4 sm:$0xff]   ;;  %v6110_v11 = vld [vmem:[%s6969_s24 + $0x244] ss:$24 sps:$4 sm:$0xff]   ;;  %v6115_v17 = vld [vmem:[%s6969_s24 + $0x840] ss:$24 sps:$4 sm:$0xff]   ;;  %v817_v28 = vcombine.high %v429_v6, %v429_v6  ;;  %v834_v29 = vcombine.high %v430_v10, %v430_v10 }
  0x8d   : > { %2788 = vmatpush1.bf16.msra.mxu1 %v6066_v36  ;;  %v6109_v9 = vld [vmem:[%s6969_s24 + $0x810] ss:$24 sps:$4 sm:$0xff]   ;;  %v6112_v12 = vld [vmem:[%s6969_s24 + $0x844] ss:$24 sps:$4 sm:$0xff]   ;;  %v6116_v18 = vld [vmem:[%s6969_s24 + $0x274] ss:$24 sps:$4 sm:$0xff]  }
  0x8e   : > { %2870 = vmatpush1.bf16.msra.mxu0 %v6067_v37  ;;  %2789 = vmatprep.subr.bf16.mxu1 %v6068_v38  ;;  %v7042_v8 = vrot.slane %v429_v6, %v7035_v3  ;;  %v7053_v14 = vrot.slane %v430_v10, %v7035_v3  ;;  %v6118_v19 = vld [vmem:[%s6969_s24 + $0x874] ss:$24 sps:$4 sm:$0xff]   ;;  %v6120_v20 = vld [vmem:[%s6969_s24 + $0x270] ss:$24 sps:$4 sm:$0xff]   ;;  %v6122_v22 = vld [vmem:[%s6969_s24 + $0x2a4] ss:$24 sps:$4 sm:$0xff]   ;;  %v7078_v34 = vrot.slane %v817_v28, %v7035_v3 }
  0x8f   : > { %2871 = vmatprep.subr.bf16.mxu0 %v6070_v39  ;;  %v6121_v21 = vld [vmem:[%s6969_s24 + $0x870] ss:$24 sps:$4 sm:$0xff]   ;;  %v6124_v23 = vld [vmem:[%s6969_s24 + $0x8a4] ss:$24 sps:$4 sm:$0xff]   ;;  %v6126_v24 = vld [vmem:[%s6969_s24 + $0x2a0] ss:$24 sps:$4 sm:$0xff]   ;;  %v7081_v35 = vrot.slane %v834_v29, %v7035_v3 }
  0x90   : > { %v7050_v13 = vcombine.high %v7042_v8, %v7042_v8  ;;  %v7058_v15 = vcombine.high %v7053_v14, %v7053_v14  ;;  %v6127_v25 = vld [vmem:[%s6969_s24 + $0x8a0] ss:$24 sps:$4 sm:$0xff]   ;;  %v6128_v26 = vld [vmem:[%s6969_s24 + $0x2d4] ss:$24 sps:$4 sm:$0xff]   ;;  %v6132_v30 = vld [vmem:[%s6969_s24 + $0x2d0] ss:$24 sps:$4 sm:$0xff]  }
  0x91   : > { %2790 = vmatpush1.bf16.msra.mxu1 %v6072_v40  ;;  %v6130_v27 = vld [vmem:[%s6969_s24 + $0x8d4] ss:$24 sps:$4 sm:$0xff]   ;;  %v6133_v31 = vld [vmem:[%s6969_s24 + $0x8d0] ss:$24 sps:$4 sm:$0xff]   ;;  %v6136_v32 = vld [vmem:[%s6969_s24 + $0x304] ss:$24 sps:$4 sm:$0xff]   ;;  %v7089_v40 = vcombine.high %v7078_v34, %v7078_v34 }
  0x92   : > { %2872 = vmatpush1.bf16.msra.mxu0 %v6073_v41  ;;  %2791 = vmatprep.subr.bf16.mxu1 %v6074_v42  ;;  %v6139_v33 = vld [vmem:[%s6969_s24 + $0x904] ss:$24 sps:$4 sm:$0xff]   ;;  %v6134_v36 = vld [vmem:[%s6969_s24 + $0x300] ss:$24 sps:$4 sm:$0xff]   ;;  %v6142_v38 = vld [vmem:[%s6969_s24 + $0x334] ss:$24 sps:$4 sm:$0xff]   ;;  %v7093_v41 = vcombine.high %v7081_v35, %v7081_v35 }
  0x93   : > { %2873 = vmatprep.subr.bf16.mxu0 %v6076_v43  ;;  %2811 = vmatprep.mubr.bf16.mxu1 %v7050_v13  ;;  %v6137_v37 = vld [vmem:[%s6969_s24 + $0x900] ss:$24 sps:$4 sm:$0xff]   ;;  %v6145_v39 = vld [vmem:[%s6969_s24 + $0x934] ss:$24 sps:$4 sm:$0xff]   ;;  %v6140_v42 = vld [vmem:[%s6969_s24 + $0x330] ss:$24 sps:$4 sm:$0xff]  }
  0x94   : > { %2893 = vmatprep.mubr.bf16.mxu0 %v7058_v15  ;;  %v6143_v43 = vld [vmem:[%s6969_s24 + $0x930] ss:$24 sps:$4 sm:$0xff]   ;;  %v6158_v54 = vld [vmem:[%s6969_s24 + $0x3c0] ss:$24 sps:$4 sm:$0xff]   ;;  %v6211_v28 = vld [vmem:[%s6969_s24 + $0xb44] ss:$24 sps:$4 sm:$0xff]  }
  0x95   : > { %2792 = vmatpush1.bf16.msra.mxu1 %v6078_v44  ;;  %v6148_v44 = vld [vmem:[%s6969_s24 + $0x364] ss:$24 sps:$4 sm:$0xff]   ;;  %v6161_v55 = vld [vmem:[%s6969_s24 + $0x9c0] ss:$24 sps:$4 sm:$0xff]   ;;  %v6167_v60 = vld [vmem:[%s6969_s24 + $0x9f0] ss:$24 sps:$4 sm:$0xff]  }
  0x96   : > { %2874 = vmatpush1.bf16.msra.mxu0 %v6079_v45  ;;  %2793 = vmatprep.subr.bf16.mxu1 %v6080_v46  ;;  %v6151_v45 = vld [vmem:[%s6969_s24 + $0x964] ss:$24 sps:$4 sm:$0xff]   ;;  %v6146_v46 = vld [vmem:[%s6969_s24 + $0x360] ss:$24 sps:$4 sm:$0xff]   ;;  %v6179_v6 = vld [vmem:[%s6969_s24 + $0xa50] ss:$24 sps:$4 sm:$0xff]  }
  0x97   : > { %2875 = vmatprep.subr.bf16.mxu0 %v6082_v47  ;;  %v6149_v47 = vld [vmem:[%s6969_s24 + $0x960] ss:$24 sps:$4 sm:$0xff]   ;;  %vm3825_vm2 = vcmask (!%p5330_p4), 1043458   ;;  %vm3818_vm3 = vcmp.lt.s32.totalorder (!%p5330_p4), %v821_v56, 256  ;;  %v3961_v56 = vld [vmem:[%s8567_s5 + $0x8] sm:$0xff] (!%p5330_p4) }
  0x98   : > { %v6182_v10 = vld [vmem:[%s6969_s24 + $0x480] ss:$24 sps:$4 sm:$0xff]  }
  0x99   : > { %2794 = vmatpush1.bf16.msra.mxu1 %v6084_v48  ;;  %v6154_v48 = vld [vmem:[%s6969_s24 + $0x394] ss:$24 sps:$4 sm:$0xff]   ;;  %v6206_v29 = vld [vmem:[%s6969_s24 + $0x540] ss:$24 sps:$4 sm:$0xff]  }
  0x9a   : > { %2876 = vmatpush1.bf16.msra.mxu0 %v6085_v49  ;;  %2795 = vmatprep.subr.bf16.mxu1 %v6086_v50  ;;  %v6157_v49 = vld [vmem:[%s6969_s24 + $0x994] ss:$24 sps:$4 sm:$0xff]   ;;  %v6152_v50 = vld [vmem:[%s6969_s24 + $0x390] ss:$24 sps:$4 sm:$0xff]  }
  0x9b   : > { %2877 = vmatprep.subr.bf16.mxu0 %v6088_v51  ;;  %v6155_v51 = vld [vmem:[%s6969_s24 + $0x990] ss:$24 sps:$4 sm:$0xff]  }
  0x9d   : > { %2796 = vmatpush1.bf16.msra.mxu1 %v6090_v52  ;;  %v6160_v52 = vld [vmem:[%s6969_s24 + $0x3c4] ss:$24 sps:$4 sm:$0xff]  }
  0x9e   : > { %2878 = vmatpush1.bf16.msra.mxu0 %v6091_v53  ;;  %2797 = vmatprep.subr.bf16.mxu1 %v6092_v57  ;;  %v6163_v53 = vld [vmem:[%s6969_s24 + $0x9c4] ss:$24 sps:$4 sm:$0xff]   ;;  %v6166_v57 = vld [vmem:[%s6969_s24 + $0x3f4] ss:$24 sps:$4 sm:$0xff]  }
  0x9f   : > { %2879 = vmatprep.subr.bf16.mxu0 %v6094_v58  ;;  %v6169_v58 = vld [vmem:[%s6969_s24 + $0x9f4] ss:$24 sps:$4 sm:$0xff]  }
  0xa1   : > { %2798 = vmatpush1.bf16.msra.mxu1 %v6096_v59  ;;  %v6164_v59 = vld [vmem:[%s6969_s24 + $0x3f0] ss:$24 sps:$4 sm:$0xff]  }
  0xa2   : > { %2880 = vmatpush1.bf16.msra.mxu0 %v6097_v62  ;;  %2799 = vmatprep.subr.bf16.mxu1 %v6098_v63  ;;  %v6172_v62 = vld [vmem:[%s6969_s24 + $0x424] ss:$24 sps:$4 sm:$0xff]  }
  0xa3   : > { %2881 = vmatprep.subr.bf16.mxu0 %v6100_v0  ;;  %v6175_v63 = vld [vmem:[%s6969_s24 + $0xa24] ss:$24 sps:$4 sm:$0xff]   ;;  %v6170_v0 = vld [vmem:[%s6969_s24 + $0x420] ss:$24 sps:$4 sm:$0xff]  }
  0xa5   : > { %2800 = vmatpush1.bf16.msra.mxu1 %v6102_v1  ;;  %v6173_v1 = vld [vmem:[%s6969_s24 + $0xa20] ss:$24 sps:$4 sm:$0xff]  }
  0xa6   : > { %2882 = vmatpush1.bf16.msra.mxu0 %v6103_v2  ;;  %2801 = vmatprep.subr.bf16.mxu1 %v6104_v4  ;;  %v6178_v2 = vld [vmem:[%s6969_s24 + $0x454] ss:$24 sps:$4 sm:$0xff]  }
  0xa7   : > { %2883 = vmatprep.subr.bf16.mxu0 %v6106_v5  ;;  %v6181_v4 = vld [vmem:[%s6969_s24 + $0xa54] ss:$24 sps:$4 sm:$0xff]   ;;  %v6176_v5 = vld [vmem:[%s6969_s24 + $0x450] ss:$24 sps:$4 sm:$0xff]  }
  0xa9   : > { %2802 = vmatpush1.bf16.msra.mxu1 %v6108_v7  ;;  %v6184_v7 = vld [vmem:[%s6969_s24 + $0x484] ss:$24 sps:$4 sm:$0xff]  }
  0xaa   : > { %2884 = vmatpush1.bf16.msra.mxu0 %v6109_v9  ;;  %2803 = vmatprep.subr.bf16.mxu1 %v6110_v11  ;;  %v6187_v9 = vld [vmem:[%s6969_s24 + $0xa84] ss:$24 sps:$4 sm:$0xff]   ;;  %v6185_v11 = vld [vmem:[%s6969_s24 + $0xa80] ss:$24 sps:$4 sm:$0xff]  }
  0xab   : > { %2885 = vmatprep.subr.bf16.mxu0 %v6112_v12  ;;  %v6190_v12 = vld [vmem:[%s6969_s24 + $0x4b4] ss:$24 sps:$4 sm:$0xff]  }
  0xad   : > { %2804 = vmatpush1.bf16.msra.mxu1 %v6114_v16  ;;  %v6193_v16 = vld [vmem:[%s6969_s24 + $0xab4] ss:$24 sps:$4 sm:$0xff]  }
  0xae   : > { %2886 = vmatpush1.bf16.msra.mxu0 %v6115_v17  ;;  %2805 = vmatprep.subr.bf16.mxu1 %v6116_v18  ;;  %v6188_v17 = vld [vmem:[%s6969_s24 + $0x4b0] ss:$24 sps:$4 sm:$0xff]  }
  0xaf   : > { %2887 = vmatprep.subr.bf16.mxu0 %v6118_v19  ;;  %v6191_v18 = vld [vmem:[%s6969_s24 + $0xab0] ss:$24 sps:$4 sm:$0xff]   ;;  %v6196_v19 = vld [vmem:[%s6969_s24 + $0x4e4] ss:$24 sps:$4 sm:$0xff]  }
  0xb1   : > { %2806 = vmatpush1.bf16.msra.mxu1 %v6120_v20  ;;  %v6199_v20 = vld [vmem:[%s6969_s24 + $0xae4] ss:$24 sps:$4 sm:$0xff]  }
  0xb2   : > { %2888 = vmatpush1.bf16.msra.mxu0 %v6121_v21  ;;  %2807 = vmatprep.subr.bf16.mxu1 %v6122_v22  ;;  %v6194_v21 = vld [vmem:[%s6969_s24 + $0x4e0] ss:$24 sps:$4 sm:$0xff]  }
  0xb3   : > { %2889 = vmatprep.subr.bf16.mxu0 %v6124_v23  ;;  %v6197_v22 = vld [vmem:[%s6969_s24 + $0xae0] ss:$24 sps:$4 sm:$0xff]   ;;  %v6202_v23 = vld [vmem:[%s6969_s24 + $0x514] ss:$24 sps:$4 sm:$0xff]  }
  0xb5   : > { %2808 = vmatpush1.bf16.msra.mxu1 %v6126_v24  ;;  %v6205_v24 = vld [vmem:[%s6969_s24 + $0xb14] ss:$24 sps:$4 sm:$0xff]  }
  0xb6   : > { %2890 = vmatpush1.bf16.msra.mxu0 %v6127_v25  ;;  %2809 = vmatprep.subr.bf16.mxu1 %v6128_v26  ;;  %v6200_v25 = vld [vmem:[%s6969_s24 + $0x510] ss:$24 sps:$4 sm:$0xff]  }
  0xb7   : > { %2891 = vmatprep.subr.bf16.mxu0 %v6130_v27  ;;  %v6203_v26 = vld [vmem:[%s6969_s24 + $0xb10] ss:$24 sps:$4 sm:$0xff]   ;;  %v6208_v27 = vld [vmem:[%s6969_s24 + $0x544] ss:$24 sps:$4 sm:$0xff]  }
  0xb9   : > { %2810 = vmatpush1.bf16.msra.mxu1 %v6132_v30  ;;  %v6209_v30 = vld [vmem:[%s6969_s24 + $0xb40] ss:$24 sps:$4 sm:$0xff]  }
  0xba   : > { %2892 = vmatpush1.bf16.msra.mxu0 %v6133_v31  ;;  %2820 = vmatprep.subr.bf16.mxu1 %v6136_v32  ;;  %v6214_v31 = vld [vmem:[%s6969_s24 + $0x574] ss:$24 sps:$4 sm:$0xff]  }
  0xbb   : > { %2902 = vmatprep.subr.bf16.mxu0 %v6139_v33  ;;  %v6217_v32 = vld [vmem:[%s6969_s24 + $0xb74] ss:$24 sps:$4 sm:$0xff]   ;;  %v6212_v33 = vld [vmem:[%s6969_s24 + $0x570] ss:$24 sps:$4 sm:$0xff]  }
  0xbc   : > { %2812 = vmatmul.mubr.bf16.vlgmr.msra.gmra.mrb[0].mxu1 %v7042_v8 }
  0xbd   : > { %2894 = vmatmul.mubr.bf16.vlgmr.msra.gmra.mrb[0].mxu0 %v7053_v14  ;;  %2821 = vmatpush1.bf16.msra.mxu1 %v6134_v36  ;;  %v6215_v36 = vld [vmem:[%s6969_s24 + $0xb70] ss:$24 sps:$4 sm:$0xff]  }
  0xbe   : > { %2903 = vmatpush1.bf16.msra.mxu0 %v6137_v37  ;;  %2822 = vmatprep.subr.bf16.mxu1 %v6142_v38  ;;  %v6220_v37 = vld [vmem:[%s6969_s24 + $0x5a4] ss:$24 sps:$4 sm:$0xff]  }
  0xbf   : > { %2904 = vmatprep.subr.bf16.mxu0 %v6145_v39  ;;  %2852 = vmatprep.mubr.bf16.mxu1 %v7089_v40  ;;  %v6223_v38 = vld [vmem:[%s6969_s24 + $0xba4] ss:$24 sps:$4 sm:$0xff]   ;;  %v6218_v39 = vld [vmem:[%s6969_s24 + $0x5a0] ss:$24 sps:$4 sm:$0xff]  }
  0xc0   : > { %2934 = vmatprep.mubr.bf16.mxu0 %v7093_v41 }
  0xc1   : > { %2823 = vmatpush1.bf16.msra.mxu1 %v6140_v42  ;;  %v6221_v42 = vld [vmem:[%s6969_s24 + $0xba0] ss:$24 sps:$4 sm:$0xff]  }
  0xc2   : > { %2905 = vmatpush1.bf16.msra.mxu0 %v6143_v43  ;;  %2824 = vmatprep.subr.bf16.mxu1 %v6148_v44  ;;  %v6226_v43 = vld [vmem:[%s6969_s24 + $0x5d4] ss:$24 sps:$4 sm:$0xff]  }
  0xc3   : > { %2906 = vmatprep.subr.bf16.mxu0 %v6151_v45  ;;  %v6229_v44 = vld [vmem:[%s6969_s24 + $0xbd4] ss:$24 sps:$4 sm:$0xff]   ;;  %v6224_v45 = vld [vmem:[%s6969_s24 + $0x5d0] ss:$24 sps:$4 sm:$0xff]  }
  0xc5   : > { %2825 = vmatpush1.bf16.msra.mxu1 %v6146_v46  ;;  %v6227_v46 = vld [vmem:[%s6969_s24 + $0xbd0] ss:$24 sps:$4 sm:$0xff]  }
  0xc6   : > { %2907 = vmatpush1.bf16.msra.mxu0 %v6149_v47  ;;  %2826 = vmatprep.subr.bf16.mxu1 %v6154_v48  ;;  %v6234_v47 = vld [vmem:[%s6969_s24 + $0xc] ss:$24 sps:$4 sm:$0xff]  }
  0xc7   : > { %2908 = vmatprep.subr.bf16.mxu0 %v6157_v49  ;;  %v6237_v48 = vld [vmem:[%s6969_s24 + $0x14] ss:$24 sps:$4 sm:$0xff]   ;;  %v6232_v49 = vld [vmem:[%s6969_s24 + $0x8] ss:$24 sps:$4 sm:$0xff]  }
  0xc9   : > { %2827 = vmatpush1.bf16.msra.mxu1 %v6152_v50  ;;  %v6235_v50 = vld [vmem:[%s6969_s24 + $0x10] ss:$24 sps:$4 sm:$0xff]  }
  0xca   : > { %2909 = vmatpush1.bf16.msra.mxu0 %v6155_v51  ;;  %2828 = vmatprep.subr.bf16.mxu1 %v6160_v52  ;;  %v6240_v51 = vld [vmem:[%s6969_s24 + $0x3c] ss:$24 sps:$4 sm:$0xff]  }
  0xcb   : > { %2910 = vmatprep.subr.bf16.mxu0 %v6163_v53  ;;  %v6243_v52 = vld [vmem:[%s6969_s24 + $0x44] ss:$24 sps:$4 sm:$0xff]   ;;  %v6238_v53 = vld [vmem:[%s6969_s24 + $0x38] ss:$24 sps:$4 sm:$0xff]  }
  0xcd   : > { %2829 = vmatpush1.bf16.msra.mxu1 %v6158_v54  ;;  %v6241_v54 = vld [vmem:[%s6969_s24 + $0x40] ss:$24 sps:$4 sm:$0xff]  }
  0xce   : > { %2911 = vmatpush1.bf16.msra.mxu0 %v6161_v55  ;;  %2830 = vmatprep.subr.bf16.mxu1 %v6166_v57  ;;  %v6246_v55 = vld [vmem:[%s6969_s24 + $0x6c] ss:$24 sps:$4 sm:$0xff]  }
  0xcf   : > { %2912 = vmatprep.subr.bf16.mxu0 %v6169_v58  ;;  %v6249_v57 = vld [vmem:[%s6969_s24 + $0x74] ss:$24 sps:$4 sm:$0xff]   ;;  %v6244_v58 = vld [vmem:[%s6969_s24 + $0x68] ss:$24 sps:$4 sm:$0xff]  }
  0xd1   : > { %2831 = vmatpush1.bf16.msra.mxu1 %v6164_v59  ;;  %v6247_v59 = vld [vmem:[%s6969_s24 + $0x70] ss:$24 sps:$4 sm:$0xff]  }
  0xd2   : > { %2913 = vmatpush1.bf16.msra.mxu0 %v6167_v60  ;;  %2832 = vmatprep.subr.bf16.mxu1 %v6172_v62  ;;  %v6252_v60 = vld [vmem:[%s6969_s24 + $0x9c] ss:$24 sps:$4 sm:$0xff]  }
  0xd3   : > { %2914 = vmatprep.subr.bf16.mxu0 %v6175_v63  ;;  %v6255_v62 = vld [vmem:[%s6969_s24 + $0xa4] ss:$24 sps:$4 sm:$0xff]   ;;  %v6250_v63 = vld [vmem:[%s6969_s24 + $0x98] ss:$24 sps:$4 sm:$0xff]  }
  0xd5   : > { %2833 = vmatpush1.bf16.msra.mxu1 %v6170_v0  ;;  %v6253_v0 = vld [vmem:[%s6969_s24 + $0xa0] ss:$24 sps:$4 sm:$0xff]  }
  0xd6   : > { %2915 = vmatpush1.bf16.msra.mxu0 %v6173_v1  ;;  %2834 = vmatprep.subr.bf16.mxu1 %v6178_v2  ;;  %v6261_v1 = vld [vmem:[%s6969_s24 + $0xd4] ss:$24 sps:$4 sm:$0xff]   ;;  %v6256_v2 = vld [vmem:[%s6969_s24 + $0xc8] ss:$24 sps:$4 sm:$0xff]  }
  0xd7   : > { %2916 = vmatprep.subr.bf16.mxu0 %v6181_v4  ;;  %v6259_v4 = vld [vmem:[%s6969_s24 + $0xd0] ss:$24 sps:$4 sm:$0xff]  }
  0xd9   : > { %2835 = vmatpush1.bf16.msra.mxu1 %v6176_v5  ;;  %v6264_v5 = vld [vmem:[%s6969_s24 + $0xfc] ss:$24 sps:$4 sm:$0xff]  }
  0xda   : > { %2917 = vmatpush1.bf16.msra.mxu0 %v6179_v6  ;;  %2836 = vmatprep.subr.bf16.mxu1 %v6184_v7  ;;  %v6267_v6 = vld [vmem:[%s6969_s24 + $0x104] ss:$24 sps:$4 sm:$0xff]   ;;  %v6262_v7 = vld [vmem:[%s6969_s24 + $0xf8] ss:$24 sps:$4 sm:$0xff]  }
  0xdb   : > { %2918 = vmatprep.subr.bf16.mxu0 %v6187_v9  ;;  %v6265_v9 = vld [vmem:[%s6969_s24 + $0x100] ss:$24 sps:$4 sm:$0xff]  }
  0xdd   : > { %2837 = vmatpush1.bf16.msra.mxu1 %v6182_v10  ;;  %v6270_v10 = vld [vmem:[%s6969_s24 + $0x12c] ss:$24 sps:$4 sm:$0xff]  }
  0xde   : > { %2919 = vmatpush1.bf16.msra.mxu0 %v6185_v11  ;;  %2838 = vmatprep.subr.bf16.mxu1 %v6190_v12  ;;  %v6273_v11 = vld [vmem:[%s6969_s24 + $0x134] ss:$24 sps:$4 sm:$0xff]   ;;  %v6268_v12 = vld [vmem:[%s6969_s24 + $0x128] ss:$24 sps:$4 sm:$0xff]  }
  0xdf   : > { %2920 = vmatprep.subr.bf16.mxu0 %v6193_v16  ;;  %v6271_v16 = vld [vmem:[%s6969_s24 + $0x130] ss:$24 sps:$4 sm:$0xff]  }
  0xe1   : > { %2839 = vmatpush1.bf16.msra.mxu1 %v6188_v17  ;;  %v6276_v17 = vld [vmem:[%s6969_s24 + $0x15c] ss:$24 sps:$4 sm:$0xff]  }
  0xe2   : > { %2921 = vmatpush1.bf16.msra.mxu0 %v6191_v18  ;;  %2840 = vmatprep.subr.bf16.mxu1 %v6196_v19  ;;  %v6279_v18 = vld [vmem:[%s6969_s24 + $0x164] ss:$24 sps:$4 sm:$0xff]   ;;  %v6274_v19 = vld [vmem:[%s6969_s24 + $0x158] ss:$24 sps:$4 sm:$0xff]  }
  0xe3   : > { %2922 = vmatprep.subr.bf16.mxu0 %v6199_v20  ;;  %v6277_v20 = vld [vmem:[%s6969_s24 + $0x160] ss:$24 sps:$4 sm:$0xff]  }
  0xe5   : > { %2841 = vmatpush1.bf16.msra.mxu1 %v6194_v21  ;;  %v6282_v21 = vld [vmem:[%s6969_s24 + $0x18c] ss:$24 sps:$4 sm:$0xff]  }
  0xe6   : > { %2923 = vmatpush1.bf16.msra.mxu0 %v6197_v22  ;;  %2842 = vmatprep.subr.bf16.mxu1 %v6202_v23  ;;  %v6285_v22 = vld [vmem:[%s6969_s24 + $0x194] ss:$24 sps:$4 sm:$0xff]   ;;  %v6280_v23 = vld [vmem:[%s6969_s24 + $0x188] ss:$24 sps:$4 sm:$0xff]  }
  0xe7   : > { %2924 = vmatprep.subr.bf16.mxu0 %v6205_v24  ;;  %v6283_v24 = vld [vmem:[%s6969_s24 + $0x190] ss:$24 sps:$4 sm:$0xff]  }
  0xe9   : > { %2843 = vmatpush1.bf16.msra.mxu1 %v6200_v25  ;;  %v6288_v25 = vld [vmem:[%s6969_s24 + $0x1bc] ss:$24 sps:$4 sm:$0xff]  }
  0xea   : > { %2925 = vmatpush1.bf16.msra.mxu0 %v6203_v26  ;;  %2844 = vmatprep.subr.bf16.mxu1 %v6208_v27  ;;  %v6291_v26 = vld [vmem:[%s6969_s24 + $0x1c4] ss:$24 sps:$4 sm:$0xff]   ;;  %v6286_v27 = vld [vmem:[%s6969_s24 + $0x1b8] ss:$24 sps:$4 sm:$0xff]  }
  0xeb   : > { %2926 = vmatprep.subr.bf16.mxu0 %v6211_v28  ;;  %v6289_v28 = vld [vmem:[%s6969_s24 + $0x1c0] ss:$24 sps:$4 sm:$0xff]  }
  0xed   : > { %2845 = vmatpush1.bf16.msra.mxu1 %v6206_v29  ;;  %v6294_v29 = vld [vmem:[%s6969_s24 + $0x1ec] ss:$24 sps:$4 sm:$0xff]  }
  0xee   : > { %2927 = vmatpush1.bf16.msra.mxu0 %v6209_v30  ;;  %2846 = vmatprep.subr.bf16.mxu1 %v6214_v31  ;;  %v6297_v30 = vld [vmem:[%s6969_s24 + $0x1f4] ss:$24 sps:$4 sm:$0xff]   ;;  %v6292_v31 = vld [vmem:[%s6969_s24 + $0x1e8] ss:$24 sps:$4 sm:$0xff]  }
  0xef   : > { %2928 = vmatprep.subr.bf16.mxu0 %v6217_v32  ;;  %v6295_v32 = vld [vmem:[%s6969_s24 + $0x1f0] ss:$24 sps:$4 sm:$0xff]  }
  0xf1   : > { %2847 = vmatpush1.bf16.msra.mxu1 %v6212_v33  ;;  %v6300_v33 = vld [vmem:[%s6969_s24 + $0x21c] ss:$24 sps:$4 sm:$0xff]  }
  0xf2   : > { %2929 = vmatpush1.bf16.msra.mxu0 %v6215_v36  ;;  %2848 = vmatprep.subr.bf16.mxu1 %v6220_v37  ;;  %v6303_v36 = vld [vmem:[%s6969_s24 + $0x224] ss:$24 sps:$4 sm:$0xff]   ;;  %v6298_v37 = vld [vmem:[%s6969_s24 + $0x218] ss:$24 sps:$4 sm:$0xff]  }
  0xf3   : > { %2930 = vmatprep.subr.bf16.mxu0 %v6223_v38  ;;  %v6301_v38 = vld [vmem:[%s6969_s24 + $0x220] ss:$24 sps:$4 sm:$0xff]  }
  0xf5   : > { %2849 = vmatpush1.bf16.msra.mxu1 %v6218_v39  ;;  %v6306_v39 = vld [vmem:[%s6969_s24 + $0x24c] ss:$24 sps:$4 sm:$0xff]  }
  0xf6   : > { %2931 = vmatpush1.bf16.msra.mxu0 %v6221_v42  ;;  %2850 = vmatprep.subr.bf16.mxu1 %v6226_v43  ;;  %v6309_v42 = vld [vmem:[%s6969_s24 + $0x254] ss:$24 sps:$4 sm:$0xff]   ;;  %v6304_v43 = vld [vmem:[%s6969_s24 + $0x248] ss:$24 sps:$4 sm:$0xff]  }
  0xf7   : > { %2932 = vmatprep.subr.bf16.mxu0 %v6229_v44  ;;  %v6307_v44 = vld [vmem:[%s6969_s24 + $0x250] ss:$24 sps:$4 sm:$0xff]  }
  0xf9   : > { %2851 = vmatpush1.bf16.msra.mxu1 %v6224_v45  ;;  %v6312_v45 = vld [vmem:[%s6969_s24 + $0x27c] ss:$24 sps:$4 sm:$0xff]  }
  0xfa   : > { %2933 = vmatpush1.bf16.msra.mxu0 %v6227_v46  ;;  %2943 = vmatprep.subr.bf16.mxu1 %v6234_v47  ;;  %v6315_v46 = vld [vmem:[%s6969_s24 + $0x284] ss:$24 sps:$4 sm:$0xff]   ;;  %v6310_v47 = vld [vmem:[%s6969_s24 + $0x278] ss:$24 sps:$4 sm:$0xff]  }
  0xfb   : > { %3107 = vmatprep.subr.bf16.mxu0 %v6237_v48  ;;  %v6313_v48 = vld [vmem:[%s6969_s24 + $0x280] ss:$24 sps:$4 sm:$0xff]  }
  0xfc   : > { %2853 = vmatmul.mubr.bf16.vlgmr.msra.gmra.mrb[0].mxu1 %v7078_v34 }
  0xfd   : > { %2935 = vmatmul.mubr.bf16.vlgmr.msra.gmra.mrb[0].mxu0 %v7081_v35  ;;  %2944 = vmatpush1.bf16.msra.mxu1 %v6232_v49  ;;  %v6318_v49 = vld [vmem:[%s6969_s24 + $0x2ac] ss:$24 sps:$4 sm:$0xff]  }
  0xfe   : > { %3108 = vmatpush1.bf16.msra.mxu0 %v6235_v50  ;;  %2945 = vmatprep.subr.bf16.mxu1 %v6240_v51  ;;  %v6321_v50 = vld [vmem:[%s6969_s24 + $0x2b4] ss:$24 sps:$4 sm:$0xff]   ;;  %v6316_v51 = vld [vmem:[%s6969_s24 + $0x2a8] ss:$24 sps:$4 sm:$0xff]  }
  0xff   : > { %3109 = vmatprep.subr.bf16.mxu0 %v6243_v52  ;;  %2975 = vmatprep.mubr.bf16.mxu1 %v7050_v13  ;;  %v6319_v52 = vld [vmem:[%s6969_s24 + $0x2b0] ss:$24 sps:$4 sm:$0xff]  }
 0x100   : > { %3139 = vmatprep.mubr.bf16.mxu0 %v7050_v13  ;;  %v6258_v13 = vld [vmem:[%s6969_s24 + $0xcc] ss:$24 sps:$4 sm:$0xff]  }
 0x101   : > { %2946 = vmatpush1.bf16.msra.mxu1 %v6238_v53  ;;  %v6324_v53 = vld [vmem:[%s6969_s24 + $0x2dc] ss:$24 sps:$4 sm:$0xff]  }
 0x102   : > { %3110 = vmatpush1.bf16.msra.mxu0 %v6241_v54  ;;  %2947 = vmatprep.subr.bf16.mxu1 %v6246_v55  ;;  %v6327_v54 = vld [vmem:[%s6969_s24 + $0x2e4] ss:$24 sps:$4 sm:$0xff]   ;;  %v6322_v55 = vld [vmem:[%s6969_s24 + $0x2d8] ss:$24 sps:$4 sm:$0xff]  }
 0x103   : > { %3111 = vmatprep.subr.bf16.mxu0 %v6249_v57  ;;  %v6325_v57 = vld [vmem:[%s6969_s24 + $0x2e0] ss:$24 sps:$4 sm:$0xff]  }
 0x105   : > { %2948 = vmatpush1.bf16.msra.mxu1 %v6244_v58  ;;  %v6330_v58 = vld [vmem:[%s6969_s24 + $0x30c] ss:$24 sps:$4 sm:$0xff]  }
 0x106   : > { %3112 = vmatpush1.bf16.msra.mxu0 %v6247_v59  ;;  %2949 = vmatprep.subr.bf16.mxu1 %v6252_v60  ;;  %v6333_v59 = vld [vmem:[%s6969_s24 + $0x314] ss:$24 sps:$4 sm:$0xff]   ;;  %v6328_v60 = vld [vmem:[%s6969_s24 + $0x308] ss:$24 sps:$4 sm:$0xff]  }
 0x107   : > { %3113 = vmatprep.subr.bf16.mxu0 %v6255_v62  ;;  %v6331_v62 = vld [vmem:[%s6969_s24 + $0x310] ss:$24 sps:$4 sm:$0xff]  }
 0x109   : > { %2950 = vmatpush1.bf16.msra.mxu1 %v6250_v63  ;;  %v6336_v63 = vld [vmem:[%s6969_s24 + $0x33c] ss:$24 sps:$4 sm:$0xff]  }
 0x10a   : > { %3114 = vmatpush1.bf16.msra.mxu0 %v6253_v0  ;;  %2951 = vmatprep.subr.bf16.mxu1 %v6258_v13  ;;  %v6339_v0 = vld [vmem:[%s6969_s24 + $0x344] ss:$24 sps:$4 sm:$0xff]   ;;  %v6334_v13 = vld [vmem:[%s6969_s24 + $0x338] ss:$24 sps:$4 sm:$0xff]  }
 0x10b   : > { %3115 = vmatprep.subr.bf16.mxu0 %v6261_v1  ;;  %v6337_v1 = vld [vmem:[%s6969_s24 + $0x340] ss:$24 sps:$4 sm:$0xff]  }
 0x10d   : > { %2952 = vmatpush1.bf16.msra.mxu1 %v6256_v2  ;;  %v6342_v2 = vld [vmem:[%s6969_s24 + $0x36c] ss:$24 sps:$4 sm:$0xff]  }
 0x10e   : > { %3116 = vmatpush1.bf16.msra.mxu0 %v6259_v4  ;;  %2953 = vmatprep.subr.bf16.mxu1 %v6264_v5  ;;  %v6345_v4 = vld [vmem:[%s6969_s24 + $0x374] ss:$24 sps:$4 sm:$0xff]   ;;  %v6343_v5 = vld [vmem:[%s6969_s24 + $0x370] ss:$24 sps:$4 sm:$0xff]  }
 0x10f   : > { %3117 = vmatprep.subr.bf16.mxu0 %v6267_v6  ;;  %v6348_v6 = vld [vmem:[%s6969_s24 + $0x39c] ss:$24 sps:$4 sm:$0xff]  }
 0x111   : > { %2954 = vmatpush1.bf16.msra.mxu1 %v6262_v7  ;;  %v6351_v7 = vld [vmem:[%s6969_s24 + $0x3a4] ss:$24 sps:$4 sm:$0xff]  }
 0x112   : > { %3118 = vmatpush1.bf16.msra.mxu0 %v6265_v9  ;;  %2955 = vmatprep.subr.bf16.mxu1 %v6270_v10  ;;  %v6346_v9 = vld [vmem:[%s6969_s24 + $0x398] ss:$24 sps:$4 sm:$0xff]  }
 0x113   : > { %3119 = vmatprep.subr.bf16.mxu0 %v6273_v11  ;;  %v6349_v10 = vld [vmem:[%s6969_s24 + $0x3a0] ss:$24 sps:$4 sm:$0xff]   ;;  %v6357_v11 = vld [vmem:[%s6969_s24 + $0x3d4] ss:$24 sps:$4 sm:$0xff]  }
 0x115   : > { %2956 = vmatpush1.bf16.msra.mxu1 %v6268_v12  ;;  %v6352_v12 = vld [vmem:[%s6969_s24 + $0x3c8] ss:$24 sps:$4 sm:$0xff]  }
 0x116   : > { %3120 = vmatpush1.bf16.msra.mxu0 %v6271_v16  ;;  %2957 = vmatprep.subr.bf16.mxu1 %v6276_v17  ;;  %v6355_v16 = vld [vmem:[%s6969_s24 + $0x3d0] ss:$24 sps:$4 sm:$0xff]   ;;  %v6360_v17 = vld [vmem:[%s6969_s24 + $0x3fc] ss:$24 sps:$4 sm:$0xff]  }
 0x117   : > { %3121 = vmatprep.subr.bf16.mxu0 %v6279_v18  ;;  %v6363_v18 = vld [vmem:[%s6969_s24 + $0x404] ss:$24 sps:$4 sm:$0xff]  }
 0x119   : > { %2958 = vmatpush1.bf16.msra.mxu1 %v6274_v19  ;;  %v6358_v19 = vld [vmem:[%s6969_s24 + $0x3f8] ss:$24 sps:$4 sm:$0xff]  }
 0x11a   : > { %3122 = vmatpush1.bf16.msra.mxu0 %v6277_v20  ;;  %2959 = vmatprep.subr.bf16.mxu1 %v6282_v21  ;;  %v6361_v20 = vld [vmem:[%s6969_s24 + $0x400] ss:$24 sps:$4 sm:$0xff]   ;;  %v6366_v21 = vld [vmem:[%s6969_s24 + $0x42c] ss:$24 sps:$4 sm:$0xff]  }
 0x11b   : > { %3123 = vmatprep.subr.bf16.mxu0 %v6285_v22  ;;  %v6369_v22 = vld [vmem:[%s6969_s24 + $0x434] ss:$24 sps:$4 sm:$0xff]  }
 0x11d   : > { %2960 = vmatpush1.bf16.msra.mxu1 %v6280_v23  ;;  %v6364_v23 = vld [vmem:[%s6969_s24 + $0x428] ss:$24 sps:$4 sm:$0xff]  }
 0x11e   : > { %3124 = vmatpush1.bf16.msra.mxu0 %v6283_v24  ;;  %2961 = vmatprep.subr.bf16.mxu1 %v6288_v25  ;;  %v6367_v24 = vld [vmem:[%s6969_s24 + $0x430] ss:$24 sps:$4 sm:$0xff]   ;;  %v6372_v25 = vld [vmem:[%s6969_s24 + $0x45c] ss:$24 sps:$4 sm:$0xff]  }
 0x11f   : > { %3125 = vmatprep.subr.bf16.mxu0 %v6291_v26  ;;  %v6375_v26 = vld [vmem:[%s6969_s24 + $0x464] ss:$24 sps:$4 sm:$0xff]  }
 0x121   : > { %2962 = vmatpush1.bf16.msra.mxu1 %v6286_v27  ;;  %v6370_v27 = vld [vmem:[%s6969_s24 + $0x458] ss:$24 sps:$4 sm:$0xff]  }
 0x122   : > { %3126 = vmatpush1.bf16.msra.mxu0 %v6289_v28  ;;  %2963 = vmatprep.subr.bf16.mxu1 %v6294_v29  ;;  %v6373_v28 = vld [vmem:[%s6969_s24 + $0x460] ss:$24 sps:$4 sm:$0xff]   ;;  %v6378_v29 = vld [vmem:[%s6969_s24 + $0x48c] ss:$24 sps:$4 sm:$0xff]  }
 0x123   : > { %3127 = vmatprep.subr.bf16.mxu0 %v6297_v30  ;;  %v6381_v30 = vld [vmem:[%s6969_s24 + $0x494] ss:$24 sps:$4 sm:$0xff]  }
 0x125   : > { %2964 = vmatpush1.bf16.msra.mxu1 %v6292_v31  ;;  %v6376_v31 = vld [vmem:[%s6969_s24 + $0x488] ss:$24 sps:$4 sm:$0xff]  }
 0x126   : > { %3128 = vmatpush1.bf16.msra.mxu0 %v6295_v32  ;;  %2965 = vmatprep.subr.bf16.mxu1 %v6300_v33  ;;  %v6379_v32 = vld [vmem:[%s6969_s24 + $0x490] ss:$24 sps:$4 sm:$0xff]   ;;  %v6384_v33 = vld [vmem:[%s6969_s24 + $0x4bc] ss:$24 sps:$4 sm:$0xff]  }
 0x127   : > { %3129 = vmatprep.subr.bf16.mxu0 %v6303_v36  ;;  %v6387_v36 = vld [vmem:[%s6969_s24 + $0x4c4] ss:$24 sps:$4 sm:$0xff]  }
 0x129   : > { %2966 = vmatpush1.bf16.msra.mxu1 %v6298_v37  ;;  %v6382_v37 = vld [vmem:[%s6969_s24 + $0x4b8] ss:$24 sps:$4 sm:$0xff]  }
 0x12a   : > { %3130 = vmatpush1.bf16.msra.mxu0 %v6301_v38  ;;  %2967 = vmatprep.subr.bf16.mxu1 %v6306_v39  ;;  %v6385_v38 = vld [vmem:[%s6969_s24 + $0x4c0] ss:$24 sps:$4 sm:$0xff]   ;;  %v6390_v39 = vld [vmem:[%s6969_s24 + $0x4ec] ss:$24 sps:$4 sm:$0xff]  }
 0x12b   : > { %3131 = vmatprep.subr.bf16.mxu0 %v6309_v42  ;;  %v6393_v42 = vld [vmem:[%s6969_s24 + $0x4f4] ss:$24 sps:$4 sm:$0xff]  }
 0x12d   : > { %2968 = vmatpush1.bf16.msra.mxu1 %v6304_v43  ;;  %v6388_v43 = vld [vmem:[%s6969_s24 + $0x4e8] ss:$24 sps:$4 sm:$0xff]  }
 0x12e   : > { %3132 = vmatpush1.bf16.msra.mxu0 %v6307_v44  ;;  %2969 = vmatprep.subr.bf16.mxu1 %v6312_v45  ;;  %v6391_v44 = vld [vmem:[%s6969_s24 + $0x4f0] ss:$24 sps:$4 sm:$0xff]   ;;  %v6396_v45 = vld [vmem:[%s6969_s24 + $0x51c] ss:$24 sps:$4 sm:$0xff]  }
 0x12f   : > { %3133 = vmatprep.subr.bf16.mxu0 %v6315_v46  ;;  %v6399_v46 = vld [vmem:[%s6969_s24 + $0x524] ss:$24 sps:$4 sm:$0xff]  }
 0x131   : > { %2970 = vmatpush1.bf16.msra.mxu1 %v6310_v47  ;;  %v6394_v47 = vld [vmem:[%s6969_s24 + $0x518] ss:$24 sps:$4 sm:$0xff]  }
 0x132   : > { %3134 = vmatpush1.bf16.msra.mxu0 %v6313_v48  ;;  %2971 = vmatprep.subr.bf16.mxu1 %v6318_v49  ;;  %v6397_v48 = vld [vmem:[%s6969_s24 + $0x520] ss:$24 sps:$4 sm:$0xff]   ;;  %v6402_v49 = vld [vmem:[%s6969_s24 + $0x54c] ss:$24 sps:$4 sm:$0xff]  }
 0x133   : > { %3135 = vmatprep.subr.bf16.mxu0 %v6321_v50  ;;  %v6405_v50 = vld [vmem:[%s6969_s24 + $0x554] ss:$24 sps:$4 sm:$0xff]  }
 0x135   : > { %2972 = vmatpush1.bf16.msra.mxu1 %v6316_v51  ;;  %v6400_v51 = vld [vmem:[%s6969_s24 + $0x548] ss:$24 sps:$4 sm:$0xff]  }
 0x136   : > { %3136 = vmatpush1.bf16.msra.mxu0 %v6319_v52  ;;  %2973 = vmatprep.subr.bf16.mxu1 %v6324_v53  ;;  %v6403_v52 = vld [vmem:[%s6969_s24 + $0x550] ss:$24 sps:$4 sm:$0xff]   ;;  %v6408_v53 = vld [vmem:[%s6969_s24 + $0x57c] ss:$24 sps:$4 sm:$0xff]  }
 0x137   : > { %3137 = vmatprep.subr.bf16.mxu0 %v6327_v54  ;;  %v6411_v54 = vld [vmem:[%s6969_s24 + $0x584] ss:$24 sps:$4 sm:$0xff]  }
 0x139   : > { %2974 = vmatpush1.bf16.msra.mxu1 %v6322_v55  ;;  %v6406_v55 = vld [vmem:[%s6969_s24 + $0x578] ss:$24 sps:$4 sm:$0xff]  }
 0x13a   : > { %3138 = vmatpush1.bf16.msra.mxu0 %v6325_v57  ;;  %2984 = vmatprep.subr.bf16.mxu1 %v6330_v58  ;;  %v6409_v57 = vld [vmem:[%s6969_s24 + $0x580] ss:$24 sps:$4 sm:$0xff]   ;;  %v6414_v58 = vld [vmem:[%s6969_s24 + $0x5ac] ss:$24 sps:$4 sm:$0xff]  }
 0x13b   : > { %3148 = vmatprep.subr.bf16.mxu0 %v6333_v59  ;;  %v6417_v59 = vld [vmem:[%s6969_s24 + $0x5b4] ss:$24 sps:$4 sm:$0xff]  }
 0x13c   : > { %2976 = vmatmul.mubr.bf16.vlgmr.msra.gmra.mrb[4].mxu1 %v7042_v8 }
 0x13d   : > { %3140 = vmatmul.mubr.bf16.vlgmr.msra.gmra.mrb[4].mxu0 %v7042_v8  ;;  %2985 = vmatpush1.bf16.msra.mxu1 %v6328_v60  ;;  %v6340_v8 = vld [vmem:[%s6969_s24 + $0x368] ss:$24 sps:$4 sm:$0xff]  }
 0x13e   : > { %3149 = vmatpush1.bf16.msra.mxu0 %v6331_v62  ;;  %2986 = vmatprep.subr.bf16.mxu1 %v6336_v63  ;;  %v6412_v60 = vld [vmem:[%s6969_s24 + $0x5a8] ss:$24 sps:$4 sm:$0xff]   ;;  %v6420_v63 = vld [vmem:[%s6969_s24 + $0x5dc] ss:$24 sps:$4 sm:$0xff]  }
 0x13f   : > { %3150 = vmatprep.subr.bf16.mxu0 %v6339_v0  ;;  %3016 = vmatprep.mubr.bf16.mxu1 %v7089_v40  ;;  %v6415_v62 = vld [vmem:[%s6969_s24 + $0x5b0] ss:$24 sps:$4 sm:$0xff]   ;;  %v6423_v0 = vld [vmem:[%s6969_s24 + $0x5e4] ss:$24 sps:$4 sm:$0xff]  }
 0x140   : > { %3180 = vmatprep.mubr.bf16.mxu0 %v7089_v40  ;;  %v6354_v40 = vld [vmem:[%s6969_s24 + $0x3cc] ss:$24 sps:$4 sm:$0xff]  }
 0x141   : > { %2987 = vmatpush1.bf16.msra.mxu1 %v6334_v13  ;;  %v6418_v13 = vld [vmem:[%s6969_s24 + $0x5d8] ss:$24 sps:$4 sm:$0xff]  }
 0x142   : > { %3151 = vmatpush1.bf16.msra.mxu0 %v6337_v1  ;;  %2988 = vmatprep.subr.bf16.mxu1 %v6342_v2  ;;  %v6421_v1 = vld [vmem:[%s6969_s24 + $0x5e0] ss:$24 sps:$4 sm:$0xff]   ;;  %v6426_v2 = vld [vmem:[%s6969_s24 + $0x60c] ss:$24 sps:$4 sm:$0xff]  }
 0x143   : > { %3152 = vmatprep.subr.bf16.mxu0 %v6345_v4  ;;  %v6429_v4 = vld [vmem:[%s6969_s24 + $0x614] ss:$24 sps:$4 sm:$0xff]  }
 0x145   : > { %2989 = vmatpush1.bf16.msra.mxu1 %v6340_v8  ;;  %v6424_v8 = vld [vmem:[%s6969_s24 + $0x608] ss:$24 sps:$4 sm:$0xff]  }
 0x146   : > { %3153 = vmatpush1.bf16.msra.mxu0 %v6343_v5  ;;  %2990 = vmatprep.subr.bf16.mxu1 %v6348_v6  ;;  %v6427_v5 = vld [vmem:[%s6969_s24 + $0x610] ss:$24 sps:$4 sm:$0xff]   ;;  %v6432_v6 = vld [vmem:[%s6969_s24 + $0x63c] ss:$24 sps:$4 sm:$0xff]  }
 0x147   : > { %3154 = vmatprep.subr.bf16.mxu0 %v6351_v7  ;;  %v6435_v7 = vld [vmem:[%s6969_s24 + $0x644] ss:$24 sps:$4 sm:$0xff]  }
 0x149   : > { %2991 = vmatpush1.bf16.msra.mxu1 %v6346_v9  ;;  %v6430_v9 = vld [vmem:[%s6969_s24 + $0x638] ss:$24 sps:$4 sm:$0xff]  }
 0x14a   : > { %3155 = vmatpush1.bf16.msra.mxu0 %v6349_v10  ;;  %2992 = vmatprep.subr.bf16.mxu1 %v6354_v40  ;;  %v6433_v10 = vld [vmem:[%s6969_s24 + $0x640] ss:$24 sps:$4 sm:$0xff]   ;;  %v6438_v40 = vld [vmem:[%s6969_s24 + $0x66c] ss:$24 sps:$4 sm:$0xff]  }
 0x14b   : > { %3156 = vmatprep.subr.bf16.mxu0 %v6357_v11  ;;  %v6441_v11 = vld [vmem:[%s6969_s24 + $0x674] ss:$24 sps:$4 sm:$0xff]  }
 0x14d   : > { %2993 = vmatpush1.bf16.msra.mxu1 %v6352_v12  ;;  %v6439_v12 = vld [vmem:[%s6969_s24 + $0x670] ss:$24 sps:$4 sm:$0xff]  }
 0x14e   : > { %3157 = vmatpush1.bf16.msra.mxu0 %v6355_v16  ;;  %2994 = vmatprep.subr.bf16.mxu1 %v6360_v17  ;;  %v6444_v16 = vld [vmem:[%s6969_s24 + $0x69c] ss:$24 sps:$4 sm:$0xff]  }
 0x14f   : > { %3158 = vmatprep.subr.bf16.mxu0 %v6363_v18  ;;  %v6447_v17 = vld [vmem:[%s6969_s24 + $0x6a4] ss:$24 sps:$4 sm:$0xff]   ;;  %v6442_v18 = vld [vmem:[%s6969_s24 + $0x698] ss:$24 sps:$4 sm:$0xff]  }
 0x151   : > { %2995 = vmatpush1.bf16.msra.mxu1 %v6358_v19  ;;  %v6445_v19 = vld [vmem:[%s6969_s24 + $0x6a0] ss:$24 sps:$4 sm:$0xff]  }
 0x152   : > { %3159 = vmatpush1.bf16.msra.mxu0 %v6361_v20  ;;  %2996 = vmatprep.subr.bf16.mxu1 %v6366_v21  ;;  %v6453_v20 = vld [vmem:[%s6969_s24 + $0x6d4] ss:$24 sps:$4 sm:$0xff]   ;;  %v6448_v21 = vld [vmem:[%s6969_s24 + $0x6c8] ss:$24 sps:$4 sm:$0xff]  }
 0x153   : > { %3160 = vmatprep.subr.bf16.mxu0 %v6369_v22  ;;  %v6451_v22 = vld [vmem:[%s6969_s24 + $0x6d0] ss:$24 sps:$4 sm:$0xff]  }
 0x155   : > { %2997 = vmatpush1.bf16.msra.mxu1 %v6364_v23  ;;  %v6456_v23 = vld [vmem:[%s6969_s24 + $0x6fc] ss:$24 sps:$4 sm:$0xff]  }
 0x156   : > { %3161 = vmatpush1.bf16.msra.mxu0 %v6367_v24  ;;  %2998 = vmatprep.subr.bf16.mxu1 %v6372_v25  ;;  %v6459_v24 = vld [vmem:[%s6969_s24 + $0x704] ss:$24 sps:$4 sm:$0xff]   ;;  %v6454_v25 = vld [vmem:[%s6969_s24 + $0x6f8] ss:$24 sps:$4 sm:$0xff]  }
 0x157   : > { %3162 = vmatprep.subr.bf16.mxu0 %v6375_v26  ;;  %v6457_v26 = vld [vmem:[%s6969_s24 + $0x700] ss:$24 sps:$4 sm:$0xff]  }
 0x159   : > { %2999 = vmatpush1.bf16.msra.mxu1 %v6370_v27  ;;  %v6462_v27 = vld [vmem:[%s6969_s24 + $0x72c] ss:$24 sps:$4 sm:$0xff]  }
 0x15a   : > { %3163 = vmatpush1.bf16.msra.mxu0 %v6373_v28  ;;  %3000 = vmatprep.subr.bf16.mxu1 %v6378_v29  ;;  %v6465_v28 = vld [vmem:[%s6969_s24 + $0x734] ss:$24 sps:$4 sm:$0xff]   ;;  %v6460_v29 = vld [vmem:[%s6969_s24 + $0x728] ss:$24 sps:$4 sm:$0xff]  }
 0x15b   : > { %3164 = vmatprep.subr.bf16.mxu0 %v6381_v30  ;;  %v6463_v30 = vld [vmem:[%s6969_s24 + $0x730] ss:$24 sps:$4 sm:$0xff]  }
 0x15d   : > { %3001 = vmatpush1.bf16.msra.mxu1 %v6376_v31  ;;  %v6468_v31 = vld [vmem:[%s6969_s24 + $0x75c] ss:$24 sps:$4 sm:$0xff]  }
 0x15e   : > { %3165 = vmatpush1.bf16.msra.mxu0 %v6379_v32  ;;  %3002 = vmatprep.subr.bf16.mxu1 %v6384_v33  ;;  %v6471_v32 = vld [vmem:[%s6969_s24 + $0x764] ss:$24 sps:$4 sm:$0xff]   ;;  %v6466_v33 = vld [vmem:[%s6969_s24 + $0x758] ss:$24 sps:$4 sm:$0xff]  }
 0x15f   : > { %3166 = vmatprep.subr.bf16.mxu0 %v6387_v36  ;;  %v6469_v36 = vld [vmem:[%s6969_s24 + $0x760] ss:$24 sps:$4 sm:$0xff]  }
 0x161   : > { %3003 = vmatpush1.bf16.msra.mxu1 %v6382_v37  ;;  %v6474_v37 = vld [vmem:[%s6969_s24 + $0x78c] ss:$24 sps:$4 sm:$0xff]  }
 0x162   : > { %3167 = vmatpush1.bf16.msra.mxu0 %v6385_v38  ;;  %3004 = vmatprep.subr.bf16.mxu1 %v6390_v39  ;;  %v6477_v38 = vld [vmem:[%s6969_s24 + $0x794] ss:$24 sps:$4 sm:$0xff]   ;;  %v6472_v39 = vld [vmem:[%s6969_s24 + $0x788] ss:$24 sps:$4 sm:$0xff]  }
 0x163   : > { %3168 = vmatprep.subr.bf16.mxu0 %v6393_v42  ;;  %v6475_v42 = vld [vmem:[%s6969_s24 + $0x790] ss:$24 sps:$4 sm:$0xff]  }
 0x165   : > { %3005 = vmatpush1.bf16.msra.mxu1 %v6388_v43  ;;  %v6480_v43 = vld [vmem:[%s6969_s24 + $0x7bc] ss:$24 sps:$4 sm:$0xff]  }
 0x166   : > { %3169 = vmatpush1.bf16.msra.mxu0 %v6391_v44  ;;  %3006 = vmatprep.subr.bf16.mxu1 %v6396_v45  ;;  %v6483_v44 = vld [vmem:[%s6969_s24 + $0x7c4] ss:$24 sps:$4 sm:$0xff]   ;;  %v6478_v45 = vld [vmem:[%s6969_s24 + $0x7b8] ss:$24 sps:$4 sm:$0xff]  }
 0x167   : > { %3170 = vmatprep.subr.bf16.mxu0 %v6399_v46  ;;  %v6481_v46 = vld [vmem:[%s6969_s24 + $0x7c0] ss:$24 sps:$4 sm:$0xff]  }
 0x169   : > { %3007 = vmatpush1.bf16.msra.mxu1 %v6394_v47  ;;  %v6486_v47 = vld [vmem:[%s6969_s24 + $0x7ec] ss:$24 sps:$4 sm:$0xff]  }
 0x16a   : > { %3171 = vmatpush1.bf16.msra.mxu0 %v6397_v48  ;;  %3008 = vmatprep.subr.bf16.mxu1 %v6402_v49  ;;  %v6489_v48 = vld [vmem:[%s6969_s24 + $0x7f4] ss:$24 sps:$4 sm:$0xff]   ;;  %v6484_v49 = vld [vmem:[%s6969_s24 + $0x7e8] ss:$24 sps:$4 sm:$0xff]  }
 0x16b   : > { %3172 = vmatprep.subr.bf16.mxu0 %v6405_v50  ;;  %v6487_v50 = vld [vmem:[%s6969_s24 + $0x7f0] ss:$24 sps:$4 sm:$0xff]  }
 0x16d   : > { %3009 = vmatpush1.bf16.msra.mxu1 %v6400_v51  ;;  %v6492_v51 = vld [vmem:[%s6969_s24 + $0x81c] ss:$24 sps:$4 sm:$0xff]  }
 0x16e   : > { %3173 = vmatpush1.bf16.msra.mxu0 %v6403_v52  ;;  %3010 = vmatprep.subr.bf16.mxu1 %v6408_v53  ;;  %v6495_v52 = vld [vmem:[%s6969_s24 + $0x824] ss:$24 sps:$4 sm:$0xff]   ;;  %v6490_v53 = vld [vmem:[%s6969_s24 + $0x818] ss:$24 sps:$4 sm:$0xff]  }
 0x16f   : > { %3174 = vmatprep.subr.bf16.mxu0 %v6411_v54  ;;  %v6493_v54 = vld [vmem:[%s6969_s24 + $0x820] ss:$24 sps:$4 sm:$0xff]  }
 0x171   : > { %3011 = vmatpush1.bf16.msra.mxu1 %v6406_v55  ;;  %v6498_v55 = vld [vmem:[%s6969_s24 + $0x84c] ss:$24 sps:$4 sm:$0xff]  }
 0x172   : > { %3175 = vmatpush1.bf16.msra.mxu0 %v6409_v57  ;;  %3012 = vmatprep.subr.bf16.mxu1 %v6414_v58  ;;  %v6501_v57 = vld [vmem:[%s6969_s24 + $0x854] ss:$24 sps:$4 sm:$0xff]   ;;  %v6496_v58 = vld [vmem:[%s6969_s24 + $0x848] ss:$24 sps:$4 sm:$0xff]  }
 0x173   : > { %3176 = vmatprep.subr.bf16.mxu0 %v6417_v59  ;;  %v6499_v59 = vld [vmem:[%s6969_s24 + $0x850] ss:$24 sps:$4 sm:$0xff]  }
 0x175   : > { %3013 = vmatpush1.bf16.msra.mxu1 %v6412_v60  ;;  %v6504_v60 = vld [vmem:[%s6969_s24 + $0x87c] ss:$24 sps:$4 sm:$0xff]  }
 0x176   : > { %3177 = vmatpush1.bf16.msra.mxu0 %v6415_v62  ;;  %3014 = vmatprep.subr.bf16.mxu1 %v6420_v63  ;;  %v6507_v62 = vld [vmem:[%s6969_s24 + $0x884] ss:$24 sps:$4 sm:$0xff]   ;;  %v6502_v63 = vld [vmem:[%s6969_s24 + $0x878] ss:$24 sps:$4 sm:$0xff]  }
 0x177   : > { %3178 = vmatprep.subr.bf16.mxu0 %v6423_v0  ;;  %v6505_v0 = vld [vmem:[%s6969_s24 + $0x880] ss:$24 sps:$4 sm:$0xff]  }
 0x179   : > { %3015 = vmatpush1.bf16.msra.mxu1 %v6418_v13  ;;  %v6510_v13 = vld [vmem:[%s6969_s24 + $0x8ac] ss:$24 sps:$4 sm:$0xff]  }
 0x17a   : > { %3179 = vmatpush1.bf16.msra.mxu0 %v6421_v1  ;;  %3025 = vmatprep.subr.bf16.mxu1 %v6426_v2  ;;  %v6513_v1 = vld [vmem:[%s6969_s24 + $0x8b4] ss:$24 sps:$4 sm:$0xff]   ;;  %v6508_v2 = vld [vmem:[%s6969_s24 + $0x8a8] ss:$24 sps:$4 sm:$0xff]  }
 0x17b   : > { %3189 = vmatprep.subr.bf16.mxu0 %v6429_v4  ;;  %v6511_v4 = vld [vmem:[%s6969_s24 + $0x8b0] ss:$24 sps:$4 sm:$0xff]  }
 0x17c   : > { %3017 = vmatmul.mubr.bf16.vlgmr.msra.gmra.mrb[4].mxu1 %v7078_v34 }
 0x17d   : > { %3181 = vmatmul.mubr.bf16.vlgmr.msra.gmra.mrb[4].mxu0 %v7078_v34  ;;  %3026 = vmatpush1.bf16.msra.mxu1 %v6424_v8  ;;  %v6436_v34 = vld [vmem:[%s6969_s24 + $0x668] ss:$24 sps:$4 sm:$0xff]   ;;  %v6516_v8 = vld [vmem:[%s6969_s24 + $0x8dc] ss:$24 sps:$4 sm:$0xff]  }
 0x17e   : > { %3190 = vmatpush1.bf16.msra.mxu0 %v6427_v5  ;;  %3027 = vmatprep.subr.bf16.mxu1 %v6432_v6  ;;  %v6519_v5 = vld [vmem:[%s6969_s24 + $0x8e4] ss:$24 sps:$4 sm:$0xff]   ;;  %v6514_v6 = vld [vmem:[%s6969_s24 + $0x8d8] ss:$24 sps:$4 sm:$0xff]  }
 0x17f   : > { %3191 = vmatprep.subr.bf16.mxu0 %v6435_v7  ;;  %3057 = vmatprep.mubr.bf16.mxu1 %v7058_v15  ;;  %v6517_v7 = vld [vmem:[%s6969_s24 + $0x8e0] ss:$24 sps:$4 sm:$0xff]  }
 0x180   : > { %3221 = vmatprep.mubr.bf16.mxu0 %v7058_v15  ;;  %v6450_v15 = vld [vmem:[%s6969_s24 + $0x6cc] ss:$24 sps:$4 sm:$0xff]  }
 0x181   : > { %3028 = vmatpush1.bf16.msra.mxu1 %v6430_v9  ;;  %v6522_v9 = vld [vmem:[%s6969_s24 + $0x90c] ss:$24 sps:$4 sm:$0xff]  }
 0x182   : > { %3192 = vmatpush1.bf16.msra.mxu0 %v6433_v10  ;;  %3029 = vmatprep.subr.bf16.mxu1 %v6438_v40  ;;  %v6525_v10 = vld [vmem:[%s6969_s24 + $0x914] ss:$24 sps:$4 sm:$0xff]   ;;  %v6520_v40 = vld [vmem:[%s6969_s24 + $0x908] ss:$24 sps:$4 sm:$0xff]  }
 0x183   : > { %3193 = vmatprep.subr.bf16.mxu0 %v6441_v11  ;;  %v6523_v11 = vld [vmem:[%s6969_s24 + $0x910] ss:$24 sps:$4 sm:$0xff]  }
 0x185   : > { %3030 = vmatpush1.bf16.msra.mxu1 %v6436_v34  ;;  %v6528_v34 = vld [vmem:[%s6969_s24 + $0x93c] ss:$24 sps:$4 sm:$0xff]  }
 0x186   : > { %3194 = vmatpush1.bf16.msra.mxu0 %v6439_v12  ;;  %3031 = vmatprep.subr.bf16.mxu1 %v6444_v16  ;;  %v6531_v12 = vld [vmem:[%s6969_s24 + $0x944] ss:$24 sps:$4 sm:$0xff]   ;;  %v6526_v16 = vld [vmem:[%s6969_s24 + $0x938] ss:$24 sps:$4 sm:$0xff]  }
 0x187   : > { %3195 = vmatprep.subr.bf16.mxu0 %v6447_v17  ;;  %v6529_v17 = vld [vmem:[%s6969_s24 + $0x940] ss:$24 sps:$4 sm:$0xff]  }
 0x189   : > { %3032 = vmatpush1.bf16.msra.mxu1 %v6442_v18  ;;  %v6534_v18 = vld [vmem:[%s6969_s24 + $0x96c] ss:$24 sps:$4 sm:$0xff]  }
 0x18a   : > { %3196 = vmatpush1.bf16.msra.mxu0 %v6445_v19  ;;  %3033 = vmatprep.subr.bf16.mxu1 %v6450_v15  ;;  %v6537_v19 = vld [vmem:[%s6969_s24 + $0x974] ss:$24 sps:$4 sm:$0xff]   ;;  %v6535_v15 = vld [vmem:[%s6969_s24 + $0x970] ss:$24 sps:$4 sm:$0xff]  }
 0x18b   : > { %3197 = vmatprep.subr.bf16.mxu0 %v6453_v20  ;;  %v6540_v20 = vld [vmem:[%s6969_s24 + $0x99c] ss:$24 sps:$4 sm:$0xff]  }
 0x18d   : > { %3034 = vmatpush1.bf16.msra.mxu1 %v6448_v21  ;;  %v6543_v21 = vld [vmem:[%s6969_s24 + $0x9a4] ss:$24 sps:$4 sm:$0xff]  }
 0x18e   : > { %3198 = vmatpush1.bf16.msra.mxu0 %v6451_v22  ;;  %3035 = vmatprep.subr.bf16.mxu1 %v6456_v23  ;;  %v6538_v22 = vld [vmem:[%s6969_s24 + $0x998] ss:$24 sps:$4 sm:$0xff]  }
 0x18f   : > { %3199 = vmatprep.subr.bf16.mxu0 %v6459_v24  ;;  %v6541_v23 = vld [vmem:[%s6969_s24 + $0x9a0] ss:$24 sps:$4 sm:$0xff]   ;;  %v6549_v24 = vld [vmem:[%s6969_s24 + $0x9d4] ss:$24 sps:$4 sm:$0xff]  }
 0x191   : > { %3036 = vmatpush1.bf16.msra.mxu1 %v6454_v25  ;;  %v6544_v25 = vld [vmem:[%s6969_s24 + $0x9c8] ss:$24 sps:$4 sm:$0xff]  }
 0x192   : > { %3200 = vmatpush1.bf16.msra.mxu0 %v6457_v26  ;;  %3037 = vmatprep.subr.bf16.mxu1 %v6462_v27  ;;  %v6547_v26 = vld [vmem:[%s6969_s24 + $0x9d0] ss:$24 sps:$4 sm:$0xff]   ;;  %v6552_v27 = vld [vmem:[%s6969_s24 + $0x9fc] ss:$24 sps:$4 sm:$0xff]  }
 0x193   : > { %3201 = vmatprep.subr.bf16.mxu0 %v6465_v28  ;;  %v6555_v28 = vld [vmem:[%s6969_s24 + $0xa04] ss:$24 sps:$4 sm:$0xff]  }
 0x195   : > { %3038 = vmatpush1.bf16.msra.mxu1 %v6460_v29  ;;  %v6550_v29 = vld [vmem:[%s6969_s24 + $0x9f8] ss:$24 sps:$4 sm:$0xff]  }
 0x196   : > { %3202 = vmatpush1.bf16.msra.mxu0 %v6463_v30  ;;  %3039 = vmatprep.subr.bf16.mxu1 %v6468_v31  ;;  %v6553_v30 = vld [vmem:[%s6969_s24 + $0xa00] ss:$24 sps:$4 sm:$0xff]   ;;  %v6558_v31 = vld [vmem:[%s6969_s24 + $0xa2c] ss:$24 sps:$4 sm:$0xff]  }
 0x197   : > { %3203 = vmatprep.subr.bf16.mxu0 %v6471_v32  ;;  %v6561_v32 = vld [vmem:[%s6969_s24 + $0xa34] ss:$24 sps:$4 sm:$0xff]  }
 0x199   : > { %3040 = vmatpush1.bf16.msra.mxu1 %v6466_v33 }
 0x19a   : > { %3204 = vmatpush1.bf16.msra.mxu0 %v6469_v36  ;;  %3041 = vmatprep.subr.bf16.mxu1 %v6474_v37 }
 0x19b   : > { %3205 = vmatprep.subr.bf16.mxu0 %v6477_v38 }
 0x19d   : > { %3042 = vmatpush1.bf16.msra.mxu1 %v6472_v39  ;;  %v426_v39 = vld [vmem:[#allocation2] sm:$0xff] }
 0x19e   : > { %3206 = vmatpush1.bf16.msra.mxu0 %v6475_v42  ;;  %3043 = vmatprep.subr.bf16.mxu1 %v6480_v43 }
 0x19f   : > { %3207 = vmatprep.subr.bf16.mxu0 %v6483_v44 }
 0x1a1   : > { %3044 = vmatpush1.bf16.msra.mxu1 %v6478_v45 }
 0x1a2   : > { %3208 = vmatpush1.bf16.msra.mxu0 %v6481_v46  ;;  %3045 = vmatprep.subr.bf16.mxu1 %v6486_v47  ;;  %v6556_v46 = vld [vmem:[%s6969_s24 + $0xa28] ss:$24 sps:$4 sm:$0xff]  }
 0x1a3   : > { %3209 = vmatprep.subr.bf16.mxu0 %v6489_v48  ;;  %v6559_v47 = vld [vmem:[%s6969_s24 + $0xa30] ss:$24 sps:$4 sm:$0xff]  }
 0x1a5   : > { %3046 = vmatpush1.bf16.msra.mxu1 %v6484_v49 }
 0x1a6   : > { %3210 = vmatpush1.bf16.msra.mxu0 %v6487_v50  ;;  %3047 = vmatprep.subr.bf16.mxu1 %v6492_v51  ;;  %v6564_v50 = vld [vmem:[%s6969_s24 + $0xa5c] ss:$24 sps:$4 sm:$0xff]  }
 0x1a7   : > { %3211 = vmatprep.subr.bf16.mxu0 %v6495_v52  ;;  %v6567_v51 = vld [vmem:[%s6969_s24 + $0xa64] ss:$24 sps:$4 sm:$0xff]  }
 0x1a9   : > { %3048 = vmatpush1.bf16.msra.mxu1 %v6490_v53 }
 0x1aa   : > { %3212 = vmatpush1.bf16.msra.mxu0 %v6493_v54  ;;  %3049 = vmatprep.subr.bf16.mxu1 %v6498_v55  ;;  %v6562_v54 = vld [vmem:[%s6969_s24 + $0xa58] ss:$24 sps:$4 sm:$0xff]  }
 0x1ab   : > { %3213 = vmatprep.subr.bf16.mxu0 %v6501_v57  ;;  %v6565_v55 = vld [vmem:[%s6969_s24 + $0xa60] ss:$24 sps:$4 sm:$0xff]   ;;  %v6570_v57 = vld [vmem:[%s6969_s24 + $0xa8c] ss:$24 sps:$4 sm:$0xff]  }
 0x1ad   : > { %3050 = vmatpush1.bf16.msra.mxu1 %v6496_v58  ;;  %v6573_v58 = vld [vmem:[%s6969_s24 + $0xa94] ss:$24 sps:$4 sm:$0xff]  }
 0x1ae   : > { %3214 = vmatpush1.bf16.msra.mxu0 %v6499_v59  ;;  %3051 = vmatprep.subr.bf16.mxu1 %v6504_v60  ;;  %v6568_v59 = vld [vmem:[%s6969_s24 + $0xa88] ss:$24 sps:$4 sm:$0xff]  }
 0x1af   : > { %3215 = vmatprep.subr.bf16.mxu0 %v6507_v62  ;;  %v6571_v60 = vld [vmem:[%s6969_s24 + $0xa90] ss:$24 sps:$4 sm:$0xff]   ;;  %v6576_v62 = vld [vmem:[%s6969_s24 + $0xabc] ss:$24 sps:$4 sm:$0xff]  }
 0x1b1   : > { %3052 = vmatpush1.bf16.msra.mxu1 %v6502_v63  ;;  %v6579_v63 = vld [vmem:[%s6969_s24 + $0xac4] ss:$24 sps:$4 sm:$0xff]  }
 0x1b2   : > { %3216 = vmatpush1.bf16.msra.mxu0 %v6505_v0  ;;  %3053 = vmatprep.subr.bf16.mxu1 %v6510_v13  ;;  %v6574_v0 = vld [vmem:[%s6969_s24 + $0xab8] ss:$24 sps:$4 sm:$0xff]  }
 0x1b3   : > { %3217 = vmatprep.subr.bf16.mxu0 %v6513_v1  ;;  %v6577_v13 = vld [vmem:[%s6969_s24 + $0xac0] ss:$24 sps:$4 sm:$0xff]   ;;  %v6582_v1 = vld [vmem:[%s6969_s24 + $0xaec] ss:$24 sps:$4 sm:$0xff]  }
 0x1b5   : > { %3054 = vmatpush1.bf16.msra.mxu1 %v6508_v2  ;;  %v6585_v2 = vld [vmem:[%s6969_s24 + $0xaf4] ss:$24 sps:$4 sm:$0xff]  }
 0x1b6   : > { %3218 = vmatpush1.bf16.msra.mxu0 %v6511_v4  ;;  %3055 = vmatprep.subr.bf16.mxu1 %v6516_v8  ;;  %v6580_v4 = vld [vmem:[%s6969_s24 + $0xae8] ss:$24 sps:$4 sm:$0xff]  }
 0x1b7   : > { %3219 = vmatprep.subr.bf16.mxu0 %v6519_v5  ;;  %v6583_v8 = vld [vmem:[%s6969_s24 + $0xaf0] ss:$24 sps:$4 sm:$0xff]   ;;  %v6588_v5 = vld [vmem:[%s6969_s24 + $0xb1c] ss:$24 sps:$4 sm:$0xff]  }
 0x1b9   : > { %3056 = vmatpush1.bf16.msra.mxu1 %v6514_v6  ;;  %v6591_v6 = vld [vmem:[%s6969_s24 + $0xb24] ss:$24 sps:$4 sm:$0xff]  }
 0x1ba   : > { %3220 = vmatpush1.bf16.msra.mxu0 %v6517_v7  ;;  %3066 = vmatprep.subr.bf16.mxu1 %v6522_v9  ;;  %v6586_v7 = vld [vmem:[%s6969_s24 + $0xb18] ss:$24 sps:$4 sm:$0xff]  }
 0x1bb   : > { %3230 = vmatprep.subr.bf16.mxu0 %v6525_v10  ;;  %v6589_v9 = vld [vmem:[%s6969_s24 + $0xb20] ss:$24 sps:$4 sm:$0xff]   ;;  %v6594_v10 = vld [vmem:[%s6969_s24 + $0xb4c] ss:$24 sps:$4 sm:$0xff]  }
 0x1bc   : > { %3058 = vmatmul.mubr.bf16.vlgmr.msra.gmra.mrb[4].mxu1 %v7053_v14 }
 0x1bd   : > { %3222 = vmatmul.mubr.bf16.vlgmr.msra.gmra.mrb[4].mxu0 %v7053_v14  ;;  %3067 = vmatpush1.bf16.msra.mxu1 %v6520_v40  ;;  %v6532_v14 = vld [vmem:[%s6969_s24 + $0x968] ss:$24 sps:$4 sm:$0xff]   ;;  %v6597_v40 = vld [vmem:[%s6969_s24 + $0xb54] ss:$24 sps:$4 sm:$0xff]  }
 0x1be   : > { %3231 = vmatpush1.bf16.msra.mxu0 %v6523_v11  ;;  %3068 = vmatprep.subr.bf16.mxu1 %v6528_v34  ;;  %v6592_v11 = vld [vmem:[%s6969_s24 + $0xb48] ss:$24 sps:$4 sm:$0xff]  }
 0x1bf   : > { %3232 = vmatprep.subr.bf16.mxu0 %v6531_v12  ;;  %3098 = vmatprep.mubr.bf16.mxu1 %v7093_v41  ;;  %v6595_v34 = vld [vmem:[%s6969_s24 + $0xb50] ss:$24 sps:$4 sm:$0xff]   ;;  %v6600_v12 = vld [vmem:[%s6969_s24 + $0xb7c] ss:$24 sps:$4 sm:$0xff]  }
 0x1c0   : > { %3262 = vmatprep.mubr.bf16.mxu0 %v7093_v41  ;;  %v6546_v41 = vld [vmem:[%s6969_s24 + $0x9cc] ss:$24 sps:$4 sm:$0xff]  }
 0x1c1   : > { %3069 = vmatpush1.bf16.msra.mxu1 %v6526_v16  ;;  %v6603_v16 = vld [vmem:[%s6969_s24 + $0xb84] ss:$24 sps:$4 sm:$0xff]  }
 0x1c2   : > { %3233 = vmatpush1.bf16.msra.mxu0 %v6529_v17  ;;  %3070 = vmatprep.subr.bf16.mxu1 %v6534_v18  ;;  %v6598_v17 = vld [vmem:[%s6969_s24 + $0xb78] ss:$24 sps:$4 sm:$0xff]  }
 0x1c3   : > { %3234 = vmatprep.subr.bf16.mxu0 %v6537_v19  ;;  %v6601_v18 = vld [vmem:[%s6969_s24 + $0xb80] ss:$24 sps:$4 sm:$0xff]   ;;  %v6606_v19 = vld [vmem:[%s6969_s24 + $0xbac] ss:$24 sps:$4 sm:$0xff]  }
 0x1c5   : > { %3071 = vmatpush1.bf16.msra.mxu1 %v6532_v14  ;;  %v6609_v14 = vld [vmem:[%s6969_s24 + $0xbb4] ss:$24 sps:$4 sm:$0xff]  }
 0x1c6   : > { %3235 = vmatpush1.bf16.msra.mxu0 %v6535_v15  ;;  %3072 = vmatprep.subr.bf16.mxu1 %v6540_v20  ;;  %v6604_v15 = vld [vmem:[%s6969_s24 + $0xba8] ss:$24 sps:$4 sm:$0xff]  }
 0x1c7   : > { %3236 = vmatprep.subr.bf16.mxu0 %v6543_v21  ;;  %v6607_v20 = vld [vmem:[%s6969_s24 + $0xbb0] ss:$24 sps:$4 sm:$0xff]   ;;  %v6612_v21 = vld [vmem:[%s6969_s24 + $0xbdc] ss:$24 sps:$4 sm:$0xff]  }
 0x1c9   : > { %3073 = vmatpush1.bf16.msra.mxu1 %v6538_v22  ;;  %v6615_v22 = vld [vmem:[%s6969_s24 + $0xbe4] ss:$24 sps:$4 sm:$0xff]  }
 0x1ca   : > { %3237 = vmatpush1.bf16.msra.mxu0 %v6541_v23  ;;  %3074 = vmatprep.subr.bf16.mxu1 %v6546_v41  ;;  %v6610_v23 = vld [vmem:[%s6969_s24 + $0xbd8] ss:$24 sps:$4 sm:$0xff]  }
 0x1cb   : > { %3238 = vmatprep.subr.bf16.mxu0 %v6549_v24  ;;  %v6613_v41 = vld [vmem:[%s6969_s24 + $0xbe0] ss:$24 sps:$4 sm:$0xff]  }
 0x1cd   : > { %3075 = vmatpush1.bf16.msra.mxu1 %v6544_v25 }
 0x1ce   : > { %3239 = vmatpush1.bf16.msra.mxu0 %v6547_v26  ;;  %3076 = vmatprep.subr.bf16.mxu1 %v6552_v27  ;;  %v427_v26 = vld [vmem:[#allocation2 + $0x8] sm:$0xff] }
 0x1cf   : > { %3240 = vmatprep.subr.bf16.mxu0 %v6555_v28  ;;  %v2854_v33 = vpop.f32.mrb[0].mxu1  ;;  %v428_v28 = vld [vmem:[#allocation2 + $0x10] sm:$0xff] }
 0x1d0   : > { %v2936_v36 = vpop.f32.mrb[0].mxu0  ;;  %v2856_v38 = vpop.f32.mrb[1].mxu1 }
 0x1d1   : > { %v5928_v37 = vadd.f32 %v2936_v36, %v2854_v33  ;;  %v2938_v42 = vpop.f32.mrb[1].mxu0  ;;  %v2858_v44 = vpop.f32.mrb[2].mxu1  ;;  %3077 = vmatpush1.bf16.msra.mxu1 %v6550_v29 }
 0x1d2   : > { %v5929_v43 = vadd.f32 %v2938_v42, %v2856_v38  ;;  %v2940_v45 = vpop.f32.mrb[2].mxu0  ;;  %3241 = vmatpush1.bf16.msra.mxu0 %v6553_v30  ;;  %v2859_v48 = vpop.f32.mrb[3].mxu1  ;;  %3078 = vmatprep.subr.bf16.mxu1 %v6558_v31  ;;  %v3299_v42 = vld [vmem:[#allocation8 + $0x18] sm:$0xff] (!%p5330_p4) }
 0x1d3   : > { %v2941_v49 = vpop.f32.mrb[3].mxu0  ;;  %3242 = vmatprep.subr.bf16.mxu0 %v6561_v32  ;;  %v3298_v45 = vld [vmem:[#allocation8 + $0x10] sm:$0xff] (!%p5330_p4) }
 0x1d4   : > { %v3277_v52 = vcombine.low %v5928_v37, %v5929_v43  ;;  %v3296_v43 = vld [vmem:[#allocation8] sm:$0xff] (!%p5330_p4) }
 0x1d5   : > { %3079 = vmatpush1.bf16.msra.mxu1 %v6556_v46  ;;  %v3301_v46 = vld [vmem:[#allocation8 + $0x28] sm:$0xff] (!%p5330_p4)  ;;  %v5418_v48 = vpack.c.bf16 (!%p5330_p4), %v3298_v45, %v3296_v43  ;;  %v3336_v45 = vld [vmem:[#allocation8 + $0x140] sm:$0xff] (!%p5330_p4) }
 0x1d6   : > { %v3283_v53 = vadd.f32 %v3277_v52, %v426_v39  ;;  %3243 = vmatpush1.bf16.msra.mxu0 %v6559_v47  ;;  %3080 = vmatprep.subr.bf16.mxu1 %v6564_v50  ;;  %v3303_v47 = vld [vmem:[#allocation8 + $0x38] sm:$0xff] (!%p5330_p4)  ;;  %v3300_v50 = vld [vmem:[#allocation8 + $0x20] sm:$0xff] (!%p5330_p4)  ;;  %v3305_v52 = vld [vmem:[#allocation8 + $0x48] sm:$0xff] (!%p5330_p4) }
 0x1d7   : > { %3244 = vmatprep.subr.bf16.mxu0 %v6567_v51  ;;  %v5420_v49 = vpack.c.bf16 (!%p5330_p4), %v3303_v47, %v3301_v46  ;;  %v3302_v51 = vld [vmem:[#allocation8 + $0x30] sm:$0xff] (!%p5330_p4)  ;;  %v3341_v47 = vld [vmem:[#allocation8 + $0x168] sm:$0xff] (!%p5330_p4) }
 0x1d8   : > { %3286 = vst [vmem:[#allocation2] sm:$0xff] %v3283_v53  ;;  %v3307_v53 = vld [vmem:[#allocation8 + $0x58] sm:$0xff] (!%p5330_p4)  ;;  %v3338_v46 = vld [vmem:[#allocation8 + $0x150] sm:$0xff] (!%p5330_p4) }
 0x1d9   : > { %3081 = vmatpush1.bf16.msra.mxu1 %v6562_v54  ;;  %v5422_v54 = vpack.c.bf16 (!%p5330_p4), %v3302_v51, %v3300_v50  ;;  %v3340_v51 = vld [vmem:[#allocation8 + $0x160] sm:$0xff] (!%p5330_p4) }
 0x1da   : > { %3245 = vmatpush1.bf16.msra.mxu0 %v6565_v55  ;;  %3082 = vmatprep.subr.bf16.mxu1 %v6570_v57  ;;  %v5424_v55 = vpack.c.bf16 (!%p5330_p4), %v3307_v53, %v3305_v52  ;;  %v3304_v57 = vld [vmem:[#allocation8 + $0x40] sm:$0xff] (!%p5330_p4)  ;;  %v3342_v52 = vld [vmem:[#allocation8 + $0x170] sm:$0xff] (!%p5330_p4)  ;;  %v3345_v53 = vld [vmem:[#allocation8 + $0x188] sm:$0xff] (!%p5330_p4) }
 0x1db   : > { %3246 = vmatprep.subr.bf16.mxu0 %v6573_v58  ;;  %v3306_v58 = vld [vmem:[#allocation8 + $0x50] sm:$0xff] (!%p5330_p4) }
 0x1dd   : > { %3083 = vmatpush1.bf16.msra.mxu1 %v6568_v59  ;;  %v3309_v59 = vld [vmem:[#allocation8 + $0x68] sm:$0xff] (!%p5330_p4) }
 0x1de   : > { %3247 = vmatpush1.bf16.msra.mxu0 %v6571_v60  ;;  %3084 = vmatprep.subr.bf16.mxu1 %v6576_v62  ;;  %v3311_v60 = vld [vmem:[#allocation8 + $0x78] sm:$0xff] (!%p5330_p4)  ;;  %v5426_v62 = vpack.c.bf16 (!%p5330_p4), %v3306_v58, %v3304_v57  ;;  %v3344_v58 = vld [vmem:[#allocation8 + $0x180] sm:$0xff] (!%p5330_p4) }
 0x1df   : > { %3248 = vmatprep.subr.bf16.mxu0 %v6579_v63  ;;  %v5428_v63 = vpack.c.bf16 (!%p5330_p4), %v3311_v60, %v3309_v59  ;;  %v3346_v59 = vld [vmem:[#allocation8 + $0x190] sm:$0xff] (!%p5330_p4)  ;;  %v3349_v60 = vld [vmem:[#allocation8 + $0x1a8] sm:$0xff] (!%p5330_p4) }
 0x1e1   : > { %3085 = vmatpush1.bf16.msra.mxu1 %v6574_v0  ;;  %v3308_v0 = vld [vmem:[#allocation8 + $0x60] sm:$0xff] (!%p5330_p4) }
 0x1e2   : > { %3249 = vmatpush1.bf16.msra.mxu0 %v6577_v13  ;;  %3086 = vmatprep.subr.bf16.mxu1 %v6582_v1  ;;  %v3310_v13 = vld [vmem:[#allocation8 + $0x70] sm:$0xff] (!%p5330_p4)  ;;  %v3313_v1 = vld [vmem:[#allocation8 + $0x88] sm:$0xff] (!%p5330_p4) }
 0x1e3   : > { %3250 = vmatprep.subr.bf16.mxu0 %v6585_v2  ;;  %v3315_v2 = vld [vmem:[#allocation8 + $0x98] sm:$0xff] (!%p5330_p4) }
 0x1e5   : > { %3087 = vmatpush1.bf16.msra.mxu1 %v6580_v4  ;;  %v5430_v4 = vpack.c.bf16 (!%p5330_p4), %v3310_v13, %v3308_v0  ;;  %v3348_v13 = vld [vmem:[#allocation8 + $0x1a0] sm:$0xff] (!%p5330_p4) }
 0x1e6   : > { %3251 = vmatpush1.bf16.msra.mxu0 %v6583_v8  ;;  %3088 = vmatprep.subr.bf16.mxu1 %v6588_v5  ;;  %v5432_v8 = vpack.c.bf16 (!%p5330_p4), %v3315_v2, %v3313_v1  ;;  %v3312_v5 = vld [vmem:[#allocation8 + $0x80] sm:$0xff] (!%p5330_p4)  ;;  %v3350_v1 = vld [vmem:[#allocation8 + $0x1b0] sm:$0xff] (!%p5330_p4)  ;;  %v3353_v2 = vld [vmem:[#allocation8 + $0x1c8] sm:$0xff] (!%p5330_p4) }
 0x1e7   : > { %3252 = vmatprep.subr.bf16.mxu0 %v6591_v6  ;;  %v3314_v6 = vld [vmem:[#allocation8 + $0x90] sm:$0xff] (!%p5330_p4) }
 0x1e9   : > { %3089 = vmatpush1.bf16.msra.mxu1 %v6586_v7  ;;  %v3317_v7 = vld [vmem:[#allocation8 + $0xa8] sm:$0xff] (!%p5330_p4) }
 0x1ea   : > { %3253 = vmatpush1.bf16.msra.mxu0 %v6589_v9  ;;  %3090 = vmatprep.subr.bf16.mxu1 %v6594_v10  ;;  %v3319_v9 = vld [vmem:[#allocation8 + $0xb8] sm:$0xff] (!%p5330_p4)  ;;  %v5434_v10 = vpack.c.bf16 (!%p5330_p4), %v3314_v6, %v3312_v5  ;;  %v3352_v6 = vld [vmem:[#allocation8 + $0x1c0] sm:$0xff] (!%p5330_p4) }
 0x1eb   : > { %3254 = vmatprep.subr.bf16.mxu0 %v6597_v40  ;;  %v5436_v40 = vpack.c.bf16 (!%p5330_p4), %v3319_v9, %v3317_v7  ;;  %v3354_v7 = vld [vmem:[#allocation8 + $0x1d0] sm:$0xff] (!%p5330_p4)  ;;  %v3357_v9 = vld [vmem:[#allocation8 + $0x1e8] sm:$0xff] (!%p5330_p4) }
 0x1ed   : > { %3091 = vmatpush1.bf16.msra.mxu1 %v6592_v11  ;;  %v3316_v11 = vld [vmem:[#allocation8 + $0xa0] sm:$0xff] (!%p5330_p4) }
 0x1ee   : > { %3255 = vmatpush1.bf16.msra.mxu0 %v6595_v34  ;;  %3092 = vmatprep.subr.bf16.mxu1 %v6600_v12  ;;  %v3318_v34 = vld [vmem:[#allocation8 + $0xb0] sm:$0xff] (!%p5330_p4)  ;;  %v3321_v12 = vld [vmem:[#allocation8 + $0xc8] sm:$0xff] (!%p5330_p4) }
 0x1ef   : > { %3256 = vmatprep.subr.bf16.mxu0 %v6603_v16  ;;  %v3323_v16 = vld [vmem:[#allocation8 + $0xd8] sm:$0xff] (!%p5330_p4) }
 0x1f1   : > { %3093 = vmatpush1.bf16.msra.mxu1 %v6598_v17  ;;  %v5438_v17 = vpack.c.bf16 (!%p5330_p4), %v3318_v34, %v3316_v11  ;;  %v3356_v34 = vld [vmem:[#allocation8 + $0x1e0] sm:$0xff] (!%p5330_p4) }
 0x1f2   : > { %3257 = vmatpush1.bf16.msra.mxu0 %v6601_v18  ;;  %3094 = vmatprep.subr.bf16.mxu1 %v6606_v19  ;;  %v5440_v18 = vpack.c.bf16 (!%p5330_p4), %v3323_v16, %v3321_v12  ;;  %v3320_v19 = vld [vmem:[#allocation8 + $0xc0] sm:$0xff] (!%p5330_p4)  ;;  %v3358_v12 = vld [vmem:[#allocation8 + $0x1f0] sm:$0xff] (!%p5330_p4)  ;;  %v3361_v16 = vld [vmem:[#allocation8 + $0x208] sm:$0xff] (!%p5330_p4) }
 0x1f3   : > { %3258 = vmatprep.subr.bf16.mxu0 %v6609_v14  ;;  %v3322_v14 = vld [vmem:[#allocation8 + $0xd0] sm:$0xff] (!%p5330_p4) }
 0x1f5   : > { %3095 = vmatpush1.bf16.msra.mxu1 %v6604_v15  ;;  %v7432_v15 = vld [vmem:[#allocation2] sm:$0xff] (!%p5330_p4) }
 0x1f6   : > { %3259 = vmatpush1.bf16.msra.mxu0 %v6607_v20  ;;  %3096 = vmatprep.subr.bf16.mxu1 %v6612_v21  ;;  %v3325_v20 = vld [vmem:[#allocation8 + $0xe8] sm:$0xff] (!%p5330_p4)  ;;  %v3327_v21 = vld [vmem:[#allocation8 + $0xf8] sm:$0xff] (!%p5330_p4) }
 0x1f7   : > { %3260 = vmatprep.subr.bf16.mxu0 %v6615_v22  ;;  %v3503_v22 = vcombine.high (!%p5330_p4), %v7432_v15, %v7432_v15 }
 0x1f9   : > { %3097 = vmatpush1.bf16.msra.mxu1 %v6610_v23  ;;  %v5442_v23 = vpack.c.bf16 (!%p5330_p4), %v3322_v14, %v3320_v19  ;;  %v3360_v14 = vld [vmem:[#allocation8 + $0x200] sm:$0xff] (!%p5330_p4) }
 0x1fa   : > { %3261 = vmatpush1.bf16.msra.mxu0 %v6613_v41  ;;  %v5444_v41 = vpack.c.bf16 (!%p5330_p4), %v3327_v21, %v3325_v20  ;;  %v3362_v20 = vld [vmem:[#allocation8 + $0x210] sm:$0xff] (!%p5330_p4) }
 0x1fc   : > { %3099 = vmatmul.mubr.bf16.vlgmr.msra.gmra.mrb[4].mxu1 %v7081_v35 }
 0x1fd   : > { %3263 = vmatmul.mubr.bf16.vlgmr.msra.gmra.mrb[4].mxu0 %v7081_v35  ;;  %v3297_v35 = vld [vmem:[#allocation8 + $0x8] sm:$0xff] (!%p5330_p4) }
 0x1fe   : > { %v5416_v44 = vpack.c.bf16 (!%p5330_p4), %v3299_v42, %v3297_v35  ;;  %3573 = vmatprep.mubr.f32.mxu0 (!%p5330_p4), %v3503_v22  ;;  %v3337_v35 = vld [vmem:[#allocation8 + $0x148] sm:$0xff] (!%p5330_p4)  ;;  %v3339_v42 = vld [vmem:[#allocation8 + $0x158] sm:$0xff] (!%p5330_p4) }
 0x1ff   : > { %v3365_v22 = vld [vmem:[#allocation8 + $0x228] sm:$0xff] (!%p5330_p4) }
 0x200   : > { %5417 = vmatprep.subr.bf16.mxu0 (!%p5330_p4), %v5416_v44  ;;  %v5456_v44 = vpack.c.bf16 (!%p5330_p4), %v3339_v42, %v3337_v35  ;;  %v3372_v35 = vld [vmem:[#allocation8 + $0x260] sm:$0xff] (!%p5330_p4)  ;;  %v3374_v42 = vld [vmem:[#allocation8 + $0x270] sm:$0xff] (!%p5330_p4) }
 0x201   : > { %5419 = vmatpush1.bf16.msra.mxu0 (!%p5330_p4), %v5418_v48  ;;  %v3343_v48 = vld [vmem:[#allocation8 + $0x178] sm:$0xff] (!%p5330_p4) }
 0x202   : > { %5421 = vmatprep.subr.bf16.mxu0 (!%p5330_p4), %v5420_v49  ;;  %v5458_v49 = vpack.c.bf16 (!%p5330_p4), %v3338_v46, %v3336_v45  ;;  %v5460_v50 = vpack.c.bf16 (!%p5330_p4), %v3343_v48, %v3341_v47  ;;  %v5494_v45 = vpack.c.bf16 (!%p5330_p4), %v3374_v42, %v3372_v35  ;;  %v3376_v46 = vld [vmem:[#allocation8 + $0x280] sm:$0xff] (!%p5330_p4)  ;;  %v3378_v47 = vld [vmem:[#allocation8 + $0x290] sm:$0xff] (!%p5330_p4)  ;;  %v3381_v48 = vld [vmem:[#allocation8 + $0x2a8] sm:$0xff] (!%p5330_p4) }
 0x203   : > { %v3412_v35 = vld [vmem:[#allocation8 + $0x3a0] sm:$0xff] (!%p5330_p4)  ;;  %v3414_v42 = vld [vmem:[#allocation8 + $0x3b0] sm:$0xff] (!%p5330_p4) }
 0x205   : > { %5423 = vmatpush1.bf16.msra.mxu0 (!%p5330_p4), %v5422_v54  ;;  %v3347_v54 = vld [vmem:[#allocation8 + $0x198] sm:$0xff] (!%p5330_p4) }
 0x206   : > { %5425 = vmatprep.subr.bf16.mxu0 (!%p5330_p4), %v5424_v55  ;;  %v5462_v55 = vpack.c.bf16 (!%p5330_p4), %v3342_v52, %v3340_v51  ;;  %v5464_v57 = vpack.c.bf16 (!%p5330_p4), %v3347_v54, %v3345_v53  ;;  %v3380_v52 = vld [vmem:[#allocation8 + $0x2a0] sm:$0xff] (!%p5330_p4)  ;;  %v3382_v53 = vld [vmem:[#allocation8 + $0x2b0] sm:$0xff] (!%p5330_p4)  ;;  %v3385_v54 = vld [vmem:[#allocation8 + $0x2c8] sm:$0xff] (!%p5330_p4) }
 0x209   : > { %5427 = vmatpush1.bf16.msra.mxu0 (!%p5330_p4), %v5426_v62  ;;  %v3351_v62 = vld [vmem:[#allocation8 + $0x1b8] sm:$0xff] (!%p5330_p4) }
 0x20a   : > { %5429 = vmatprep.subr.bf16.mxu0 (!%p5330_p4), %v5428_v63  ;;  %v5466_v63 = vpack.c.bf16 (!%p5330_p4), %v3346_v59, %v3344_v58  ;;  %v5468_v0 = vpack.c.bf16 (!%p5330_p4), %v3351_v62, %v3349_v60  ;;  %v3384_v59 = vld [vmem:[#allocation8 + $0x2c0] sm:$0xff] (!%p5330_p4)  ;;  %v3386_v60 = vld [vmem:[#allocation8 + $0x2d0] sm:$0xff] (!%p5330_p4)  ;;  %v3389_v62 = vld [vmem:[#allocation8 + $0x2e8] sm:$0xff] (!%p5330_p4) }
 0x20d   : > { %5431 = vmatpush1.bf16.msra.mxu0 (!%p5330_p4), %v5430_v4  ;;  %v3355_v4 = vld [vmem:[#allocation8 + $0x1d8] sm:$0xff] (!%p5330_p4) }
 0x20e   : > { %5433 = vmatprep.subr.bf16.mxu0 (!%p5330_p4), %v5432_v8  ;;  %v5470_v8 = vpack.c.bf16 (!%p5330_p4), %v3350_v1, %v3348_v13  ;;  %v5472_v5 = vpack.c.bf16 (!%p5330_p4), %v3355_v4, %v3353_v2  ;;  %v3388_v1 = vld [vmem:[#allocation8 + $0x2e0] sm:$0xff] (!%p5330_p4)  ;;  %v3390_v2 = vld [vmem:[#allocation8 + $0x2f0] sm:$0xff] (!%p5330_p4)  ;;  %v3393_v4 = vld [vmem:[#allocation8 + $0x308] sm:$0xff] (!%p5330_p4) }
 0x211   : > { %5435 = vmatpush1.bf16.msra.mxu0 (!%p5330_p4), %v5434_v10  ;;  %v3359_v10 = vld [vmem:[#allocation8 + $0x1f8] sm:$0xff] (!%p5330_p4) }
 0x212   : > { %5437 = vmatprep.subr.bf16.mxu0 (!%p5330_p4), %v5436_v40  ;;  %v5474_v40 = vpack.c.bf16 (!%p5330_p4), %v3354_v7, %v3352_v6  ;;  %v5476_v11 = vpack.c.bf16 (!%p5330_p4), %v3359_v10, %v3357_v9  ;;  %v3392_v7 = vld [vmem:[#allocation8 + $0x300] sm:$0xff] (!%p5330_p4)  ;;  %v3394_v9 = vld [vmem:[#allocation8 + $0x310] sm:$0xff] (!%p5330_p4)  ;;  %v3397_v10 = vld [vmem:[#allocation8 + $0x328] sm:$0xff] (!%p5330_p4) }
 0x215   : > { %5439 = vmatpush1.bf16.msra.mxu0 (!%p5330_p4), %v5438_v17  ;;  %v3363_v17 = vld [vmem:[#allocation8 + $0x218] sm:$0xff] (!%p5330_p4) }
 0x216   : > { %5441 = vmatprep.subr.bf16.mxu0 (!%p5330_p4), %v5440_v18  ;;  %v5478_v18 = vpack.c.bf16 (!%p5330_p4), %v3358_v12, %v3356_v34  ;;  %v5480_v19 = vpack.c.bf16 (!%p5330_p4), %v3363_v17, %v3361_v16  ;;  %v3396_v12 = vld [vmem:[#allocation8 + $0x320] sm:$0xff] (!%p5330_p4)  ;;  %v3398_v16 = vld [vmem:[#allocation8 + $0x330] sm:$0xff] (!%p5330_p4)  ;;  %v3401_v17 = vld [vmem:[#allocation8 + $0x348] sm:$0xff] (!%p5330_p4) }
 0x219   : > { %5443 = vmatpush1.bf16.msra.mxu0 (!%p5330_p4), %v5442_v23  ;;  %v3367_v23 = vld [vmem:[#allocation8 + $0x238] sm:$0xff] (!%p5330_p4) }
 0x21a   : > { %5445 = vmatprep.subr.bf16.mxu0 (!%p5330_p4), %v5444_v41  ;;  %v5482_v41 = vpack.c.bf16 (!%p5330_p4), %v3362_v20, %v3360_v14  ;;  %v3400_v20 = vld [vmem:[#allocation8 + $0x340] sm:$0xff] (!%p5330_p4) }
 0x2cf   : > { %v3100_v24 = vpop.f32.mrb[4].mxu1 }
 0x2d0   : > { %v3264_v25 = vpop.f32.mrb[4].mxu0  ;;  %v3102_v27 = vpop.f32.mrb[5].mxu1  ;;  %3292 = sbr.rel (%p5330_p4) target bundleno = 3011 (0xbc3), region = 72 }
 0x2d1   : > { %v3266_v29 = vpop.f32.mrb[5].mxu0  ;;  %v3278_v30 = vcombine.low %v3100_v24, %v3102_v27  ;;  %v3104_v32 = vpop.f32.mrb[6].mxu1  ;;  %v3324_v24 = vld [vmem:[#allocation8 + $0xe0] sm:$0xff] (!%p5330_p4)  ;;  %v3331_v27 = vld [vmem:[#allocation8 + $0x118] sm:$0xff] (!%p5330_p4) }
 0x2d2   : > { %v3279_v31 = vcombine.low %v3264_v25, %v3266_v29  ;;  %v3268_v33 = vpop.f32.mrb[6].mxu0  ;;  %v3105_v36 = vpop.f32.mrb[7].mxu1  ;;  %v3326_v25 = vld [vmem:[#allocation8 + $0xf0] sm:$0xff] (!%p5330_p4)  ;;  %v3333_v32 = vld [vmem:[#allocation8 + $0x128] sm:$0xff] (!%p5330_p4) }
 0x2d3   : > { %v3269_v37 = vpop.f32.mrb[7].mxu0  ;;  %v3284_v38 = vadd.f32 %v3278_v30, %v427_v26  ;;  %v3329_v26 = vld [vmem:[#allocation8 + $0x108] sm:$0xff] (!%p5330_p4)  ;;  %v3328_v30 = vld [vmem:[#allocation8 + $0x100] sm:$0xff] (!%p5330_p4)  ;;  %v3335_v33 = vld [vmem:[#allocation8 + $0x138] sm:$0xff] (!%p5330_p4) }
 0x2d4   : > { %v3285_v39 = vadd.f32 %v3279_v31, %v428_v28  ;;  %v5446_v28 = vpack.c.bf16 (!%p5330_p4), %v3326_v25, %v3324_v24  ;;  %v5448_v29 = vpack.c.bf16 (!%p5330_p4), %v3331_v27, %v3329_v26  ;;  %v3330_v31 = vld [vmem:[#allocation8 + $0x110] sm:$0xff] (!%p5330_p4)  ;;  %v5452_v37 = vpack.c.bf16 (!%p5330_p4), %v3335_v33, %v3333_v32  ;;  %v3364_v26 = vld [vmem:[#allocation8 + $0x220] sm:$0xff] (!%p5330_p4) }
 0x2d5   : > { %3287 = vst [vmem:[#allocation2 + $0x8] sm:$0xff] %v3284_v38  ;;  %v5450_v36 = vpack.c.bf16 (!%p5330_p4), %v3330_v31, %v3328_v30  ;;  %v3332_v38 = vld [vmem:[#allocation8 + $0x120] sm:$0xff] (!%p5330_p4)  ;;  %v5484_v25 = vpack.c.bf16 (!%p5330_p4), %v3367_v23, %v3365_v22  ;;  %v3366_v27 = vld [vmem:[#allocation8 + $0x230] sm:$0xff] (!%p5330_p4)  ;;  %v3405_v23 = vld [vmem:[#allocation8 + $0x368] sm:$0xff] (!%p5330_p4) }
 0x2d6   : > { %3288 = vst [vmem:[#allocation2 + $0x10] sm:$0xff] %v3285_v39  ;;  %5447 = vmatpush1.bf16.msra.mxu0 (!%p5330_p4), %v5446_v28  ;;  %v3334_v39 = vld [vmem:[#allocation8 + $0x130] sm:$0xff] (!%p5330_p4)  ;;  %v3369_v28 = vld [vmem:[#allocation8 + $0x248] sm:$0xff] (!%p5330_p4)  ;;  %v5486_v30 = vpack.c.bf16 (!%p5330_p4), %v3366_v27, %v3364_v26  ;;  %v3368_v32 = vld [vmem:[#allocation8 + $0x240] sm:$0xff] (!%p5330_p4) }
 0x2d7   : > { %5449 = vmatprep.subr.bf16.mxu0 %v5448_v29  ;;  %v5454_v43 = vpack.c.bf16 %v3334_v39, %v3332_v38  ;;  %v3371_v29 = vld [vmem:[#allocation8 + $0x258] sm:$0xff]  ;;  %v3370_v33 = vld [vmem:[#allocation8 + $0x250] sm:$0xff]  ;;  %v3404_v26 = vld [vmem:[#allocation8 + $0x360] sm:$0xff] }
 0x2d8   : > { %v5488_v31 = vpack.c.bf16 %v3371_v29, %v3369_v28  ;;  %v5490_v38 = vpack.c.bf16 %v3370_v33, %v3368_v32  ;;  %v3402_v22 = vld [vmem:[#allocation8 + $0x350] sm:$0xff]  ;;  %v3409_v28 = vld [vmem:[#allocation8 + $0x388] sm:$0xff]  ;;  %v3411_v29 = vld [vmem:[#allocation8 + $0x398] sm:$0xff] }
 0x2d9   : > { %v3406_v27 = vld [vmem:[#allocation8 + $0x370] sm:$0xff]  ;;  %v3408_v32 = vld [vmem:[#allocation8 + $0x380] sm:$0xff] }
 0x2da   : > { %5451 = vmatpush1.bf16.msra.mxu0 %v5450_v36  ;;  %v3373_v36 = vld [vmem:[#allocation8 + $0x268] sm:$0xff]  ;;  %v3410_v33 = vld [vmem:[#allocation8 + $0x390] sm:$0xff] }
 0x2db   : > { %5453 = vmatprep.subr.bf16.mxu0 %v5452_v37  ;;  %v3375_v37 = vld [vmem:[#allocation8 + $0x278] sm:$0xff] }
 0x2dc   : > { %v7436_v21 = vld [vmem:[#allocation2 + $0x8] sm:$0xff]  ;;  %v5492_v39 = vpack.c.bf16 %v3375_v37, %v3373_v36  ;;  %v3415_v37 = vld [vmem:[#allocation8 + $0x3b8] sm:$0xff] }
 0x2dd   : > { %v3504_v24 = vcombine.high %v7436_v21, %v7436_v21  ;;  %v3413_v36 = vld [vmem:[#allocation8 + $0x3a8] sm:$0xff] }
 0x2de   : > { %5455 = vmatpush1.bf16.msra.mxu0 %v5454_v43  ;;  %v3377_v43 = vld [vmem:[#allocation8 + $0x288] sm:$0xff] }
 0x2df   : > { %5457 = vmatprep.subr.bf16.mxu0 %v5456_v44  ;;  %v3379_v44 = vld [vmem:[#allocation8 + $0x298] sm:$0xff] }
 0x2e2   : > { %5459 = vmatpush1.bf16.msra.mxu0 %v5458_v49  ;;  %v3383_v49 = vld [vmem:[#allocation8 + $0x2b8] sm:$0xff] }
 0x2e3   : > { %5461 = vmatprep.subr.bf16.mxu0 %v5460_v50  ;;  %v5498_v50 = vpack.c.bf16 %v3378_v47, %v3376_v46  ;;  %v5500_v51 = vpack.c.bf16 %v3383_v49, %v3381_v48  ;;  %v3416_v46 = vld [vmem:[#allocation8 + $0x3c0] sm:$0xff]  ;;  %v3418_v47 = vld [vmem:[#allocation8 + $0x3d0] sm:$0xff]  ;;  %v3421_v48 = vld [vmem:[#allocation8 + $0x3e8] sm:$0xff] }
 0x2e4   : > { %v3423_v49 = vld [vmem:[#allocation8 + $0x3f8] sm:$0xff] }
 0x2e6   : > { %5463 = vmatpush1.bf16.msra.mxu0 %v5462_v55  ;;  %v3387_v55 = vld [vmem:[#allocation8 + $0x2d8] sm:$0xff] }
 0x2e7   : > { %5465 = vmatprep.subr.bf16.mxu0 %v5464_v57  ;;  %v5502_v57 = vpack.c.bf16 %v3382_v53, %v3380_v52  ;;  %v5504_v58 = vpack.c.bf16 %v3387_v55, %v3385_v54  ;;  %v3420_v52 = vld [vmem:[#allocation8 + $0x3e0] sm:$0xff]  ;;  %v3422_v53 = vld [vmem:[#allocation8 + $0x3f0] sm:$0xff]  ;;  %v3425_v54 = vld [vmem:[#allocation8 + $0x408] sm:$0xff] }
 0x2e8   : > { %v3427_v55 = vld [vmem:[#allocation8 + $0x418] sm:$0xff] }
 0x2ea   : > { %5467 = vmatpush1.bf16.msra.mxu0 %v5466_v63  ;;  %v3391_v63 = vld [vmem:[#allocation8 + $0x2f8] sm:$0xff] }
 0x2eb   : > { %5469 = vmatprep.subr.bf16.mxu0 %v5468_v0  ;;  %v5506_v0 = vpack.c.bf16 %v3386_v60, %v3384_v59  ;;  %v5508_v13 = vpack.c.bf16 %v3391_v63, %v3389_v62  ;;  %v3424_v59 = vld [vmem:[#allocation8 + $0x400] sm:$0xff]  ;;  %v3426_v60 = vld [vmem:[#allocation8 + $0x410] sm:$0xff]  ;;  %v3429_v63 = vld [vmem:[#allocation8 + $0x428] sm:$0xff] }
 0x2ec   : > { %v7441_v62 = vld [vmem:[#allocation2 + $0x10] sm:$0xff] }
 0x2ee   : > { %5471 = vmatpush1.bf16.msra.mxu0 %v5470_v8  ;;  %v3395_v8 = vld [vmem:[#allocation8 + $0x318] sm:$0xff] }
 0x2ef   : > { %5473 = vmatprep.subr.bf16.mxu0 %v5472_v5  ;;  %v5510_v5 = vpack.c.bf16 %v3390_v2, %v3388_v1  ;;  %v5512_v6 = vpack.c.bf16 %v3395_v8, %v3393_v4  ;;  %v3505_v1 = vcombine.high %v7441_v62, %v7441_v62  ;;  %v3428_v4 = vld [vmem:[#allocation8 + $0x420] sm:$0xff]  ;;  %v3430_v8 = vld [vmem:[#allocation8 + $0x430] sm:$0xff] }
 0x2f2   : > { %5475 = vmatpush1.bf16.msra.mxu0 %v5474_v40  ;;  %v3399_v40 = vld [vmem:[#allocation8 + $0x338] sm:$0xff] }
 0x2f3   : > { %5477 = vmatprep.subr.bf16.mxu0 %v5476_v11  ;;  %v5514_v11 = vpack.c.bf16 %v3394_v9, %v3392_v7  ;;  %v5516_v34 = vpack.c.bf16 %v3399_v40, %v3397_v10  ;;  %v5550_v7 = vpack.c.bf16 %v3430_v8, %v3428_v4  ;;  %v3432_v10 = vld [vmem:[#allocation8 + $0x440] sm:$0xff]  ;;  %v3434_v40 = vld [vmem:[#allocation8 + $0x450] sm:$0xff] }
 0x2f4   : > { %v3468_v4 = vld [vmem:[#allocation8 + $0x560] sm:$0xff]  ;;  %v3470_v8 = vld [vmem:[#allocation8 + $0x570] sm:$0xff] }
 0x2f6   : > { %5479 = vmatpush1.bf16.msra.mxu0 %v5478_v18  ;;  %v3403_v18 = vld [vmem:[#allocation8 + $0x358] sm:$0xff] }
 0x2f7   : > { %5481 = vmatprep.subr.bf16.mxu0 %v5480_v19  ;;  %v5518_v19 = vpack.c.bf16 %v3398_v16, %v3396_v12  ;;  %v5520_v14 = vpack.c.bf16 %v3403_v18, %v3401_v17  ;;  %v5554_v12 = vpack.c.bf16 %v3434_v40, %v3432_v10  ;;  %v3436_v17 = vld [vmem:[#allocation8 + $0x460] sm:$0xff]  ;;  %v3438_v18 = vld [vmem:[#allocation8 + $0x470] sm:$0xff] }
 0x2f8   : > { %v3472_v10 = vld [vmem:[#allocation8 + $0x580] sm:$0xff]  ;;  %v3474_v40 = vld [vmem:[#allocation8 + $0x590] sm:$0xff] }
 0x2f9   : > { %3574 = vmatmul.mubr.f32.vlgmr.msra.gmra.mrb[0].mxu0 %v7432_v15  ;;  %v5496_v15 = vpack.c.bf16 %v3379_v44, %v3377_v43  ;;  %v3417_v43 = vld [vmem:[#allocation8 + $0x3c8] sm:$0xff]  ;;  %v3419_v44 = vld [vmem:[#allocation8 + $0x3d8] sm:$0xff] }
 0x2fa   : > { %5483 = vmatpush1.bf16.msra.mxu0 %v5482_v41  ;;  %3644 = vmatprep.mubr.f32.mxu0 %v3504_v24  ;;  %v3407_v41 = vld [vmem:[#allocation8 + $0x378] sm:$0xff]  ;;  %v5522_v24 = vpack.c.bf16 %v3402_v22, %v3400_v20  ;;  %v5558_v20 = vpack.c.bf16 %v3438_v18, %v3436_v17  ;;  %v3440_v22 = vld [vmem:[#allocation8 + $0x480] sm:$0xff]  ;;  %v3478_v18 = vld [vmem:[#allocation8 + $0x5b0] sm:$0xff] }
 0x2fb   : > { %5485 = vmatprep.subr.bf16.mxu0 %v5484_v25  ;;  %v5524_v25 = vpack.c.bf16 %v3407_v41, %v3405_v23  ;;  %v3442_v23 = vld [vmem:[#allocation8 + $0x490] sm:$0xff]  ;;  %v3445_v41 = vld [vmem:[#allocation8 + $0x4a8] sm:$0xff]  ;;  %v3476_v17 = vld [vmem:[#allocation8 + $0x5a0] sm:$0xff] }
 0x2fe   : > { %5487 = vmatpush1.bf16.msra.mxu0 %v5486_v30  ;;  %v5526_v30 = vpack.c.bf16 %v3406_v27, %v3404_v26  ;;  %v3444_v27 = vld [vmem:[#allocation8 + $0x4a0] sm:$0xff] }
 0x2ff   : > { %5489 = vmatprep.subr.bf16.mxu0 %v5488_v31  ;;  %v5528_v31 = vpack.c.bf16 %v3411_v29, %v3409_v28  ;;  %v3446_v28 = vld [vmem:[#allocation8 + $0x4b0] sm:$0xff]  ;;  %v3449_v29 = vld [vmem:[#allocation8 + $0x4c8] sm:$0xff] }
 0x302   : > { %5491 = vmatpush1.bf16.msra.mxu0 %v5490_v38  ;;  %v5530_v38 = vpack.c.bf16 %v3410_v33, %v3408_v32  ;;  %v3448_v33 = vld [vmem:[#allocation8 + $0x4c0] sm:$0xff] }
 0x303   : > { %5493 = vmatprep.subr.bf16.mxu0 %v5492_v39  ;;  %v5532_v39 = vpack.c.bf16 %v3415_v37, %v3413_v36  ;;  %v3450_v36 = vld [vmem:[#allocation8 + $0x4d0] sm:$0xff]  ;;  %v3453_v37 = vld [vmem:[#allocation8 + $0x4e8] sm:$0xff] }
 0x306   : > { %5495 = vmatpush1.bf16.msra.mxu0 %v5494_v45  ;;  %v5534_v45 = vpack.c.bf16 %v3414_v42, %v3412_v35  ;;  %v3452_v42 = vld [vmem:[#allocation8 + $0x4e0] sm:$0xff] }
 0x307   : > { %5497 = vmatprep.subr.bf16.mxu0 %v5496_v15  ;;  %v5536_v15 = vpack.c.bf16 %v3419_v44, %v3417_v43  ;;  %v3454_v43 = vld [vmem:[#allocation8 + $0x4f0] sm:$0xff]  ;;  %v3457_v44 = vld [vmem:[#allocation8 + $0x508] sm:$0xff] }
 0x30a   : > { %5499 = vmatpush1.bf16.msra.mxu0 %v5498_v50  ;;  %v5538_v50 = vpack.c.bf16 %v3418_v47, %v3416_v46  ;;  %v3456_v47 = vld [vmem:[#allocation8 + $0x500] sm:$0xff] }
 0x30b   : > { %5501 = vmatprep.subr.bf16.mxu0 %v5500_v51  ;;  %v5540_v51 = vpack.c.bf16 %v3423_v49, %v3421_v48  ;;  %v3458_v48 = vld [vmem:[#allocation8 + $0x510] sm:$0xff]  ;;  %v3461_v49 = vld [vmem:[#allocation8 + $0x528] sm:$0xff] }
 0x30e   : > { %5503 = vmatpush1.bf16.msra.mxu0 %v5502_v57  ;;  %v5542_v57 = vpack.c.bf16 %v3422_v53, %v3420_v52  ;;  %v3460_v53 = vld [vmem:[#allocation8 + $0x520] sm:$0xff] }
 0x30f   : > { %5505 = vmatprep.subr.bf16.mxu0 %v5504_v58  ;;  %v5544_v58 = vpack.c.bf16 %v3427_v55, %v3425_v54  ;;  %v3462_v54 = vld [vmem:[#allocation8 + $0x530] sm:$0xff]  ;;  %v3465_v55 = vld [vmem:[#allocation8 + $0x548] sm:$0xff] }
 0x312   : > { %5507 = vmatpush1.bf16.msra.mxu0 %v5506_v0  ;;  %v3431_v0 = vld [vmem:[#allocation8 + $0x438] sm:$0xff] }
 0x313   : > { %5509 = vmatprep.subr.bf16.mxu0 %v5508_v13  ;;  %v5546_v13 = vpack.c.bf16 %v3426_v60, %v3424_v59  ;;  %v5548_v2 = vpack.c.bf16 %v3431_v0, %v3429_v63  ;;  %v3464_v60 = vld [vmem:[#allocation8 + $0x540] sm:$0xff]  ;;  %v3466_v63 = vld [vmem:[#allocation8 + $0x550] sm:$0xff]  ;;  %v3469_v0 = vld [vmem:[#allocation8 + $0x568] sm:$0xff] }
 0x316   : > { %5511 = vmatpush1.bf16.msra.mxu0 %v5510_v5  ;;  %v3433_v5 = vld [vmem:[#allocation8 + $0x448] sm:$0xff] }
 0x317   : > { %5513 = vmatprep.subr.bf16.mxu0 %v5512_v6  ;;  %v3435_v6 = vld [vmem:[#allocation8 + $0x458] sm:$0xff] }
 0x318   : > { %v5552_v9 = vpack.c.bf16 %v3435_v6, %v3433_v5  ;;  %v3473_v5 = vld [vmem:[#allocation8 + $0x588] sm:$0xff]  ;;  %v3475_v6 = vld [vmem:[#allocation8 + $0x598] sm:$0xff] }
 0x31a   : > { %5515 = vmatpush1.bf16.msra.mxu0 %v5514_v11  ;;  %v3437_v11 = vld [vmem:[#allocation8 + $0x468] sm:$0xff] }
 0x31b   : > { %5517 = vmatprep.subr.bf16.mxu0 %v5516_v34  ;;  %v3439_v34 = vld [vmem:[#allocation8 + $0x478] sm:$0xff] }
 0x31c   : > { %v5556_v16 = vpack.c.bf16 %v3439_v34, %v3437_v11  ;;  %v3477_v11 = vld [vmem:[#allocation8 + $0x5a8] sm:$0xff]  ;;  %v3479_v34 = vld [vmem:[#allocation8 + $0x5b8] sm:$0xff] }
 0x31e   : > { %5519 = vmatpush1.bf16.msra.mxu0 %v5518_v19  ;;  %v3441_v19 = vld [vmem:[#allocation8 + $0x488] sm:$0xff] }
 0x31f   : > { %5521 = vmatprep.subr.bf16.mxu0 %v5520_v14  ;;  %v3443_v14 = vld [vmem:[#allocation8 + $0x498] sm:$0xff] }
 0x322   : > { %5523 = vmatpush1.bf16.msra.mxu0 %v5522_v24  ;;  %v3447_v24 = vld [vmem:[#allocation8 + $0x4b8] sm:$0xff] }
 0x323   : > { %5525 = vmatprep.subr.bf16.mxu0 %v5524_v25  ;;  %v5562_v25 = vpack.c.bf16 %v3442_v23, %v3440_v22  ;;  %v5564_v26 = vpack.c.bf16 %v3447_v24, %v3445_v41  ;;  %v3480_v22 = vld [vmem:[#allocation8 + $0x5c0] sm:$0xff]  ;;  %v3482_v23 = vld [vmem:[#allocation8 + $0x5d0] sm:$0xff]  ;;  %v3485_v41 = vld [vmem:[#allocation8 + $0x5e8] sm:$0xff] }
 0x324   : > { %v3487_v24 = vld [vmem:[#allocation8 + $0x5f8] sm:$0xff] }
 0x326   : > { %5527 = vmatpush1.bf16.msra.mxu0 %v5526_v30  ;;  %v3451_v30 = vld [vmem:[#allocation8 + $0x4d8] sm:$0xff] }
 0x327   : > { %5529 = vmatprep.subr.bf16.mxu0 %v5528_v31  ;;  %v5566_v31 = vpack.c.bf16 %v3446_v28, %v3444_v27  ;;  %v5568_v32 = vpack.c.bf16 %v3451_v30, %v3449_v29  ;;  %v3484_v27 = vld [vmem:[#allocation8 + $0x5e0] sm:$0xff]  ;;  %v3486_v28 = vld [vmem:[#allocation8 + $0x5f0] sm:$0xff]  ;;  %v7448_v30 = vsub.s32 0, %v7027_v61 }
 0x328   : > { %v5606_v29 = vpack.c.bf16 %v3486_v28, %v3484_v27 }
 0x32a   : > { %5531 = vmatpush1.bf16.msra.mxu0 %v5530_v38  ;;  %v3455_v38 = vld [vmem:[#allocation8 + $0x4f8] sm:$0xff] }
 0x32b   : > { %5533 = vmatprep.subr.bf16.mxu0 %v5532_v39  ;;  %v5570_v39 = vpack.c.bf16 %v3450_v36, %v3448_v33  ;;  %v5572_v35 = vpack.c.bf16 %v3455_v38, %v3453_v37 }
 0x32e   : > { %5535 = vmatpush1.bf16.msra.mxu0 %v5534_v45  ;;  %v3459_v45 = vld [vmem:[#allocation8 + $0x518] sm:$0xff] }
 0x32f   : > { %5537 = vmatprep.subr.bf16.mxu0 %v5536_v15  ;;  %v5574_v15 = vpack.c.bf16 %v3454_v43, %v3452_v42  ;;  %v5576_v46 = vpack.c.bf16 %v3459_v45, %v3457_v44 }
 0x332   : > { %5539 = vmatpush1.bf16.msra.mxu0 %v5538_v50  ;;  %v3463_v50 = vld [vmem:[#allocation8 + $0x538] sm:$0xff] }
 0x333   : > { %5541 = vmatprep.subr.bf16.mxu0 %v5540_v51  ;;  %v5578_v51 = vpack.c.bf16 %v3458_v48, %v3456_v47  ;;  %v5580_v52 = vpack.c.bf16 %v3463_v50, %v3461_v49 }
 0x336   : > { %5543 = vmatpush1.bf16.msra.mxu0 %v5542_v57  ;;  %v3467_v57 = vld [vmem:[#allocation8 + $0x558] sm:$0xff] }
 0x337   : > { %5545 = vmatprep.subr.bf16.mxu0 %v5544_v58  ;;  %v5582_v58 = vpack.c.bf16 %v3462_v54, %v3460_v53  ;;  %v5584_v59 = vpack.c.bf16 %v3467_v57, %v3465_v55  ;;  %v5331_v55 = vld [vmem:[%s8566_s4 + $0x1] ss:$8 sm:$0x3]  ;;  %v5332_v57 = vld [vmem:[%s8566_s4 + $0x2] ss:$8 sm:$0x3] }
 0x339   : > { %3645 = vmatmul.mubr.f32.vlgmr.msra.gmra.mrb[0].mxu0 %v7436_v21  ;;  %v5560_v21 = vpack.c.bf16 %v3443_v14, %v3441_v19  ;;  %v3481_v19 = vld [vmem:[#allocation8 + $0x5c8] sm:$0xff]  ;;  %v3483_v14 = vld [vmem:[#allocation8 + $0x5d8] sm:$0xff] }
 0x33a   : > { %5547 = vmatpush1.bf16.msra.mxu0 %v5546_v13  ;;  %3715 = vmatprep.mubr.f32.mxu0 %v3505_v1  ;;  %v3471_v13 = vld [vmem:[#allocation8 + $0x578] sm:$0xff]  ;;  %v5586_v1 = vpack.c.bf16 %v3466_v63, %v3464_v60  ;;  %v3765_v63 = vrot.slane %v5332_v57, %v7448_v30 }
 0x33b   : > { %5549 = vmatprep.subr.bf16.mxu0 %v5548_v2  ;;  %v5588_v2 = vpack.c.bf16 %v3471_v13, %v3469_v0 }
 0x33e   : > { %5551 = vmatpush1.bf16.msra.mxu0 %v5550_v7  ;;  %v5590_v7 = vpack.c.bf16 %v3470_v8, %v3468_v4 }
 0x33f   : > { %5553 = vmatprep.subr.bf16.mxu0 %v5552_v9  ;;  %v5592_v9 = vpack.c.bf16 %v3475_v6, %v3473_v5 }
 0x342   : > { %5555 = vmatpush1.bf16.msra.mxu0 %v5554_v12  ;;  %v5594_v12 = vpack.c.bf16 %v3474_v40, %v3472_v10 }
 0x343   : > { %5557 = vmatprep.subr.bf16.mxu0 %v5556_v16  ;;  %v5596_v16 = vpack.c.bf16 %v3479_v34, %v3477_v11 }
 0x346   : > { %5559 = vmatpush1.bf16.msra.mxu0 %v5558_v20  ;;  %v5598_v20 = vpack.c.bf16 %v3478_v18, %v3476_v17 }
 0x347   : > { %5561 = vmatprep.subr.bf16.mxu0 %v5560_v21  ;;  %v5600_v21 = vpack.c.bf16 %v3483_v14, %v3481_v19 }
 0x34a   : > { %5563 = vmatpush1.bf16.msra.mxu0 %v5562_v25  ;;  %v5602_v25 = vpack.c.bf16 %v3482_v23, %v3480_v22  ;;  %v6761_v22 = vmov 1966171168  }
 0x34b   : > { %5565 = vmatprep.subr.bf16.mxu0 %v5564_v26  ;;  %v5604_v26 = vpack.c.bf16 %v3487_v24, %v3485_v41  ;;  %v3802_v23 = vunpack.c.l.s4 %v6761_v22 }
 0x34e   : > { %5567 = vmatpush1.bf16.msra.mxu0 %v5566_v31  ;;  %v3488_v31 = vld [vmem:[%s8566_s4] ss:$8 sm:$0x3] }
 0x34f   : > { %5569 = vmatprep.subr.bf16.mxu0 %v5568_v32  ;;  %v7454_v32 = vsub.s32 1, %v7027_v61  ;;  %v3493_v33 = vrot.slane %v3488_v31, %v7448_v30 }
 0x351   : > { %v3497_v36 = vrot.slane %v3488_v31, %v7454_v32  ;;  %v3769_v0 = vrot.slane %v5332_v57, %v7454_v32 }
 0x352   : > { %5571 = vmatpush1.bf16.msra.mxu0 %v5570_v39 }
 0x353   : > { %5573 = vmatprep.subr.bf16.mxu0 %v5572_v35 }
 0x356   : > { %5575 = vmatpush1.bf16.msra.mxu0 %v5574_v15 }
 0x357   : > { %5577 = vmatprep.subr.bf16.mxu0 %v5576_v46 }
 0x35a   : > { %5579 = vmatpush1.bf16.msra.mxu0 %v5578_v51 }
 0x35b   : > { %5581 = vmatprep.subr.bf16.mxu0 %v5580_v52 }
 0x35e   : > { %5583 = vmatpush1.bf16.msra.mxu0 %v5582_v58  ;;  %v3752_v58 = vrot.slane %v5331_v55, %v7448_v30 }
 0x35f   : > { %5585 = vmatprep.subr.bf16.mxu0 %v5584_v59  ;;  %v3756_v59 = vrot.slane %v5331_v55, %v7454_v32 }
 0x362   : > { %5587 = vmatpush1.bf16.msra.mxu0 %v5586_v1 }
 0x363   : > { %5589 = vmatprep.subr.bf16.mxu0 %v5588_v2 }
 0x366   : > { %5591 = vmatpush1.bf16.msra.mxu0 %v5590_v7 }
 0x367   : > { %5593 = vmatprep.subr.bf16.mxu0 %v5592_v9 }
 0x36a   : > { %5595 = vmatpush1.bf16.msra.mxu0 %v5594_v12 }
 0x36b   : > { %5597 = vmatprep.subr.bf16.mxu0 %v5596_v16 }
 0x36e   : > { %5599 = vmatpush1.bf16.msra.mxu0 %v5598_v20 }
 0x36f   : > { %5601 = vmatprep.subr.bf16.mxu0 %v5600_v21 }
 0x372   : > { %5603 = vmatpush1.bf16.msra.mxu0 %v5602_v25 }
 0x373   : > { %5605 = vmatprep.subr.bf16.mxu0 %v5604_v26 }
 0x376   : > { %5607 = vmatpush1.bf16.msra.mxu0 %v5606_v29 }
 0x379   : > { %3716 = vmatmul.mubr.f32.vlgmr.msra.gmra.mrb[0].mxu0 %v7441_v62 }
 0x44c   : > { %v3717_v37 = vpop.f32.mrb[0].mxu0 }
 0x44d   : > { %v5962_v38 = vadd.f32 %v3717_v37, %v3493_v33  ;;  %v3719_v39 = vpop.f32.mrb[1].mxu0  ;;  %v3803_v33 = vunpack.c.0.s8 %v3802_v23  ;;  %v3976_v23 = vld [vmem:[%s8567_s5 + $0x200] sm:$0xff] }
 0x44e   : > { %v5963_v35 = vadd.f32 %v3719_v39, %v3497_v36 }
 0x44f   : > { %v3727_v62 = vsel %vm3726_vm0, %v5962_v38, 0.0 }
 0x450   : > { %v3728_v42 = vsel %vm3726_vm0, %v5963_v35, 0.0 }
 0x451   : > { %v3729_v43 = vadd.f32 %v3728_v42, %v3727_v62  ;;  %v3806_v42 = vsub.s32 %v3803_v33, %v7027_v61  ;;  %v3987_v33 = vld [vmem:[%s8567_s5 + $0x348] sm:$0xff] }
 0x453   : > { %3730 = vadd.xlane.f32.xlu0 %v3729_v43 }
 0x4e0   : > { %v3731_v44 = vpop.xlane.xlu0 %3730 }
 0x4e1   : > { %v3733_v45 = vmul.f32 0.00390625, %v3731_v44 }
 0x4e3   : > { %v3734_v15 = vsub.f32 %v5962_v38, %v3733_v45  ;;  %v3735_v46 = vsub.f32 %v5963_v35, %v3733_v45 }
 0x4e5   : > { %v3736_v47 = vmul.f32 %v3734_v15, %v3734_v15  ;;  %v3737_v48 = vmul.f32 %v3735_v46, %v3735_v46 }
 0x4e7   : > { %v3738_v49 = vsel %vm3726_vm0, %v3736_v47, 0.0  ;;  %v3739_v50 = vsel %vm3726_vm0, %v3737_v48, 0.0 }
 0x4e8   : > { %v3740_v51 = vadd.f32 %v3739_v50, %v3738_v49 }
 0x4ea   : > { %3741 = vadd.xlane.f32.xlu0 %v3740_v51 }
 0x577   : > { %v3742_v52 = vpop.xlane.xlu0 %3741 }
 0x578   : > { %v3743_v53 = vmul.f32 0.00390625, %v3742_v52 }
 0x57a   : > { %v3744_v54 = vadd.f32 1e-05, %v3743_v53 }
 0x57c   : > { %6621 = vrsqrt.f32 %v3744_v54 }
 0x586   : > { %v6622_v60 = vpop.eup %6621 }
 0x587   : > { %v3746_v13 = vmul.f32 %v6622_v60, %v3734_v15  ;;  %v3747_v1 = vmul.f32 %v6622_v60, %v3735_v46  ;;  %v3960_v60 = vld [vmem:[%s8567_s5] sm:$0xff] }
 0x589   : > { %v3759_v2 = vmul.f32 %v3752_v58, %v3746_v13  ;;  %v3760_v4 = vmul.f32 %v3756_v59, %v3747_v1  ;;  %v3963_v59 = vld [vmem:[%s8567_s5 + $0x48] sm:$0xff] }
 0x58a   : > { %v3965_v13 = vld [vmem:[%s8567_s5 + $0x88] sm:$0xff] }
 0x58b   : > { %v3772_v8 = vadd.f32 %v3765_v63, %v3759_v2  ;;  %v3773_v5 = vadd.f32 %v3769_v0, %v3760_v4  ;;  %v5608_v63 = vpack.c.bf16 %v3963_v59, %v3961_v56  ;;  %v3962_v0 = vld [vmem:[%s8567_s5 + $0x40] sm:$0xff]  ;;  %v3967_v1 = vld [vmem:[%s8567_s5 + $0xc8] sm:$0xff] }
 0x58c   : > { %v5610_v2 = vpack.c.bf16 %v3962_v0, %v3960_v60  ;;  %v5612_v4 = vpack.c.bf16 %v3967_v1, %v3965_v13 }
 0x58d   : > { %v3776_v6 = vcombine.low %v3772_v8, %v3773_v5  ;;  %v3964_v8 = vld [vmem:[%s8567_s5 + $0x80] sm:$0xff]  ;;  %5609 = vmatprep.subr.bf16.mxu1 %v5608_v63 }
 0x58e   : > { %v3966_v5 = vld [vmem:[%s8567_s5 + $0xc0] sm:$0xff]  ;;  %5611 = vmatpush1.bf16.msra.mxu1 %v5610_v2 }
 0x58f   : > { %3778 = vst [vmem:[%s8570_s8] sm:$0xff] %v3776_v6  ;;  %v3969_v6 = vld [vmem:[%s8567_s5 + $0x108] sm:$0xff]  ;;  %5613 = vmatprep.subr.bf16.mxu1 %v5612_v4 }
 0x596   : > { %v3779_v7 = vld [vmem:[%s8570_s8] sm:$0x33]  ;;  %v3821_v9 = vld [vmem:[%s8570_s8] sm:$0xcc] }
 0x597   : > { %v3781_v10 = vcombine.high %v3779_v7, %v3779_v7  ;;  %v3784_v40 = vsel %vm3783_vm1, %v3779_v7, -inf  ;;  %v3823_v11 = vcombine.high %v3821_v9, %v3821_v9  ;;  %v3826_v34 = vsel %vm3825_vm2, %v3821_v9, -inf  ;;  %v3971_v7 = vld [vmem:[%s8567_s5 + $0x148] sm:$0xff] }
 0x598   : > { %v3785_v12 = vrot.slane %v3784_v40, 4  ;;  %v3827_v16 = vrot.slane %v3826_v34, 4  ;;  %v5614_v9 = vpack.c.bf16 %v3966_v5, %v3964_v8  ;;  %v3996_v5 = vld [vmem:[%s8567_s5 + $0x480] sm:$0xff] }
 0x599   : > { %v3791_v17 = vsel %vm3783_vm1, %v3781_v10, -inf  ;;  %v3833_v18 = vsel %vm3825_vm2, %v3823_v11, -inf  ;;  %v5616_v10 = vpack.c.bf16 %v3971_v7, %v3969_v6  ;;  %v3970_v11 = vld [vmem:[%s8567_s5 + $0x140] sm:$0xff] }
 0x59a   : > { %v3786_v19 = vmax.f32 %v3784_v40, %v3785_v12  ;;  %v3792_v14 = vrot.slane %v3791_v17, 4  ;;  %v3828_v20 = vmax.f32 %v3826_v34, %v3827_v16  ;;  %v3834_v21 = vrot.slane %v3833_v18, 4  ;;  %v3968_v40 = vld [vmem:[%s8567_s5 + $0x100] sm:$0xff]  ;;  %v3973_v34 = vld [vmem:[%s8567_s5 + $0x188] sm:$0xff]  ;;  %5615 = vmatpush1.bf16.msra.mxu1 %v5614_v9 }
 0x59b   : > { %v3975_v12 = vld [vmem:[%s8567_s5 + $0x1c8] sm:$0xff]  ;;  %v5618_v16 = vpack.c.bf16 %v3970_v11, %v3968_v40  ;;  %5617 = vmatprep.subr.bf16.mxu1 %v5616_v10  ;;  %v3998_v6 = vld [vmem:[%s8567_s5 + $0x4c0] sm:$0xff] }
 0x59c   : > { %v3787_v41 = vrot.slane %v3786_v19, 2  ;;  %v3793_v24 = vmax.f32 %v3791_v17, %v3792_v14  ;;  %v3829_v25 = vrot.slane %v3828_v20, 2  ;;  %v3835_v26 = vmax.f32 %v3833_v18, %v3834_v21  ;;  %v3972_v18 = vld [vmem:[%s8567_s5 + $0x180] sm:$0xff]  ;;  %v3977_v14 = vld [vmem:[%s8567_s5 + $0x208] sm:$0xff] }
 0x59d   : > { %v5620_v17 = vpack.c.bf16 %v3975_v12, %v3973_v34  ;;  %v5646_v7 = vpack.c.bf16 %v3998_v6, %v3996_v5  ;;  %v4001_v9 = vld [vmem:[%s8567_s5 + $0x508] sm:$0xff]  ;;  %v4000_v11 = vld [vmem:[%s8567_s5 + $0x500] sm:$0xff]  ;;  %v4119_v6 = vld [vmem:[%s8567_s5 + $0x10] sm:$0xff] }
 0x59e   : > { %v3788_v27 = vmax.f32 %v3786_v19, %v3787_v41  ;;  %v3794_v28 = vrot.slane %v3793_v24, 2  ;;  %v3830_v29 = vmax.f32 %v3828_v20, %v3829_v25  ;;  %v3836_v31 = vrot.slane %v3835_v26, 2  ;;  %v3974_v19 = vld [vmem:[%s8567_s5 + $0x1c0] sm:$0xff]  ;;  %v3979_v20 = vld [vmem:[%s8567_s5 + $0x248] sm:$0xff]  ;;  %5619 = vmatpush1.bf16.msra.mxu1 %v5618_v16 }
 0x59f   : > { %v5622_v21 = vpack.c.bf16 %v3974_v19, %v3972_v18  ;;  %5621 = vmatprep.subr.bf16.mxu1 %v5620_v17  ;;  %v5624_v22 = vpack.c.bf16 %v3979_v20, %v3977_v14  ;;  %v3978_v41 = vld [vmem:[%s8567_s5 + $0x240] sm:$0xff]  ;;  %v3983_v25 = vld [vmem:[%s8567_s5 + $0x2c8] sm:$0xff] }
 0x5a0   : > { %v3789_v36 = vrot.slane %v3788_v27, 1  ;;  %v3795_v37 = vmax.f32 %v3793_v24, %v3794_v28  ;;  %v3831_v38 = vrot.slane %v3830_v29, 1  ;;  %v3837_v39 = vmax.f32 %v3835_v26, %v3836_v31  ;;  %v3981_v24 = vld [vmem:[%s8567_s5 + $0x288] sm:$0xff]  ;;  %v3980_v28 = vld [vmem:[%s8567_s5 + $0x280] sm:$0xff] }
 0x5a1   : > { %v5626_v26 = vpack.c.bf16 %v3978_v41, %v3976_v23  ;;  %v3985_v31 = vld [vmem:[%s8567_s5 + $0x308] sm:$0xff]  ;;  %v4002_v34 = vld [vmem:[%s8567_s5 + $0x540] sm:$0xff] }
 0x5a2   : > { %v3796_v35 = vrot.slane %v3795_v37, 1  ;;  %v3838_v62 = vrot.slane %v3837_v39, 1  ;;  %v3790_v43 = vmax.f32 %v3788_v27, %v3789_v36  ;;  %v3832_v45 = vmax.f32 %v3830_v29, %v3831_v38  ;;  %5623 = vmatpush1.bf16.msra.mxu1 %v5622_v21  ;;  %v3982_v29 = vld [vmem:[%s8567_s5 + $0x2c0] sm:$0xff]  ;;  %v4003_v10 = vld [vmem:[%s8567_s5 + $0x548] sm:$0xff] }
 0x5a3   : > { %5625 = vmatprep.subr.bf16.mxu1 %v5624_v22  ;;  %v5628_v27 = vpack.c.bf16 %v3983_v25, %v3981_v24  ;;  %v5630_v36 = vpack.c.bf16 %v3982_v29, %v3980_v28  ;;  %v3984_v38 = vld [vmem:[%s8567_s5 + $0x300] sm:$0xff]  ;;  %v5648_v40 = vpack.c.bf16 %v4003_v10, %v4001_v9  ;;  %v5650_v12 = vpack.c.bf16 %v4002_v34, %v4000_v11  ;;  %v4005_v16 = vld [vmem:[%s8567_s5 + $0x588] sm:$0xff]  ;;  %v4123_v34 = vld [vmem:[%s8567_s5 + $0x90] sm:$0xff] }
 0x5a4   : > { %v3797_v44 = vmax.f32 %v3795_v37, %v3796_v35  ;;  %v3839_v15 = vmax.f32 %v3837_v39, %v3838_v62  ;;  %v5632_v37 = vpack.c.bf16 %v3987_v33, %v3985_v31  ;;  %v3986_v39 = vld [vmem:[%s8567_s5 + $0x340] sm:$0xff]  ;;  %v3989_v35 = vld [vmem:[%s8567_s5 + $0x388] sm:$0xff] }
 0x5a5   : > { %v3991_v62 = vld [vmem:[%s8567_s5 + $0x3c8] sm:$0xff]  ;;  %v4004_v18 = vld [vmem:[%s8567_s5 + $0x580] sm:$0xff] }
 0x5a6   : > { %v3800_v46 = vcombine.low %v3790_v43, %v3797_v44  ;;  %v3842_v47 = vcombine.low %v3832_v45, %v3839_v15  ;;  %5627 = vmatpush1.bf16.msra.mxu1 %v5626_v26  ;;  %v5636_v43 = vpack.c.bf16 %v3991_v62, %v3989_v35  ;;  %v3988_v44 = vld [vmem:[%s8567_s5 + $0x380] sm:$0xff]  ;;  %v3993_v15 = vld [vmem:[%s8567_s5 + $0x408] sm:$0xff] }
 0x5a7   : > { %5629 = vmatprep.subr.bf16.mxu1 %v5628_v27  ;;  %v3990_v45 = vld [vmem:[%s8567_s5 + $0x3c0] sm:$0xff]  ;;  %v4007_v17 = vld [vmem:[%s8567_s5 + $0x5c8] sm:$0xff] }
 0x5a8   : > { %v3807_v48 = vrot.slane %v3800_v46, %v3806_v42  ;;  %v3849_v49 = vrot.slane %v3842_v47, %v3806_v42  ;;  %v3995_v46 = vld [vmem:[%s8567_s5 + $0x448] sm:$0xff]  ;;  %v5638_v47 = vpack.c.bf16 %v3990_v45, %v3988_v44  ;;  %v5652_v19 = vpack.c.bf16 %v4007_v17, %v4005_v16  ;;  %v4006_v14 = vld [vmem:[%s8567_s5 + $0x5c0] sm:$0xff]  ;;  %v4130_v16 = vld [vmem:[%s8567_s5 + $0x158] sm:$0xff] }
 0x5a9   : > { %v4009_v20 = vld [vmem:[%s8567_s5 + $0x608] sm:$0xff]  ;;  %v5654_v22 = vpack.c.bf16 %v4006_v14, %v4004_v18  ;;  %v4008_v41 = vld [vmem:[%s8567_s5 + $0x600] sm:$0xff]  ;;  %v4129_v14 = vld [vmem:[%s8567_s5 + $0x150] sm:$0xff] }
 0x5aa   : > { %v3814_v50 = vrot.slane %v3807_v48, %v3806_v42  ;;  %v3856_v51 = vrot.slane %v3849_v49, %v3806_v42  ;;  %5631 = vmatpush1.bf16.msra.mxu1 %v5630_v36  ;;  %v5634_v42 = vpack.c.bf16 %v3986_v39, %v3984_v38  ;;  %v5640_v48 = vpack.c.bf16 %v3995_v46, %v3993_v15  ;;  %v3992_v49 = vld [vmem:[%s8567_s5 + $0x400] sm:$0xff]  ;;  %v4011_v21 = vld [vmem:[%s8567_s5 + $0x648] sm:$0xff] }
 0x5ab   : > { %5633 = vmatprep.subr.bf16.mxu1 %v5632_v37  ;;  %v5656_v23 = vpack.c.bf16 %v4011_v21, %v4009_v20  ;;  %v4010_v24 = vld [vmem:[%s8567_s5 + $0x640] sm:$0xff]  ;;  %v4013_v25 = vld [vmem:[%s8567_s5 + $0x688] sm:$0xff]  ;;  %v4132_v20 = vld [vmem:[%s8567_s5 + $0x198] sm:$0xff] }
 0x5ac   : > { %3820 = vst.msk [vmem:[#allocation3] ss:$2 sm:$0x3] %vm3818_vm3, %v3814_v50  ;;  %3859 = vst.msk [vmem:[#allocation3 + $0x1] ss:$2 sm:$0x3] %vm3818_vm3, %v3856_v51  ;;  %v5658_v27 = vpack.c.bf16 %v4010_v24, %v4008_v41 }
 0x5ad   : > { %v3994_v50 = vld [vmem:[%s8567_s5 + $0x440] sm:$0xff]  ;;  %v4015_v26 = vld [vmem:[%s8567_s5 + $0x6c8] sm:$0xff]  ;;  %v4134_v21 = vld [vmem:[%s8567_s5 + $0x1d8] sm:$0xff] }
 0x5ae   : > { %5635 = vmatpush1.bf16.msra.mxu1 %v5634_v42  ;;  %v5642_v51 = vpack.c.bf16 %v3994_v50, %v3992_v49  ;;  %v5660_v28 = vpack.c.bf16 %v4015_v26, %v4013_v25  ;;  %v4012_v29 = vld [vmem:[%s8567_s5 + $0x680] sm:$0xff]  ;;  %v4017_v33 = vld [vmem:[%s8567_s5 + $0x708] sm:$0xff]  ;;  %v4131_v41 = vld [vmem:[%s8567_s5 + $0x190] sm:$0xff] }
 0x5af   : > { %5637 = vmatprep.subr.bf16.mxu1 %v5636_v43  ;;  %v4014_v31 = vld [vmem:[%s8567_s5 + $0x6c0] sm:$0xff]  ;;  %v4019_v36 = vld [vmem:[%s8567_s5 + $0x748] sm:$0xff]  ;;  %v4133_v24 = vld [vmem:[%s8567_s5 + $0x1d0] sm:$0xff] }
 0x5b0   : > { %v5662_v37 = vpack.c.bf16 %v4014_v31, %v4012_v29  ;;  %v5664_v38 = vpack.c.bf16 %v4019_v36, %v4017_v33  ;;  %v4016_v39 = vld [vmem:[%s8567_s5 + $0x700] sm:$0xff]  ;;  %v4021_v62 = vld [vmem:[%s8567_s5 + $0x788] sm:$0xff]  ;;  %v4136_v25 = vld [vmem:[%s8567_s5 + $0x218] sm:$0xff] }
 0x5b1   : > { %v4018_v35 = vld [vmem:[%s8567_s5 + $0x740] sm:$0xff]  ;;  %v4023_v42 = vld [vmem:[%s8567_s5 + $0x7c8] sm:$0xff]  ;;  %v4138_v26 = vld [vmem:[%s8567_s5 + $0x258] sm:$0xff] }
 0x5b2   : > { %5639 = vmatpush1.bf16.msra.mxu1 %v5638_v47  ;;  %v5666_v43 = vpack.c.bf16 %v4018_v35, %v4016_v39  ;;  %v5668_v44 = vpack.c.bf16 %v4023_v42, %v4021_v62  ;;  %v4020_v45 = vld [vmem:[%s8567_s5 + $0x780] sm:$0xff]  ;;  %v4120_v47 = vld [vmem:[%s8567_s5 + $0x18] sm:$0xff]  ;;  %v4135_v29 = vld [vmem:[%s8567_s5 + $0x210] sm:$0xff] }
 0x5b3   : > { %v7481_v52 = vld [vmem:[#allocation3] sm:$0xf]  ;;  %5641 = vmatprep.subr.bf16.mxu1 %v5640_v48  ;;  %v4022_v15 = vld [vmem:[%s8567_s5 + $0x7c0] sm:$0xff]  ;;  %v4137_v31 = vld [vmem:[%s8567_s5 + $0x250] sm:$0xff] }
 0x5b4   : > { %v3872_v53 = vrot.slane %v7481_v52, %v7035_v3  ;;  %v5670_v46 = vpack.c.bf16 %v4022_v15, %v4020_v45  ;;  %v4122_v48 = vld [vmem:[%s8567_s5 + $0x58] sm:$0xff]  ;;  %v4139_v39 = vld [vmem:[%s8567_s5 + $0x290] sm:$0xff] }
 0x5b5   : > { %v5672_v49 = vpack.c.bf16 %v4122_v48, %v4120_v47  ;;  %v4140_v33 = vld [vmem:[%s8567_s5 + $0x298] sm:$0xff]  ;;  %v4141_v35 = vld [vmem:[%s8567_s5 + $0x2d0] sm:$0xff] }
 0x5b6   : > { %v3873_v54 = vcombine.high %v3872_v53, %v3872_v53  ;;  %v3876_v55 = vsel %vm3783_vm1, %v3872_v53, 0.0  ;;  %5643 = vmatpush1.bf16.msra.mxu1 %v5642_v51  ;;  %v6762_v53 = vmov 269488144   ;;  %v4142_v36 = vld [vmem:[%s8567_s5 + $0x2d8] sm:$0xff]  ;;  %v4143_v45 = vld [vmem:[%s8567_s5 + $0x310] sm:$0xff] }
 0x5b7   : > { %v4144_v62 = vld [vmem:[%s8567_s5 + $0x318] sm:$0xff]  ;;  %v4145_v15 = vld [vmem:[%s8567_s5 + $0x350] sm:$0xff] }
 0x5b8   : > { %v3877_v57 = vsel %vm3783_vm1, %v3873_v54, 0.0  ;;  %v3884_v54 = vunpack.c.l.s4 %v6762_v53  ;;  %v4146_v42 = vld [vmem:[%s8567_s5 + $0x358] sm:$0xff]  ;;  %v5698_v48 = vpack.c.bf16 %v4145_v15, %v4143_v45 }
 0x5b9   : > { %v3878_v58 = vadd.f32 %v3877_v57, %v3876_v55  ;;  %v4150_v47 = vld [vmem:[%s8567_s5 + $0x3d8] sm:$0xff] }
 0x5ba   : > { %v3885_v55 = vunpack.c.0.s8 %v3884_v54  ;;  %v5333_v54 = vld [vmem:[%s8566_s4 + $0x3] ss:$8 sm:$0x3] }
 0x5bb   : > { %3879 = vadd.xlane.f32.xlu1 %v3878_v58 }
 0x5bc   : > { %v7596_v57 = vsub.s32 %v3885_v55, %v7027_v61  ;;  %v3997_v61 = vld [vmem:[%s8567_s5 + $0x488] sm:$0xff] }
 0x5bd   : > { %v5334_v55 = vld [vmem:[%s8566_s4 + $0x4] ss:$8 sm:$0x3] }
 0x648   : > { %v3880_v58 = vpop.xlane.xlu1 %3879 }
 0x649   : > { %v3881_v56 = vmul.f32 0.00390625, %v3880_v58  ;;  %v3926_v58 = vrot.slane %v5333_v54, %v7448_v30 }
 0x64b   : > { %v3889_v59 = vrot.slane %v3881_v56, %v7596_v57  ;;  %v3930_v56 = vrot.slane %v5333_v54, %v7454_v32  ;;  %v4154_v54 = vld [vmem:[%s8567_s5 + $0x458] sm:$0xff] }
 0x64d   : > { %v7600_v60 = vsub.f32 %v7481_v52, %v3889_v59  ;;  %v3999_v52 = vld [vmem:[%s8567_s5 + $0x4c8] sm:$0xff]  ;;  %v3945_v59 = vrot.slane %v5334_v55, %v7448_v30 }
 0x64e   : > { %v5644_v8 = vpack.c.bf16 %v3999_v52, %v3997_v61 }
 0x64f   : > { %v3892_v63 = vmul.f32 %v7600_v60, %v7600_v60 }
 0x650   : > { %5645 = vmatprep.subr.bf16.mxu1 %v5644_v8 }
 0x651   : > { %v3900_v0 = vrot.slane %v3892_v63, %v7035_v3  ;;  %5647 = vmatpush1.bf16.msra.mxu1 %v5646_v7  ;;  %v3949_v63 = vrot.slane %v5334_v55, %v7454_v32  ;;  %v4121_v7 = vld [vmem:[%s8567_s5 + $0x50] sm:$0xff] }
 0x652   : > { %5649 = vmatprep.subr.bf16.mxu1 %v5648_v40  ;;  %v5674_v40 = vpack.c.bf16 %v4121_v7, %v4119_v6  ;;  %v4159_v6 = vld [vmem:[%s8567_s5 + $0x510] sm:$0xff] }
 0x653   : > { %v3901_v13 = vcombine.high %v3900_v0, %v3900_v0  ;;  %v3904_v1 = vsel %vm3783_vm1, %v3900_v0, 0.0  ;;  %v3931_v0 = vcombine.low %v3926_v58, %v3930_v56  ;;  %v4151_v56 = vld [vmem:[%s8567_s5 + $0x410] sm:$0xff] }
 0x654   : > { %v4161_v7 = vld [vmem:[%s8567_s5 + $0x550] sm:$0xff] }
 0x655   : > { %v3905_v2 = vsel %vm3783_vm1, %v3901_v13, 0.0  ;;  %5651 = vmatpush1.bf16.msra.mxu1 %v5650_v12  ;;  %v3950_v13 = vcombine.low %v3945_v59, %v3949_v63  ;;  %v4125_v12 = vld [vmem:[%s8567_s5 + $0xd0] sm:$0xff]  ;;  %v4156_v63 = vld [vmem:[%s8567_s5 + $0x498] sm:$0xff] }
 0x656   : > { %v3906_v4 = vadd.f32 %v3905_v2, %v3904_v1  ;;  %5653 = vmatprep.subr.bf16.mxu1 %v5652_v19  ;;  %v5678_v17 = vpack.c.bf16 %v4125_v12, %v4123_v34  ;;  %v4127_v19 = vld [vmem:[%s8567_s5 + $0x110] sm:$0xff]  ;;  %v4168_v34 = vld [vmem:[%s8567_s5 + $0x618] sm:$0xff] }
 0x657   : > { %v3957_v52 = vrot.slane %v3950_v13, %v7035_v3  ;;  %v4153_v59 = vld [vmem:[%s8567_s5 + $0x450] sm:$0xff]  ;;  %v4170_v12 = vld [vmem:[%s8567_s5 + $0x658] sm:$0xff] }
 0x658   : > { %3907 = vadd.xlane.f32.xlu1 %v3906_v4  ;;  %v3938_v4 = vrot.slane %v3931_v0, %v7035_v3  ;;  %v4158_v0 = vld [vmem:[%s8567_s5 + $0x4d8] sm:$0xff]  ;;  %v5706_v13 = vpack.c.bf16 %v4153_v59, %v4151_v56  ;;  %v4318_v56 = vld [vmem:[%s8567_s5 + $0x28] sm:$0xff] }
 0x659   : > { %5655 = vmatpush1.bf16.msra.mxu1 %v5654_v22  ;;  %v5682_v22 = vpack.c.bf16 %v4129_v14, %v4127_v19  ;;  %v4172_v19 = vld [vmem:[%s8567_s5 + $0x698] sm:$0xff]  ;;  %v4320_v59 = vld [vmem:[%s8567_s5 + $0x68] sm:$0xff] }
 0x65a   : > { %5657 = vmatprep.subr.bf16.mxu1 %v5656_v23  ;;  %v5684_v23 = vpack.c.bf16 %v4134_v21, %v4132_v20  ;;  %v4174_v14 = vld [vmem:[%s8567_s5 + $0x6d8] sm:$0xff] }
 0x65b   : > { %v5724_v21 = vpack.c.bf16 %v4174_v14, %v4172_v19  ;;  %v4504_v14 = vld [vmem:[%s8567_s5 + $0x138] sm:$0xff] }
 0x65d   : > { %5659 = vmatpush1.bf16.msra.mxu1 %v5658_v27  ;;  %v5686_v27 = vpack.c.bf16 %v4133_v24, %v4131_v41  ;;  %v4176_v41 = vld [vmem:[%s8567_s5 + $0x718] sm:$0xff] }
 0x65e   : > { %5661 = vmatprep.subr.bf16.mxu1 %v5660_v28  ;;  %v5688_v28 = vpack.c.bf16 %v4138_v26, %v4136_v25  ;;  %v4178_v24 = vld [vmem:[%s8567_s5 + $0x758] sm:$0xff] }
 0x65f   : > { %v5728_v26 = vpack.c.bf16 %v4178_v24, %v4176_v41  ;;  %v4503_v41 = vld [vmem:[%s8567_s5 + $0x130] sm:$0xff] }
 0x660   : > { %v4505_v24 = vld [vmem:[%s8567_s5 + $0x170] sm:$0xff] }
 0x661   : > { %5663 = vmatpush1.bf16.msra.mxu1 %v5662_v37  ;;  %v5690_v37 = vpack.c.bf16 %v4137_v31, %v4135_v29  ;;  %v4180_v31 = vld [vmem:[%s8567_s5 + $0x798] sm:$0xff] }
 0x662   : > { %5665 = vmatprep.subr.bf16.mxu1 %v5664_v38  ;;  %v5692_v38 = vpack.c.bf16 %v4142_v36, %v4140_v33  ;;  %v4182_v33 = vld [vmem:[%s8567_s5 + $0x7d8] sm:$0xff] }
 0x663   : > { %v5732_v36 = vpack.c.bf16 %v4182_v33, %v4180_v31  ;;  %v4510_v33 = vld [vmem:[%s8567_s5 + $0x1f8] sm:$0xff] }
 0x665   : > { %5667 = vmatpush1.bf16.msra.mxu1 %v5666_v43  ;;  %v5694_v43 = vpack.c.bf16 %v4141_v35, %v4139_v39  ;;  %v5335_v35 = vld [vmem:[%s8566_s4 + $0x5] ss:$8 sm:$0x3] }
 0x666   : > { %5669 = vmatprep.subr.bf16.mxu1 %v5668_v44  ;;  %v5696_v44 = vpack.c.bf16 %v4146_v42, %v4144_v62  ;;  %v4034_v62 = vrot.slane %v5335_v35, %v7454_v32  ;;  %v4030_v42 = vrot.slane %v5335_v35, %v7448_v30  ;;  %v4509_v35 = vld [vmem:[%s8567_s5 + $0x1f0] sm:$0xff] }
 0x669   : > { %5671 = vmatpush1.bf16.msra.mxu1 %v5670_v46  ;;  %v4148_v46 = vld [vmem:[%s8567_s5 + $0x398] sm:$0xff] }
 0x66a   : > { %5673 = vmatprep.subr.bf16.mxu1 %v5672_v49  ;;  %v5700_v49 = vpack.c.bf16 %v4150_v47, %v4148_v46  ;;  %v5336_v46 = vld [vmem:[%s8566_s4 + $0x6] ss:$8 sm:$0x3] }
 0x66b   : > { %v4189_v47 = vrot.slane %v5336_v46, %v7448_v30 }
 0x6e5   : > { %v3908_v50 = vpop.xlane.xlu1 %3907 }
 0x6e6   : > { %v3909_v51 = vmul.f32 0.00390625, %v3908_v50  ;;  %v4147_v50 = vld [vmem:[%s8567_s5 + $0x390] sm:$0xff] }
 0x6e8   : > { %v3910_v53 = vadd.f32 1e-05, %v3909_v51  ;;  %v4149_v51 = vld [vmem:[%s8567_s5 + $0x3d0] sm:$0xff] }
 0x6e9   : > { %v5702_v55 = vpack.c.bf16 %v4149_v51, %v4147_v50 }
 0x6ea   : > { %6623 = vrsqrt.f32 %v3910_v53  ;;  %v4152_v53 = vld [vmem:[%s8567_s5 + $0x418] sm:$0xff] }
 0x6eb   : > { %v5704_v58 = vpack.c.bf16 %v4154_v54, %v4152_v53 }
 0x6f4   : > { %v6624_v1 = vpop.eup %6623 }
 0x6f5   : > { %v3919_v2 = vrot.slane %v6624_v1, %v7596_v57  ;;  %v4124_v57 = vld [vmem:[%s8567_s5 + $0x98] sm:$0xff]  ;;  %v5708_v1 = vpack.c.bf16 %v4158_v0, %v4156_v63  ;;  %v5736_v0 = vpack.c.bf16 %v4320_v59, %v4318_v56 }
 0x6f6   : > { %v4496_v63 = vld [vmem:[%s8567_s5 + $0x38] sm:$0xff] }
 0x6f7   : > { %v3921_v61 = vmul.f32 %v3919_v2, %v7600_v60  ;;  %v4126_v60 = vld [vmem:[%s8567_s5 + $0xd8] sm:$0xff]  ;;  %v4155_v2 = vld [vmem:[%s8567_s5 + $0x490] sm:$0xff] }
 0x6f8   : > { %v5676_v11 = vpack.c.bf16 %v4126_v60, %v4124_v57  ;;  %v4166_v57 = vld [vmem:[%s8567_s5 + $0x5d8] sm:$0xff]  ;;  %v5714_v60 = vpack.c.bf16 %v4161_v7, %v4159_v6  ;;  %v4324_v7 = vld [vmem:[%s8567_s5 + $0xe8] sm:$0xff] }
 0x6f9   : > { %v3940_v8 = vmul.f32 %v3938_v4, %v3921_v61  ;;  %v4157_v4 = vld [vmem:[%s8567_s5 + $0x4d0] sm:$0xff]  ;;  %v4160_v61 = vld [vmem:[%s8567_s5 + $0x518] sm:$0xff] }
 0x6fa   : > { %v4516_v56 = vld [vmem:[%s8567_s5 + $0x2b8] sm:$0xff] }
 0x6fb   : > { %v3959_v5 = vadd.f32 %v3957_v52, %v3940_v8  ;;  %v4162_v52 = vld [vmem:[%s8567_s5 + $0x558] sm:$0xff]  ;;  %v5710_v8 = vpack.c.bf16 %v4157_v4, %v4155_v2  ;;  %v4319_v2 = vld [vmem:[%s8567_s5 + $0x60] sm:$0xff] }
 0x6fc   : > { %v4518_v59 = vld [vmem:[%s8567_s5 + $0x2f8] sm:$0xff] }
 0x6fd   : > { %v4044_v9 = vrot.slane %v3959_v5, %v7035_v3  ;;  %v4128_v3 = vld [vmem:[%s8567_s5 + $0x118] sm:$0xff]  ;;  %v5712_v5 = vpack.c.bf16 %v4162_v52, %v4160_v61  ;;  %v4495_v52 = vld [vmem:[%s8567_s5 + $0x30] sm:$0xff] }
 0x6fe   : > { %v5680_v18 = vpack.c.bf16 %v4130_v16, %v4128_v3  ;;  %v5720_v16 = vpack.c.bf16 %v4170_v12, %v4168_v34  ;;  %v4499_v34 = vld [vmem:[%s8567_s5 + $0xb0] sm:$0xff] }
 0x6ff   : > { %v4045_v10 = vcombine.high %v4044_v9, %v4044_v9 }
 0x701   : > { %4112 = vmatprep.mubr.f32.mxu1 %v4045_v10 }
 0x702   : > { %4113 = vmatmul.mubr.f32.vlgmr.msra.gmra.mrb[0].mxu1 %v4044_v9  ;;  %v4164_v9 = vld [vmem:[%s8567_s5 + $0x598] sm:$0xff] }
 0x703   : > { %5675 = vmatpush1.bf16.msra.mxu1 %v5674_v40  ;;  %v5716_v10 = vpack.c.bf16 %v4166_v57, %v4164_v9  ;;  %v4163_v40 = vld [vmem:[%s8567_s5 + $0x590] sm:$0xff]  ;;  %v4500_v9 = vld [vmem:[%s8567_s5 + $0xb8] sm:$0xff] }
 0x704   : > { %5677 = vmatprep.subr.bf16.mxu1 %v5676_v11  ;;  %v4165_v11 = vld [vmem:[%s8567_s5 + $0x5d0] sm:$0xff]  ;;  %v4502_v57 = vld [vmem:[%s8567_s5 + $0xf8] sm:$0xff] }
 0x705   : > { %v5718_v3 = vpack.c.bf16 %v4165_v11, %v4163_v40  ;;  %v4321_v40 = vld [vmem:[%s8567_s5 + $0xa0] sm:$0xff] }
 0x706   : > { %v4323_v11 = vld [vmem:[%s8567_s5 + $0xe0] sm:$0xff] }
 0x707   : > { %5679 = vmatpush1.bf16.msra.mxu1 %v5678_v17  ;;  %v4167_v17 = vld [vmem:[%s8567_s5 + $0x610] sm:$0xff]  ;;  %v5742_v12 = vpack.c.bf16 %v4323_v11, %v4321_v40  ;;  %v4343_v40 = vld [vmem:[%s8567_s5 + $0x360] sm:$0xff] }
 0x708   : > { %5681 = vmatprep.subr.bf16.mxu1 %v5680_v18  ;;  %v4169_v18 = vld [vmem:[%s8567_s5 + $0x650] sm:$0xff] }
 0x709   : > { %v5722_v20 = vpack.c.bf16 %v4169_v18, %v4167_v17  ;;  %v4328_v17 = vld [vmem:[%s8567_s5 + $0x168] sm:$0xff]  ;;  %v4519_v11 = vld [vmem:[%s8567_s5 + $0x330] sm:$0xff] }
 0x70b   : > { %5683 = vmatpush1.bf16.msra.mxu1 %v5682_v22  ;;  %v4171_v22 = vld [vmem:[%s8567_s5 + $0x690] sm:$0xff] }
 0x70c   : > { %5685 = vmatprep.subr.bf16.mxu1 %v5684_v23  ;;  %v4173_v23 = vld [vmem:[%s8567_s5 + $0x6d0] sm:$0xff] }
 0x70d   : > { %v5726_v25 = vpack.c.bf16 %v4173_v23, %v4171_v22  ;;  %v4327_v23 = vld [vmem:[%s8567_s5 + $0x160] sm:$0xff] }
 0x70f   : > { %5687 = vmatpush1.bf16.msra.mxu1 %v5686_v27  ;;  %v4175_v27 = vld [vmem:[%s8567_s5 + $0x710] sm:$0xff] }
 0x710   : > { %5689 = vmatprep.subr.bf16.mxu1 %v5688_v28  ;;  %v4177_v28 = vld [vmem:[%s8567_s5 + $0x750] sm:$0xff] }
 0x711   : > { %v5730_v29 = vpack.c.bf16 %v4177_v28, %v4175_v27  ;;  %v4332_v27 = vld [vmem:[%s8567_s5 + $0x1e8] sm:$0xff]  ;;  %v4508_v28 = vld [vmem:[%s8567_s5 + $0x1b8] sm:$0xff] }
 0x713   : > { %5691 = vmatpush1.bf16.msra.mxu1 %v5690_v37  ;;  %v4179_v37 = vld [vmem:[%s8567_s5 + $0x790] sm:$0xff] }
 0x714   : > { %5693 = vmatprep.subr.bf16.mxu1 %v5692_v38  ;;  %v4181_v38 = vld [vmem:[%s8567_s5 + $0x7d0] sm:$0xff] }
 0x715   : > { %v5734_v39 = vpack.c.bf16 %v4181_v38, %v4179_v37  ;;  %v4331_v37 = vld [vmem:[%s8567_s5 + $0x1e0] sm:$0xff]  ;;  %v5812_v38 = vpack.c.bf16 %v4510_v33, %v4508_v28  ;;  %v4530_v28 = vld [vmem:[%s8567_s5 + $0x478] sm:$0xff] }
 0x717   : > { %5695 = vmatpush1.bf16.msra.mxu1 %v5694_v43 }
 0x718   : > { %5697 = vmatprep.subr.bf16.mxu1 %v5696_v44 }
 0x71b   : > { %5699 = vmatpush1.bf16.msra.mxu1 %v5698_v48  ;;  %v4193_v48 = vrot.slane %v5336_v46, %v7454_v32 }
 0x71c   : > { %5701 = vmatprep.subr.bf16.mxu1 %v5700_v49 }
 0x71f   : > { %5703 = vmatpush1.bf16.msra.mxu1 %v5702_v55 }
 0x720   : > { %5705 = vmatprep.subr.bf16.mxu1 %v5704_v58 }
 0x723   : > { %5707 = vmatpush1.bf16.msra.mxu1 %v5706_v13  ;;  %v4498_v13 = vld [vmem:[%s8567_s5 + $0x78] sm:$0xff] }
 0x724   : > { %5709 = vmatprep.subr.bf16.mxu1 %v5708_v1  ;;  %v4317_v1 = vld [vmem:[%s8567_s5 + $0x20] sm:$0xff]  ;;  %v5800_v4 = vpack.c.bf16 %v4498_v13, %v4496_v63 }
 0x725   : > { %v5738_v61 = vpack.c.bf16 %v4319_v2, %v4317_v1  ;;  %v4337_v1 = vld [vmem:[%s8567_s5 + $0x2a0] sm:$0xff] }
 0x726   : > { %5801 = vmatprep.subr.bf16.mxu0 %v5800_v4  ;;  %v4339_v2 = vld [vmem:[%s8567_s5 + $0x2e0] sm:$0xff]  ;;  %v4515_v4 = vld [vmem:[%s8567_s5 + $0x2b0] sm:$0xff] }
 0x727   : > { %5711 = vmatpush1.bf16.msra.mxu1 %v5710_v8  ;;  %v4497_v8 = vld [vmem:[%s8567_s5 + $0x70] sm:$0xff] }
 0x728   : > { %5713 = vmatprep.subr.bf16.mxu1 %v5712_v5  ;;  %v4322_v5 = vld [vmem:[%s8567_s5 + $0xa8] sm:$0xff]  ;;  %v5802_v6 = vpack.c.bf16 %v4497_v8, %v4495_v52  ;;  %v4517_v52 = vld [vmem:[%s8567_s5 + $0x2f0] sm:$0xff] }
 0x729   : > { %v4342_v8 = vld [vmem:[%s8567_s5 + $0x328] sm:$0xff] }
 0x72a   : > { %5803 = vmatpush1.bf16.msra.mxu0 %v5802_v6  ;;  %v4520_v6 = vld [vmem:[%s8567_s5 + $0x338] sm:$0xff] }
 0x72b   : > { %5715 = vmatpush1.bf16.msra.mxu1 %v5714_v60  ;;  %v5740_v60 = vpack.c.bf16 %v4324_v7, %v4322_v5  ;;  %v4344_v5 = vld [vmem:[%s8567_s5 + $0x368] sm:$0xff]  ;;  %v4522_v7 = vld [vmem:[%s8567_s5 + $0x378] sm:$0xff] }
 0x72c   : > { %5717 = vmatprep.subr.bf16.mxu1 %v5716_v10  ;;  %v5804_v10 = vpack.c.bf16 %v4502_v57, %v4500_v9  ;;  %v5758_v9 = vpack.c.bf16 %v4339_v2, %v4337_v1  ;;  %v5822_v57 = vpack.c.bf16 %v4517_v52, %v4515_v4  ;;  %v4357_v1 = vld [vmem:[%s8567_s5 + $0x520] sm:$0xff]  ;;  %v4537_v52 = vld [vmem:[%s8567_s5 + $0x570] sm:$0xff] }
 0x72d   : > { %v4359_v2 = vld [vmem:[%s8567_s5 + $0x560] sm:$0xff] }
 0x72e   : > { %5805 = vmatprep.subr.bf16.mxu0 %v5804_v10  ;;  %v4341_v10 = vld [vmem:[%s8567_s5 + $0x320] sm:$0xff] }
 0x72f   : > { %5719 = vmatpush1.bf16.msra.mxu1 %v5718_v3  ;;  %v4501_v3 = vld [vmem:[%s8567_s5 + $0xf0] sm:$0xff] }
 0x730   : > { %5721 = vmatprep.subr.bf16.mxu1 %v5720_v16  ;;  %v4326_v16 = vld [vmem:[%s8567_s5 + $0x128] sm:$0xff]  ;;  %v5806_v18 = vpack.c.bf16 %v4501_v3, %v4499_v34  ;;  %v5824_v34 = vpack.c.bf16 %v4522_v7, %v4520_v6 }
 0x731   : > { %v5744_v19 = vpack.c.bf16 %v4328_v17, %v4326_v16  ;;  %v4346_v3 = vld [vmem:[%s8567_s5 + $0x3a8] sm:$0xff]  ;;  %v4524_v17 = vld [vmem:[%s8567_s5 + $0x3b8] sm:$0xff] }
 0x732   : > { %5807 = vmatpush1.bf16.msra.mxu0 %v5806_v18  ;;  %v4348_v16 = vld [vmem:[%s8567_s5 + $0x3e8] sm:$0xff]  ;;  %v4526_v18 = vld [vmem:[%s8567_s5 + $0x3f8] sm:$0xff] }
 0x733   : > { %5723 = vmatpush1.bf16.msra.mxu1 %v5722_v20  ;;  %v4506_v20 = vld [vmem:[%s8567_s5 + $0x178] sm:$0xff] }
 0x734   : > { %5725 = vmatprep.subr.bf16.mxu1 %v5724_v21  ;;  %v4325_v21 = vld [vmem:[%s8567_s5 + $0x120] sm:$0xff]  ;;  %v5808_v22 = vpack.c.bf16 %v4506_v20, %v4504_v14  ;;  %v5764_v20 = vpack.c.bf16 %v4348_v16, %v4346_v3  ;;  %v4542_v16 = vld [vmem:[%s8567_s5 + $0x5f8] sm:$0xff] }
 0x736   : > { %5809 = vmatprep.subr.bf16.mxu0 %v5808_v22  ;;  %v4347_v22 = vld [vmem:[%s8567_s5 + $0x3e0] sm:$0xff] }
 0x737   : > { %5727 = vmatpush1.bf16.msra.mxu1 %v5726_v25  ;;  %v5746_v25 = vpack.c.bf16 %v4327_v23, %v4325_v21  ;;  %v4345_v21 = vld [vmem:[%s8567_s5 + $0x3a0] sm:$0xff]  ;;  %v4523_v23 = vld [vmem:[%s8567_s5 + $0x3b0] sm:$0xff] }
 0x738   : > { %5729 = vmatprep.subr.bf16.mxu1 %v5728_v26  ;;  %v4330_v26 = vld [vmem:[%s8567_s5 + $0x1a8] sm:$0xff] }
 0x739   : > { %v5748_v31 = vpack.c.bf16 %v4332_v27, %v4330_v26  ;;  %v4352_v26 = vld [vmem:[%s8567_s5 + $0x468] sm:$0xff]  ;;  %v4528_v27 = vld [vmem:[%s8567_s5 + $0x438] sm:$0xff] }
 0x73b   : > { %5731 = vmatpush1.bf16.msra.mxu1 %v5730_v29  ;;  %v5810_v29 = vpack.c.bf16 %v4505_v24, %v4503_v41  ;;  %v5828_v41 = vpack.c.bf16 %v4526_v18, %v4524_v17  ;;  %v4525_v24 = vld [vmem:[%s8567_s5 + $0x3f0] sm:$0xff]  ;;  %v4361_v17 = vld [vmem:[%s8567_s5 + $0x5a0] sm:$0xff] }
 0x73c   : > { %5733 = vmatprep.subr.bf16.mxu1 %v5732_v36  ;;  %v4329_v36 = vld [vmem:[%s8567_s5 + $0x1a0] sm:$0xff] }
 0x73d   : > { %5811 = vmatpush1.bf16.msra.mxu0 %v5810_v29  ;;  %v5766_v29 = vpack.c.bf16 %v4347_v22, %v4345_v21  ;;  %v4363_v18 = vld [vmem:[%s8567_s5 + $0x5e0] sm:$0xff]  ;;  %v4541_v21 = vld [vmem:[%s8567_s5 + $0x5f0] sm:$0xff] }
 0x73e   : > { %5813 = vmatprep.subr.bf16.mxu0 %v5812_v38  ;;  %v4527_v38 = vld [vmem:[%s8567_s5 + $0x430] sm:$0xff] }
 0x73f   : > { %5735 = vmatpush1.bf16.msra.mxu1 %v5734_v39  ;;  %v4507_v39 = vld [vmem:[%s8567_s5 + $0x1b0] sm:$0xff] }
 0x740   : > { %5737 = vmatprep.subr.bf16.mxu1 %v5736_v0 }
 0x7d5   : > { %v4114_v43 = vpop.f32.mrb[0].mxu1 }
 0x7d6   : > { %v4116_v44 = vpop.f32.mrb[1].mxu1  ;;  %v4115_v15 = vadd.f32 %v4114_v43, %v4030_v42  ;;  %v4336_v42 = vld [vmem:[%s8567_s5 + $0x268] sm:$0xff]  ;;  %v4512_v43 = vld [vmem:[%s8567_s5 + $0x238] sm:$0xff] }
 0x7d7   : > { %v4117_v45 = vadd.f32 %v4116_v44, %v4034_v62  ;;  %v4334_v62 = vld [vmem:[%s8567_s5 + $0x228] sm:$0xff]  ;;  %v4514_v44 = vld [vmem:[%s8567_s5 + $0x278] sm:$0xff] }
 0x7d8   : > { %v5752_v46 = vpack.c.bf16 %v4336_v42, %v4334_v62  ;;  %v4354_v62 = vld [vmem:[%s8567_s5 + $0x4a8] sm:$0xff] }
 0x7d9   : > { %4260 = vmatprep.mubr.f32.mxu1 %v4117_v45  ;;  %v5750_v45 = vpack.c.bf16 %v4331_v37, %v4329_v36  ;;  %v4349_v36 = vld [vmem:[%s8567_s5 + $0x420] sm:$0xff]  ;;  %v4356_v42 = vld [vmem:[%s8567_s5 + $0x4e8] sm:$0xff] }
 0x7da   : > { %4261 = vmatmul.mubr.f32.vlgmr.msra.gmra.mrb[2].mxu1 %v4115_v15  ;;  %v5814_v15 = vpack.c.bf16 %v4509_v35, %v4507_v39  ;;  %v4351_v37 = vld [vmem:[%s8567_s5 + $0x460] sm:$0xff]  ;;  %v5832_v39 = vpack.c.bf16 %v4530_v28, %v4528_v27  ;;  %v4529_v35 = vld [vmem:[%s8567_s5 + $0x470] sm:$0xff] }
 0x7db   : > { %5739 = vmatpush1.bf16.msra.mxu1 %v5738_v61  ;;  %v5820_v61 = vpack.c.bf16 %v4518_v59, %v4516_v56  ;;  %v4536_v56 = vld [vmem:[%s8567_s5 + $0x538] sm:$0xff]  ;;  %v4365_v27 = vld [vmem:[%s8567_s5 + $0x620] sm:$0xff] }
 0x7dc   : > { %5741 = vmatprep.subr.bf16.mxu1 %v5740_v60  ;;  %5815 = vmatpush1.bf16.msra.mxu0 %v5814_v15  ;;  %v5760_v60 = vpack.c.bf16 %v4344_v5, %v4342_v8  ;;  %v5834_v15 = vpack.c.bf16 %v4529_v35, %v4527_v38  ;;  %v4538_v59 = vld [vmem:[%s8567_s5 + $0x578] sm:$0xff]  ;;  %v5778_v8 = vpack.c.bf16 %v4359_v2, %v4357_v1  ;;  %v4367_v28 = vld [vmem:[%s8567_s5 + $0x660] sm:$0xff]  ;;  %v4378_v2 = vld [vmem:[%s8567_s5 + $0x7a8] sm:$0xff] }
 0x7dd   : > { %v5840_v4 = vpack.c.bf16 %v4538_v59, %v4536_v56  ;;  %v4548_v35 = vld [vmem:[%s8567_s5 + $0x6b8] sm:$0xff]  ;;  %v4373_v56 = vld [vmem:[%s8567_s5 + $0x720] sm:$0xff] }
 0x7df   : > { %5743 = vmatpush1.bf16.msra.mxu1 %v5742_v12  ;;  %v4521_v12 = vld [vmem:[%s8567_s5 + $0x370] sm:$0xff] }
 0x7e0   : > { %5745 = vmatprep.subr.bf16.mxu1 %v5744_v19  ;;  %v5762_v19 = vpack.c.bf16 %v4343_v40, %v4341_v10  ;;  %v5826_v14 = vpack.c.bf16 %v4521_v12, %v4519_v11  ;;  %v4540_v12 = vld [vmem:[%s8567_s5 + $0x5b8] sm:$0xff] }
 0x7e3   : > { %5747 = vmatpush1.bf16.msra.mxu1 %v5746_v25  ;;  %v4350_v25 = vld [vmem:[%s8567_s5 + $0x428] sm:$0xff] }
 0x7e4   : > { %5749 = vmatprep.subr.bf16.mxu1 %v5748_v31  ;;  %v5830_v31 = vpack.c.bf16 %v4525_v24, %v4523_v23  ;;  %v5768_v33 = vpack.c.bf16 %v4352_v26, %v4350_v25  ;;  %v4366_v23 = vld [vmem:[%s8567_s5 + $0x628] sm:$0xff]  ;;  %v4544_v24 = vld [vmem:[%s8567_s5 + $0x638] sm:$0xff] }
 0x7e5   : > { %v4546_v26 = vld [vmem:[%s8567_s5 + $0x678] sm:$0xff] }
 0x7e7   : > { %5751 = vmatpush1.bf16.msra.mxu1 %v5750_v45  ;;  %v5770_v45 = vpack.c.bf16 %v4351_v37, %v4349_v36  ;;  %v4545_v36 = vld [vmem:[%s8567_s5 + $0x670] sm:$0xff]  ;;  %v4370_v37 = vld [vmem:[%s8567_s5 + $0x6a8] sm:$0xff] }
 0x7e8   : > { %5753 = vmatprep.subr.bf16.mxu1 %v5752_v46  ;;  %v5772_v46 = vpack.c.bf16 %v4356_v42, %v4354_v62  ;;  %v4550_v62 = vld [vmem:[%s8567_s5 + $0x6f8] sm:$0xff] }
 0x8ad   : > { %v4262_v49 = vpop.f32.mrb[2].mxu1 }
 0x8ae   : > { %v7908_v50 = vadd.f32 %v4262_v49, %v4189_v47  ;;  %v4264_v51 = vpop.f32.mrb[3].mxu1  ;;  %v4333_v47 = vld [vmem:[%s8567_s5 + $0x220] sm:$0xff]  ;;  %v4511_v49 = vld [vmem:[%s8567_s5 + $0x230] sm:$0xff] }
 0x8af   : > { %v7910_v53 = vadd.f32 %v4264_v51, %v4193_v48  ;;  %v4335_v48 = vld [vmem:[%s8567_s5 + $0x260] sm:$0xff]  ;;  %v5816_v51 = vpack.c.bf16 %v4514_v44, %v4512_v43  ;;  %v4532_v43 = vld [vmem:[%s8567_s5 + $0x4b8] sm:$0xff] }
 0x8b0   : > { %v4271_v54 = vsel %vm3783_vm1, %v7908_v50, 0.0  ;;  %v5754_v63 = vpack.c.bf16 %v4335_v48, %v4333_v47  ;;  %v4534_v44 = vld [vmem:[%s8567_s5 + $0x4f8] sm:$0xff]  ;;  %v4353_v47 = vld [vmem:[%s8567_s5 + $0x4a0] sm:$0xff] }
 0x8b1   : > { %v4272_v55 = vsel %vm3783_vm1, %v7910_v53, 0.0  ;;  %5817 = vmatprep.subr.bf16.mxu0 %v5816_v51  ;;  %v4355_v48 = vld [vmem:[%s8567_s5 + $0x4e0] sm:$0xff]  ;;  %v5836_v51 = vpack.c.bf16 %v4534_v44, %v4532_v43  ;;  %v5852_v43 = vpack.c.bf16 %v4550_v62, %v4548_v35 }
 0x8b2   : > { %v4273_v58 = vadd.f32 %v4272_v55, %v4271_v54  ;;  %v4513_v54 = vld [vmem:[%s8567_s5 + $0x270] sm:$0xff]  ;;  %v4338_v55 = vld [vmem:[%s8567_s5 + $0x2a8] sm:$0xff]  ;;  %5755 = vmatpush1.bf16.msra.mxu1 %v5754_v63  ;;  %v5774_v63 = vpack.c.bf16 %v4355_v48, %v4353_v47  ;;  %v4369_v44 = vld [vmem:[%s8567_s5 + $0x6a0] sm:$0xff] }
 0x8b3   : > { %v5818_v0 = vpack.c.bf16 %v4513_v54, %v4511_v49  ;;  %v4531_v49 = vld [vmem:[%s8567_s5 + $0x4b0] sm:$0xff]  ;;  %v4374_v48 = vld [vmem:[%s8567_s5 + $0x728] sm:$0xff] }
 0x8b4   : > { %4274 = vadd.xlane.f32.xlu0 %v4273_v58  ;;  %v4340_v58 = vld [vmem:[%s8567_s5 + $0x2e8] sm:$0xff]  ;;  %v4533_v54 = vld [vmem:[%s8567_s5 + $0x4f0] sm:$0xff] }
 0x8b5   : > { %v5756_v13 = vpack.c.bf16 %v4340_v58, %v4338_v55  ;;  %5819 = vmatpush1.bf16.msra.mxu0 %v5818_v0  ;;  %v4358_v55 = vld [vmem:[%s8567_s5 + $0x528] sm:$0xff]  ;;  %v5838_v0 = vpack.c.bf16 %v4533_v54, %v4531_v49  ;;  %v4549_v47 = vld [vmem:[%s8567_s5 + $0x6f0] sm:$0xff] }
 0x8b6   : > { %5821 = vmatprep.subr.bf16.mxu0 %v5820_v61  ;;  %v4360_v58 = vld [vmem:[%s8567_s5 + $0x568] sm:$0xff]  ;;  %v4535_v61 = vld [vmem:[%s8567_s5 + $0x530] sm:$0xff] }
 0x8b7   : > { %5757 = vmatprep.subr.bf16.mxu1 %v5756_v13  ;;  %v5776_v13 = vpack.c.bf16 %v4360_v58, %v4358_v55  ;;  %v5842_v5 = vpack.c.bf16 %v4537_v52, %v4535_v61  ;;  %v4376_v49 = vld [vmem:[%s8567_s5 + $0x768] sm:$0xff]  ;;  %v4552_v55 = vld [vmem:[%s8567_s5 + $0x738] sm:$0xff] }
 0x8b8   : > { %5759 = vmatpush1.bf16.msra.mxu1 %v5758_v9  ;;  %v5792_v54 = vpack.c.bf16 %v4376_v49, %v4374_v48  ;;  %v4554_v58 = vld [vmem:[%s8567_s5 + $0x778] sm:$0xff]  ;;  %v4695_v48 = vld [vmem:[%s8568_s6 + $0x1a0] sm:$0xff]  ;;  %v4696_v49 = vld [vmem:[%s8568_s6 + $0x1a8] sm:$0xff] }
 0x8b9   : > { %5823 = vmatpush1.bf16.msra.mxu0 %v5822_v57  ;;  %5761 = vmatprep.subr.bf16.mxu1 %v5760_v60  ;;  %v5856_v59 = vpack.c.bf16 %v4554_v58, %v4552_v55  ;;  %v4556_v61 = vld [vmem:[%s8567_s5 + $0x7b8] sm:$0xff]  ;;  %v4679_v55 = vld [vmem:[%s8568_s6 + $0x120] sm:$0xff]  ;;  %v4680_v58 = vld [vmem:[%s8568_s6 + $0x128] sm:$0xff] }
 0x8ba   : > { %5825 = vmatprep.subr.bf16.mxu0 %v5824_v34 }
 0x8bc   : > { %5763 = vmatpush1.bf16.msra.mxu1 %v5762_v19  ;;  %v5844_v19 = vpack.c.bf16 %v4542_v16, %v4540_v12 }
 0x8bd   : > { %5827 = vmatpush1.bf16.msra.mxu0 %v5826_v14  ;;  %5765 = vmatprep.subr.bf16.mxu1 %v5764_v20  ;;  %v5782_v14 = vpack.c.bf16 %v4363_v18, %v4361_v17  ;;  %v4539_v20 = vld [vmem:[%s8567_s5 + $0x5b0] sm:$0xff]  ;;  %v5337_v18 = vld [vmem:[%s8566_s4 + $0x7] ss:$8 sm:$0x3] }
 0x8be   : > { %5829 = vmatprep.subr.bf16.mxu0 %v5828_v41  ;;  %v5846_v22 = vpack.c.bf16 %v4541_v21, %v4539_v20  ;;  %v4368_v41 = vld [vmem:[%s8567_s5 + $0x668] sm:$0xff]  ;;  %v5341_v20 = vld [vmem:[%s8566_s4 + $0x13] ss:$8 sm:$0x3]  ;;  %v4295_v21 = vrot.slane %v5337_v18, %v7448_v30 }
 0x8bf   : > { %v5784_v25 = vpack.c.bf16 %v4368_v41, %v4366_v23 }
 0x8c0   : > { %5767 = vmatpush1.bf16.msra.mxu1 %v5766_v29  ;;  %v5848_v29 = vpack.c.bf16 %v4546_v26, %v4544_v24 }
 0x8c1   : > { %5831 = vmatpush1.bf16.msra.mxu0 %v5830_v31  ;;  %5769 = vmatprep.subr.bf16.mxu1 %v5768_v33  ;;  %v5786_v31 = vpack.c.bf16 %v4367_v28, %v4365_v27  ;;  %v4543_v33 = vld [vmem:[%s8567_s5 + $0x630] sm:$0xff]  ;;  %v4486_v28 = vrot.slane %v5341_v20, %v7448_v30 }
 0x8c2   : > { %5833 = vmatprep.subr.bf16.mxu0 %v5832_v39  ;;  %v5850_v38 = vpack.c.bf16 %v4545_v36, %v4543_v33  ;;  %v4372_v39 = vld [vmem:[%s8567_s5 + $0x6e8] sm:$0xff]  ;;  %v4675_v33 = vld [vmem:[%s8568_s6 + $0x100] sm:$0xff] }
 0x8c3   : > { %v5788_v42 = vpack.c.bf16 %v4372_v39, %v4370_v37  ;;  %v4676_v36 = vld [vmem:[%s8568_s6 + $0x108] sm:$0xff] }
 0x8c4   : > { %5771 = vmatpush1.bf16.msra.mxu1 %v5770_v45  ;;  %v4371_v45 = vld [vmem:[%s8567_s5 + $0x6e0] sm:$0xff]  ;;  %v5866_v62 = vpack.c.bf16 %v4676_v36, %v4675_v33 }
 0x8c5   : > { %5835 = vmatpush1.bf16.msra.mxu0 %v5834_v15  ;;  %5773 = vmatprep.subr.bf16.mxu1 %v5772_v46  ;;  %v4547_v15 = vld [vmem:[%s8567_s5 + $0x6b0] sm:$0xff]  ;;  %v5790_v46 = vpack.c.bf16 %v4371_v45, %v4369_v44 }
 0x8c6   : > { %5837 = vmatprep.subr.bf16.mxu0 %v5836_v51  ;;  %v5854_v51 = vpack.c.bf16 %v4549_v47, %v4547_v15  ;;  %v4678_v47 = vld [vmem:[%s8568_s6 + $0x118] sm:$0xff] }
 0x8c8   : > { %5775 = vmatpush1.bf16.msra.mxu1 %v5774_v63  ;;  %v4375_v63 = vld [vmem:[%s8567_s5 + $0x760] sm:$0xff] }
 0x8c9   : > { %5839 = vmatpush1.bf16.msra.mxu0 %v5838_v0  ;;  %5777 = vmatprep.subr.bf16.mxu1 %v5776_v13  ;;  %v4551_v0 = vld [vmem:[%s8567_s5 + $0x730] sm:$0xff]  ;;  %v5794_v1 = vpack.c.bf16 %v4375_v63, %v4373_v56  ;;  %v5874_v63 = vpack.c.bf16 %v4680_v58, %v4679_v55  ;;  %v4666_v55 = vld [vmem:[%s8568_s6 + $0xb8] sm:$0xff] }
 0x8ca   : > { %5841 = vmatprep.subr.bf16.mxu0 %v5840_v4  ;;  %v4553_v13 = vld [vmem:[%s8567_s5 + $0x770] sm:$0xff]  ;;  %v4380_v4 = vld [vmem:[%s8567_s5 + $0x7e8] sm:$0xff] }
 0x8cb   : > { %v5858_v52 = vpack.c.bf16 %v4553_v13, %v4551_v0  ;;  %v4697_v56 = vld [vmem:[%s8568_s6 + $0x1b0] sm:$0xff] }
 0x8cc   : > { %5779 = vmatpush1.bf16.msra.mxu1 %v5778_v8  ;;  %v5796_v8 = vpack.c.bf16 %v4380_v4, %v4378_v2  ;;  %v4681_v13 = vld [vmem:[%s8568_s6 + $0x130] sm:$0xff]  ;;  %v4699_v2 = vld [vmem:[%s8568_s6 + $0x1c0] sm:$0xff]  ;;  %v4700_v4 = vld [vmem:[%s8568_s6 + $0x1c8] sm:$0xff] }
 0x8cd   : > { %5843 = vmatpush1.bf16.msra.mxu0 %v5842_v5  ;;  %v4558_v5 = vld [vmem:[%s8567_s5 + $0x7f8] sm:$0xff] }
 0x8ce   : > { %5845 = vmatprep.subr.bf16.mxu0 %v5844_v19  ;;  %v5340_v19 = vld [vmem:[%s8566_s4 + $0x12] ss:$8 sm:$0x3] }
 0x8cf   : > { %v4473_v23 = vrot.slane %v5340_v19, %v7448_v30  ;;  %v4477_v41 = vrot.slane %v5340_v19, %v7454_v32  ;;  %v4706_v19 = vld [vmem:[%s8568_s6 + $0x1f8] sm:$0xff] }
 0x8d1   : > { %5847 = vmatpush1.bf16.msra.mxu0 %v5846_v22  ;;  %v4299_v22 = vrot.slane %v5337_v18, %v7454_v32  ;;  %v4705_v18 = vld [vmem:[%s8568_s6 + $0x1f0] sm:$0xff] }
 0x8d2   : > { %5849 = vmatprep.subr.bf16.mxu0 %v5848_v29  ;;  %v4490_v29 = vrot.slane %v5341_v20, %v7454_v32  ;;  %v4689_v20 = vld [vmem:[%s8568_s6 + $0x170] sm:$0xff] }
 0x8d5   : > { %5851 = vmatpush1.bf16.msra.mxu0 %v5850_v38 }
 0x8d6   : > { %5853 = vmatprep.subr.bf16.mxu0 %v5852_v43 }
 0x8d9   : > { %5855 = vmatpush1.bf16.msra.mxu0 %v5854_v51 }
 0x8da   : > { %5857 = vmatprep.subr.bf16.mxu0 %v5856_v59  ;;  %v4698_v59 = vld [vmem:[%s8568_s6 + $0x1b8] sm:$0xff] }
 0x8db   : > { %v5876_v0 = vpack.c.bf16 %v4698_v59, %v4697_v56  ;;  %v4649_v59 = vld [vmem:[%s8568_s6 + $0x30] sm:$0xff] }
 0x8dd   : > { %5859 = vmatpush1.bf16.msra.mxu0 %v5858_v52  ;;  %v5880_v52 = vpack.c.bf16 %v4700_v4, %v4699_v2  ;;  %v4651_v4 = vld [vmem:[%s8568_s6 + $0x40] sm:$0xff] }
 0x941   : > { %v4275_v6 = vpop.xlane.xlu0 %4274 }
 0x942   : > { %v4276_v7 = vmul.f32 0.00390625, %v4275_v6  ;;  %v4377_v6 = vld [vmem:[%s8567_s5 + $0x7a0] sm:$0xff] }
 0x944   : > { %v8181_v9 = vsub.f32 %v7908_v50, %v4276_v7  ;;  %v8184_v57 = vsub.f32 %v7910_v53, %v4276_v7  ;;  %v4362_v50 = vld [vmem:[%s8567_s5 + $0x5a8] sm:$0xff]  ;;  %v4379_v7 = vld [vmem:[%s8567_s5 + $0x7e0] sm:$0xff] }
 0x945   : > { %v4364_v53 = vld [vmem:[%s8567_s5 + $0x5e8] sm:$0xff] }
 0x946   : > { %v4279_v60 = vmul.f32 %v8181_v9, %v8181_v9  ;;  %v4280_v10 = vmul.f32 %v8184_v57, %v8184_v57  ;;  %v5780_v3 = vpack.c.bf16 %v4364_v53, %v4362_v50  ;;  %v4691_v50 = vld [vmem:[%s8568_s6 + $0x180] sm:$0xff]  ;;  %v4692_v53 = vld [vmem:[%s8568_s6 + $0x188] sm:$0xff] }
 0x947   : > { %v5864_v12 = vpack.c.bf16 %v4692_v53, %v4691_v50  ;;  %v4704_v50 = vld [vmem:[%s8568_s6 + $0x1e8] sm:$0xff] }
 0x948   : > { %v4281_v40 = vsel %vm3783_vm1, %v4279_v60, 0.0  ;;  %v4282_v11 = vsel %vm3783_vm1, %v4280_v10, 0.0  ;;  %5781 = vmatprep.subr.bf16.mxu1 %v5780_v3  ;;  %v5860_v60 = vpack.c.bf16 %v4558_v5, %v4556_v61  ;;  %v4555_v10 = vld [vmem:[%s8567_s5 + $0x7b0] sm:$0xff]  ;;  %v4684_v5 = vld [vmem:[%s8568_s6 + $0x148] sm:$0xff] }
 0x949   : > { %v4283_v34 = vadd.f32 %v4282_v11, %v4281_v40  ;;  %5783 = vmatpush1.bf16.msra.mxu1 %v5782_v14  ;;  %v4557_v40 = vld [vmem:[%s8567_s5 + $0x7f0] sm:$0xff]  ;;  %v5798_v11 = vpack.c.bf16 %v4379_v7, %v4377_v6  ;;  %v4702_v7 = vld [vmem:[%s8568_s6 + $0x1d8] sm:$0xff] }
 0x94a   : > { %5785 = vmatprep.subr.bf16.mxu1 %v5784_v25  ;;  %5861 = vmatprep.subr.bf16.mxu0 %v5860_v60  ;;  %v5338_v14 = vld [vmem:[%s8566_s4 + $0x10] ss:$8 sm:$0x3] }
 0x94b   : > { %4284 = vadd.xlane.f32.xlu1 %v4283_v34  ;;  %v5862_v34 = vpack.c.bf16 %v4557_v40, %v4555_v10  ;;  %v4308_v25 = vrot.slane %v5338_v14, %v7448_v30  ;;  %v4312_v26 = vrot.slane %v5338_v14, %v7454_v32  ;;  %v4701_v6 = vld [vmem:[%s8568_s6 + $0x1d0] sm:$0xff]  ;;  %v5892_v14 = vpack.c.bf16 %v4706_v19, %v4705_v18  ;;  %v4658_v19 = vld [vmem:[%s8568_s6 + $0x78] sm:$0xff] }
 0x94c   : > { %v5884_v10 = vpack.c.bf16 %v4702_v7, %v4701_v6  ;;  %v4685_v40 = vld [vmem:[%s8568_s6 + $0x150] sm:$0xff] }
 0x94d   : > { %5787 = vmatpush1.bf16.msra.mxu1 %v5786_v31  ;;  %5863 = vmatpush1.bf16.msra.mxu0 %v5862_v34  ;;  %v4703_v34 = vld [vmem:[%s8568_s6 + $0x1e0] sm:$0xff]  ;;  %v4653_v7 = vld [vmem:[%s8568_s6 + $0x50] sm:$0xff] }
 0x94e   : > { %5789 = vmatprep.subr.bf16.mxu1 %v5788_v42  ;;  %v4657_v18 = vld [vmem:[%s8568_s6 + $0x70] sm:$0xff] }
 0x951   : > { %5791 = vmatpush1.bf16.msra.mxu1 %v5790_v46  ;;  %v4677_v46 = vld [vmem:[%s8568_s6 + $0x110] sm:$0xff] }
 0x952   : > { %5793 = vmatprep.subr.bf16.mxu1 %v5792_v54  ;;  %v5870_v51 = vpack.c.bf16 %v4678_v47, %v4677_v46  ;;  %v5872_v54 = vpack.c.bf16 %v4696_v49, %v4695_v48  ;;  %v4664_v46 = vld [vmem:[%s8568_s6 + $0xa8] sm:$0xff]  ;;  %v4647_v49 = vld [vmem:[%s8568_s6 + $0x20] sm:$0xff] }
 0x955   : > { %5795 = vmatpush1.bf16.msra.mxu1 %v5794_v1  ;;  %v4682_v1 = vld [vmem:[%s8568_s6 + $0x138] sm:$0xff] }
 0x956   : > { %5797 = vmatprep.subr.bf16.mxu1 %v5796_v8  ;;  %v5878_v61 = vpack.c.bf16 %v4682_v1, %v4681_v13  ;;  %v4683_v8 = vld [vmem:[%s8568_s6 + $0x140] sm:$0xff]  ;;  %v4668_v13 = vld [vmem:[%s8568_s6 + $0xc8] sm:$0xff] }
 0x957   : > { %v5882_v60 = vpack.c.bf16 %v4684_v5, %v4683_v8  ;;  %v4670_v8 = vld [vmem:[%s8568_s6 + $0xd8] sm:$0xff] }
 0x959   : > { %5799 = vmatpush1.bf16.msra.mxu1 %v5798_v11  ;;  %v4686_v11 = vld [vmem:[%s8568_s6 + $0x158] sm:$0xff] }
 0x95a   : > { %5865 = vmatprep.subr.bf16.mxu1 %v5864_v12  ;;  %v5886_v53 = vpack.c.bf16 %v4686_v11, %v4685_v40  ;;  %v5888_v12 = vpack.c.bf16 %v4704_v50, %v4703_v34  ;;  %v4672_v40 = vld [vmem:[%s8568_s6 + $0xe8] sm:$0xff]  ;;  %v4655_v50 = vld [vmem:[%s8568_s6 + $0x60] sm:$0xff] }
 0x9d8   : > { %v4285_v3 = vpop.xlane.xlu1 %4284 }
 0x9d9   : > { %v4286_v16 = vmul.f32 0.00390625, %v4285_v3  ;;  %v4687_v3 = vld [vmem:[%s8568_s6 + $0x160] sm:$0xff] }
 0x9db   : > { %v4287_v17 = vadd.f32 1e-05, %v4286_v16  ;;  %v4688_v16 = vld [vmem:[%s8568_s6 + $0x168] sm:$0xff] }
 0x9dd   : > { %6625 = vrsqrt.f32 %v4287_v17  ;;  %v5890_v17 = vpack.c.bf16 %v4688_v16, %v4687_v3  ;;  %v4674_v3 = vld [vmem:[%s8568_s6 + $0xf8] sm:$0xff] }
 0x9e7   : > { %v6626_v24 = vpop.eup %6625 }
 0x9e8   : > { %v4290_v27 = vmul.f32 %v6626_v24, %v8184_v57  ;;  %v4289_v31 = vmul.f32 %v6626_v24, %v8181_v9  ;;  %v4693_v57 = vld [vmem:[%s8568_s6 + $0x190] sm:$0xff]  ;;  %v4694_v9 = vld [vmem:[%s8568_s6 + $0x198] sm:$0xff] }
 0x9e9   : > { %v5868_v15 = vpack.c.bf16 %v4694_v9, %v4693_v57 }
 0x9ea   : > { %v4303_v37 = vmul.f32 %v4299_v22, %v4290_v27  ;;  %v4481_v38 = vmul.f32 %v4477_v41, %v4290_v27  ;;  %v4302_v39 = vmul.f32 %v4295_v21, %v4289_v31  ;;  %v4480_v35 = vmul.f32 %v4473_v23, %v4289_v31  ;;  %v4690_v21 = vld [vmem:[%s8568_s6 + $0x178] sm:$0xff]  ;;  %v4659_v23 = vld [vmem:[%s8568_s6 + $0x80] sm:$0xff]  ;;  %v4660_v41 = vld [vmem:[%s8568_s6 + $0x88] sm:$0xff] }
 0x9eb   : > { %v5894_v22 = vpack.c.bf16 %v4690_v21, %v4689_v20  ;;  %v5896_v24 = vpack.c.bf16 %v4660_v41, %v4659_v23  ;;  %v4644_v31 = vld [vmem:[%s8568_s6 + $0x8] sm:$0xff] }
 0x9ec   : > { %v4316_v42 = vadd.f32 %v4312_v26, %v4303_v37  ;;  %v4494_v43 = vadd.f32 %v4490_v29, %v4481_v38  ;;  %v4315_v44 = vadd.f32 %v4308_v25, %v4302_v39  ;;  %v4493_v45 = vadd.f32 %v4486_v28, %v4480_v35  ;;  %v5342_v25 = vld [vmem:[%s8566_s4 + $0x14] ss:$8 sm:$0x3]  ;;  %v8442_v26 = vld [vmem:[%s8566_s4 + $0x11] ss:$8 sm:$0x3] }
 0x9ed   : > { %v4569_v27 = vrot.slane %v5342_v25, %v7454_v32  ;;  %v4565_v28 = vrot.slane %v5342_v25, %v7448_v30  ;;  %v4643_v29 = vld [vmem:[%s8568_s6] sm:$0xff]  ;;  %v4391_v37 = vrot.slane %v8442_v26, %v7454_v32  ;;  %v4661_v38 = vld [vmem:[%s8568_s6 + $0x90] sm:$0xff]  ;;  %v4662_v39 = vld [vmem:[%s8568_s6 + $0x98] sm:$0xff]  ;;  %v4387_v20 = vrot.slane %v8442_v26, %v7448_v30 }
 0x9ee   : > { %4458 = vmatprep.mubr.f32.mxu1 %v4316_v42  ;;  %4636 = vmatprep.mubr.f32.mxu0 %v4494_v43  ;;  %v5900_v43 = vpack.c.bf16 %v4662_v39, %v4661_v38  ;;  %v4646_v32 = vld [vmem:[%s8568_s6 + $0x18] sm:$0xff] }
 0x9ef   : > { %4459 = vmatmul.mubr.f32.vlgmr.msra.gmra.mrb[4].mxu1 %v4315_v44  ;;  %4637 = vmatmul.mubr.f32.vlgmr.msra.gmra.mrb[2].mxu0 %v4493_v45  ;;  %v4645_v44 = vld [vmem:[%s8568_s6 + $0x10] sm:$0xff] }
 0x9f0   : > { %5867 = vmatpush3.bf16.msra.mxu1 %v5866_v62  ;;  %v5898_v62 = vpack.c.bf16 %v4644_v31, %v4643_v29  ;;  %v5902_v47 = vpack.c.bf16 %v4646_v32, %v4645_v44 }
 0x9f1   : > { %5869 = vmatprep.subr.bf16.mxu1 %v5868_v15  ;;  %v4663_v15 = vld [vmem:[%s8568_s6 + $0xa0] sm:$0xff] }
 0x9f2   : > { %v5904_v48 = vpack.c.bf16 %v4664_v46, %v4663_v15 }
 0x9f4   : > { %5871 = vmatpush3.bf16.msra.mxu1 %v5870_v51  ;;  %v4648_v51 = vld [vmem:[%s8568_s6 + $0x28] sm:$0xff] }
 0x9f5   : > { %5873 = vmatprep.subr.bf16.mxu1 %v5872_v54  ;;  %v4665_v54 = vld [vmem:[%s8568_s6 + $0xb0] sm:$0xff]  ;;  %v5906_v58 = vpack.c.bf16 %v4648_v51, %v4647_v49 }
 0x9f6   : > { %v5908_v56 = vpack.c.bf16 %v4666_v55, %v4665_v54 }
 0x9f8   : > { %5875 = vmatpush3.bf16.msra.mxu1 %v5874_v63  ;;  %v4650_v63 = vld [vmem:[%s8568_s6 + $0x38] sm:$0xff] }
 0x9f9   : > { %5877 = vmatprep.subr.bf16.mxu1 %v5876_v0  ;;  %v4667_v0 = vld [vmem:[%s8568_s6 + $0xc0] sm:$0xff]  ;;  %v5910_v1 = vpack.c.bf16 %v4650_v63, %v4649_v59 }
 0x9fa   : > { %v5912_v2 = vpack.c.bf16 %v4668_v13, %v4667_v0 }
 0x9fc   : > { %5879 = vmatpush3.bf16.msra.mxu1 %v5878_v61  ;;  %v4652_v61 = vld [vmem:[%s8568_s6 + $0x48] sm:$0xff] }
 0x9fd   : > { %5881 = vmatprep.subr.bf16.mxu1 %v5880_v52  ;;  %v4669_v52 = vld [vmem:[%s8568_s6 + $0xd0] sm:$0xff]  ;;  %v5914_v5 = vpack.c.bf16 %v4652_v61, %v4651_v4 }
 0x9fe   : > { %v5916_v6 = vpack.c.bf16 %v4670_v8, %v4669_v52 }
 0xa00   : > { %5883 = vmatpush3.bf16.msra.mxu1 %v5882_v60  ;;  %v4654_v60 = vld [vmem:[%s8568_s6 + $0x58] sm:$0xff] }
 0xa01   : > { %5885 = vmatprep.subr.bf16.mxu1 %v5884_v10  ;;  %v4671_v10 = vld [vmem:[%s8568_s6 + $0xe0] sm:$0xff]  ;;  %v5918_v11 = vpack.c.bf16 %v4654_v60, %v4653_v7 }
 0xa02   : > { %v5920_v34 = vpack.c.bf16 %v4672_v40, %v4671_v10 }
 0xa04   : > { %5887 = vmatpush3.bf16.msra.mxu1 %v5886_v53  ;;  %v4656_v53 = vld [vmem:[%s8568_s6 + $0x68] sm:$0xff] }
 0xa05   : > { %5889 = vmatprep.subr.bf16.mxu1 %v5888_v12  ;;  %v4673_v12 = vld [vmem:[%s8568_s6 + $0xf0] sm:$0xff]  ;;  %v5922_v16 = vpack.c.bf16 %v4656_v53, %v4655_v50 }
 0xa08   : > { %5891 = vmatpush3.bf16.msra.mxu1 %v5890_v17  ;;  %v5924_v17 = vpack.c.bf16 %v4674_v3, %v4673_v12 }
 0xa09   : > { %5893 = vmatprep.subr.bf16.mxu1 %v5892_v14  ;;  %v5926_v14 = vpack.c.bf16 %v4658_v19, %v4657_v18 }
 0xa0c   : > { %5895 = vmatpush3.bf16.msra.mxu1 %v5894_v22 }
 0xa0d   : > { %5897 = vmatprep.subr.bf16.mxu1 %v5896_v24 }
 0xac2   : > { %v8452_v33 = vpop.f32.mrb[4].mxu1  ;;  %v4638_v36 = vpop.f32.mrb[2].mxu0 }
 0xac3   : > { %v4462_v35 = vpop.f32.mrb[5].mxu1  ;;  %v4640_v57 = vpop.f32.mrb[3].mxu0  ;;  %v4639_v42 = vadd.f32 %v4638_v36, %v4565_v28  ;;  %v4461_v21 = vadd.f32 %v8452_v33, %v4387_v20  ;;  %v5343_v28 = vld [vmem:[%s8569_s7] ss:$0 sm:$0xff] }
 0xac4   : > { %v4641_v9 = vadd.f32 %v4640_v57, %v4569_v27  ;;  %v4463_v45 = vadd.f32 %v4462_v35, %v4391_v37 }
 0xac6   : > { %4771 = vmatprep.mubr.f32.mxu1 %v4641_v9 }
 0xac7   : > { %4772 = vmatmul.mubr.f32.vlgmr.msra.gmra.mrb[6].mxu1 %v4639_v42 }
 0xac8   : > { %5899 = vmatpush3.bf16.msra.mxu1 %v5898_v62  ;;  %4841 = vmatprep.mubr.f32.mxu1 %v4463_v45 }
 0xac9   : > { %5901 = vmatprep.subr.bf16.mxu1 %v5900_v43 }
 0xacc   : > { %5903 = vmatpush3.bf16.msra.mxu1 %v5902_v47 }
 0xacd   : > { %5905 = vmatprep.subr.bf16.mxu1 %v5904_v48 }
 0xad0   : > { %5907 = vmatpush3.bf16.msra.mxu1 %v5906_v58 }
 0xad1   : > { %5909 = vmatprep.subr.bf16.mxu1 %v5908_v56 }
 0xad4   : > { %5911 = vmatpush3.bf16.msra.mxu1 %v5910_v1 }
 0xad5   : > { %5913 = vmatprep.subr.bf16.mxu1 %v5912_v2 }
 0xad8   : > { %5915 = vmatpush3.bf16.msra.mxu1 %v5914_v5 }
 0xad9   : > { %5917 = vmatprep.subr.bf16.mxu1 %v5916_v6 }
 0xadc   : > { %5919 = vmatpush3.bf16.msra.mxu1 %v5918_v11 }
 0xadd   : > { %5921 = vmatprep.subr.bf16.mxu1 %v5920_v34 }
 0xae0   : > { %5923 = vmatpush3.bf16.msra.mxu1 %v5922_v16 }
 0xae1   : > { %5925 = vmatprep.subr.bf16.mxu1 %v5924_v17 }
 0xae4   : > { %5927 = vmatpush3.bf16.msra.mxu1 %v5926_v14 }
 0xae7   : > { %4842 = vmatmul.mubr.f32.vlgmr.msra.gmra.mrb[8].mxu1 %v4461_v21 }
 0xb9a   : > { %v5378_v22 = vpop.f32.mrb[6].mxu1 }
 0xb9b   : > { %v5379_v23 = vpop.f32.mrb[7].mxu1 }
 0xb9c   : > { %v5380_v41 = vadd.f32 %v5379_v23, %v5378_v22 }
 0xbba   : > { %v5413_v24 = vpop.f32.mrb[8].mxu1 }
 0xbbb   : > { %v5414_v25 = vpop.f32.mrb[9].mxu1 }
 0xbbc   : > { %v5415_v27 = vadd.f32 %v5414_v25, %v5413_v24 }
 0xbbe   : > { %v4844_v29 = vadd.f32 %v5415_v27, %v5380_v41 }
 0xbc0   : > { %v4854_v31 = vadd.f32 %v5343_v28, %v4844_v29 }
 0xbc2   : > { %4855 = vst [vmem:[%s8571_s9] sm:$0x3] %v4854_v31 }
 0xbc3 PF: > { %s8590_s12 = sld [smem:[#allocation11_spill]]  ;;  %p21_p7 = scmp.ge.s32.totalorder %s6835_s14, 5  }
 0xbc4   : > { %s8591_s30 = smov %s6743_s10  ;;  %s8592_s10 = smov %s6747_s11 }
 0xbc5   :  { %23 = sbr.rel (!%p21_p7) target bundleno = 6 (0x6), region = 128 }
 0xbc9   : > { %s8593_s11 = smov %s8590_s12  ;;  %s8594_s12 = smov %s6835_s14 }
 0xbcc   :  { %4873 = vsyncpa [#allocation5], 1 }
 0xbcd   :  { %4875 = vsyncpa [#allocation5 + $0x1], 1 }
 0xbce   :  { %4876 = vsyncpa [#allocation7], 1 }

</bundles_post_ra>
